<compile_context>
chip_gen: v7x
topology: tpu7x:2x2x1
jax: 0.10.0
libtpu: 0.0.40
codegen_flags: <defaults>
</compile_context>

<pallas_src>
import math
import functools

import jax
import jax.numpy as jnp
from jax.experimental import pallas as pl
from jax.experimental.pallas import tpu as pltpu


def _round_up(x, m):
    return (x + m - 1) // m * m


# ---------------------------------------------------------------------------
# Pallas kernel: (M,N,K)-tiled matmul, f32 accumulation into the resident output
# block, fused bias + optional LeakyReLU + optional skip-add + post-scale.
# ---------------------------------------------------------------------------
def _mm_kernel(*refs, apply_leaky, neg_slope, has_skip, post_scale):
    if has_skip:
        a_ref, b_ref, bias_ref, skip_ref, o_ref = refs
    else:
        a_ref, b_ref, bias_ref, o_ref = refs
        skip_ref = None

    k = pl.program_id(2)

    @pl.when(k == 0)
    def _():
        o_ref[...] = jnp.zeros_like(o_ref)

    o_ref[...] += jnp.dot(a_ref[...], b_ref[...], preferred_element_type=jnp.float32)

    @pl.when(k == pl.num_programs(2) - 1)
    def _():
        y = o_ref[...] + bias_ref[...]          # (1, tn) broadcasts over rows
        if apply_leaky:
            y = jnp.where(y >= 0, y, neg_slope * y)
        if has_skip:
            y = y + skip_ref[...]
        o_ref[...] = y * post_scale


def _tile_policy(M, K, N):
    Np = _round_up(N, 128)
    tn = Np if Np <= 512 else 512
    Np = _round_up(Np, tn)
    Kp = _round_up(K, 128)
    tk = Kp if Kp <= 512 else 256
    Kp = _round_up(Kp, tk)
    Mp = _round_up(M, 8)
    tm = Mp if Mp <= 256 else 256
    Mp = _round_up(Mp, tm)
    return Mp, Kp, Np, tm, tk, tn


def matmul_bias_act(a, bmat, bias, *, leaky, neg_slope=0.2, skip=None, post_scale=None):
    """a:(M,K) @ bmat:(K,N) + bias, optional LeakyReLU, optional (+skip)*post_scale."""
    M, K = a.shape
    K2, N = bmat.shape
    assert K == K2
    Mp, Kp, Np, tm, tk, tn = _tile_policy(M, K, N)

    a_p = jnp.pad(a, ((0, Mp - M), (0, Kp - K))).astype(jnp.bfloat16)
    b_p = jnp.pad(bmat, ((0, Kp - K), (0, Np - N))).astype(jnp.bfloat16)
    bias_p = jnp.pad(bias.astype(jnp.float32), (0, Np - N)).reshape(1, Np)

    has_skip = skip is not None
    kernel = functools.partial(
        _mm_kernel,
        apply_leaky=leaky,
        neg_slope=neg_slope,
        has_skip=has_skip,
        post_scale=1.0 if post_scale is None else float(post_scale),
    )

    in_specs = [
        pl.BlockSpec((tm, tk), lambda i, j, k: (i, k)),
        pl.BlockSpec((tk, tn), lambda i, j, k: (k, j)),
        pl.BlockSpec((1, tn), lambda i, j, k: (0, j)),
    ]
    operands = [a_p, b_p, bias_p]
    if has_skip:
        skip_p = jnp.pad(skip.astype(jnp.float32), ((0, Mp - M), (0, Np - N)))
        in_specs.append(pl.BlockSpec((tm, tn), lambda i, j, k: (i, j)))
        operands.append(skip_p)

    out = pl.pallas_call(
        kernel,
        out_shape=jax.ShapeDtypeStruct((Mp, Np), jnp.float32),
        grid=(Mp // tm, Np // tn, Kp // tk),
        in_specs=in_specs,
        out_specs=pl.BlockSpec((tm, tn), lambda i, j, k: (i, j)),
        compiler_params=pltpu.CompilerParams(
            dimension_semantics=("parallel", "parallel", "arbitrary")),
    )(*operands)
    return out[:M, :N]


# ---------------------------------------------------------------------------
# Conv2d (NHWC) = im2col + Pallas matmul (bias / LeakyReLU / skip fused in-kernel).
# Weights are pre-transposed to (kh, kw, Cin, Cout).
# ---------------------------------------------------------------------------
def conv2d_nhwc(x, w, bias, *, stride=1, padding=0, leaky=False,
                skip=None, post_scale=None):
    B, H, W, Cin = x.shape
    kh, kw, Cin2, Cout = w.shape
    assert Cin == Cin2
    Ho = (H + 2 * padding - kh) // stride + 1
    Wo = (W + 2 * padding - kw) // stride + 1
    if padding:
        x = jnp.pad(x, ((0, 0), (padding, padding), (padding, padding), (0, 0)))

    if kh == 1 and kw == 1 and stride == 1:
        A = x.reshape(B * Ho * Wo, Cin)
    else:
        cols = []
        for di in range(kh):
            for dj in range(kw):
                cols.append(x[:, di:di + (Ho - 1) * stride + 1:stride,
                               dj:dj + (Wo - 1) * stride + 1:stride, :])
        patches = jnp.stack(cols, axis=3)           # (B, Ho, Wo, kh*kw, Cin)
        A = patches.reshape(B * Ho * Wo, kh * kw * Cin)

    Bm = w.reshape(kh * kw * Cin, Cout)
    skip_flat = None if skip is None else skip.reshape(B * Ho * Wo, Cout)
    out = matmul_bias_act(A, Bm, bias, leaky=leaky, skip=skip_flat,
                          post_scale=post_scale)
    return out.reshape(B, Ho, Wo, Cout)


# ---------------------------------------------------------------------------
# Module pieces (glue in plain JAX, all matmul compute goes through Pallas).
# ---------------------------------------------------------------------------
def add_coords(x):
    """AddCoords(with_r=False), NHWC: append normalized col / row coordinate channels.
    Matches the reference: col-index / (x_dim-1), row-index / (y_dim-1)."""
    b, h, w, _ = x.shape
    col = jnp.broadcast_to(jnp.arange(w, dtype=jnp.float32)[None, None, :, None],
                           (b, h, w, 1))
    row = jnp.broadcast_to(jnp.arange(h, dtype=jnp.float32)[None, :, None, None],
                           (b, h, w, 1))
    xx = col / (h - 1) * 2.0 - 1.0
    yy = row / (w - 1) * 2.0 - 1.0
    return jnp.concatenate([x, xx, yy], axis=-1)


def avg_pool2(x):
    b, h, w, c = x.shape
    return x.reshape(b, h // 2, 2, w // 2, 2, c).mean(axis=(2, 4))


def residual_coord_conv(x, p):
    # Sequential(CoordConv, LeakyReLU, CoordConv, LeakyReLU) -- LeakyReLU fused in kernel.
    k1 = p["c1"]["w"].shape[0]
    y = conv2d_nhwc(add_coords(x), p["c1"]["w"], p["c1"]["b"],
                    padding=k1 // 2, leaky=True)
    k2 = p["c2"]["w"].shape[0]
    y = conv2d_nhwc(add_coords(y), p["c2"]["w"], p["c2"]["b"],
                    padding=k2 // 2, leaky=True)
    # downsample=True always in this module
    y = avg_pool2(y)
    x = avg_pool2(x)
    if "proj" in p:
        # (proj(x) + y) / sqrt(2) fused into the 1x1 projection conv epilogue.
        return conv2d_nhwc(x, p["proj"]["w"], p["proj"]["b"], padding=0, leaky=False,
                           skip=y, post_scale=1.0 / math.sqrt(2))
    return (y + x) * (1.0 / math.sqrt(2))


IMG_SIZE_TO_LAYER = {2: 8, 4: 7, 8: 6, 16: 5, 32: 4, 64: 3, 128: 2, 256: 1, 512: 0}


def progressive_discriminator(params, x, alpha):
    start_idx = IMG_SIZE_TO_LAYER[x.shape[-1]]
    xh = jnp.transpose(x, (0, 2, 3, 1))          # NCHW -> NHWC once
    frgb = params["fromRGB"][start_idx]
    # ConvBlock(3, C, 1, 0, 1, Instance_layer=False): 1x1 conv + LeakyReLU(0.2)
    h = conv2d_nhwc(xh, frgb["w"], frgb["b"], padding=0, leaky=True)
    for i, layer_idx in enumerate(range(start_idx, len(params["layers"]))):
        if i == 1:
            x_half = xh[:, ::2, ::2, :]          # F.interpolate(scale=0.5, 'nearest')
            frgb2 = params["fromRGB"][start_idx + 1]
            skip = conv2d_nhwc(x_half, frgb2["w"], frgb2["b"], padding=0, leaky=True)
            h = alpha * h + (1.0 - alpha) * skip
        h = residual_coord_conv(h, params["layers"][layer_idx])
    out = conv2d_nhwc(h, params["final"]["w"], params["final"]["b"],
                      padding=0, leaky=False)
    return out.reshape(out.shape[0], 1)


# ---------------------------------------------------------------------------
# Deterministic parameter initialization (PyTorch default-style uniform), with
# weights pre-transposed to the NHWC im2col K-ordering and cast to bf16 once.
# ---------------------------------------------------------------------------
def _conv_params(key, out_c, in_c, k):
    kw_key, kb_key = jax.random.split(key)
    bound = 1.0 / math.sqrt(in_c * k * k)
    w = jax.random.uniform(kw_key, (out_c, in_c, k, k), jnp.float32, -bound, bound)
    b = jax.random.uniform(kb_key, (out_c,), jnp.float32, -bound, bound)
    return w, b


def _prep(w, b):
    # (Cout, Cin, kh, kw) -> (kh, kw, Cin, Cout) bf16; bias stays f32.
    return {"w": jnp.transpose(w, (2, 3, 1, 0)).astype(jnp.bfloat16),
            "b": b.astype(jnp.float32)}


def init_params(key):
    layer_io = [(16, 32), (32, 64), (64, 128), (128, 256),
                (256, 400), (400, 400), (400, 400), (400, 400)]
    from_rgb_out = [16, 32, 64, 128, 256, 400, 400, 400, 400]
    keys = jax.random.split(key, 64)
    ki = 0
    params = {"fromRGB": [], "layers": []}
    for oc in from_rgb_out:
        w, b = _conv_params(keys[ki], oc, 3, 1); ki += 1
        params["fromRGB"].append(_prep(w, b))
    for ic, oc in layer_io:
        w1, b1 = _conv_params(keys[ki], oc, ic + 2, 3); ki += 1   # CoordConv adds 2 ch
        w2, b2 = _conv_params(keys[ki], oc, oc + 2, 3); ki += 1
        layer = {"c1": _prep(w1, b1), "c2": _prep(w2, b2)}
        if ic != oc:
            wp, bp = _conv_params(keys[ki], oc, ic, 1); ki += 1
            layer["proj"] = _prep(wp, bp)
        params["layers"].append(layer)
    wf, bf = _conv_params(keys[ki], 1, 400, 2); ki += 1
    params["final"] = _prep(wf, bf)
    return params


if __name__ == "__main__":
    key = jax.random.PRNGKey(0)
    pkey, xkey1, xkey2 = jax.random.split(key, 3)
    params = init_params(pkey)

    fwd = jax.jit(progressive_discriminator)

    # 8x8 RGB input -> start_idx=6 -> fromRGB[6], alpha blend, layers 6-7, final conv.
    x8 = jax.random.normal(xkey1, (2, 3, 8, 8), dtype=jnp.float32)
    out8 = fwd(params, x8, jnp.float32(0.7))
    jax.block_until_ready(out8)
    assert out8.shape == (2, 1) and out8.dtype == jnp.float32
    assert bool(jnp.all(jnp.isfinite(out8)))

    # 32x32 RGB input -> start_idx=4 -> exercises the fused projection-residual path.
    x32 = jax.random.normal(xkey2, (2, 3, 32, 32), dtype=jnp.float32)
    out32 = fwd(params, x32, jnp.float32(0.3))
    jax.block_until_ready(out32)
    assert out32.shape == (2, 1) and out32.dtype == jnp.float32
    assert bool(jnp.all(jnp.isfinite(out32)))

    print("KERNEL_OK")
</pallas_src>

<mosaic_0001>
module attributes {stable_mosaic.version = 11 : i64} {
  func.func @_mm_kernel(%arg0: i32, %arg1: i32, %arg2: i32, %arg3: memref<128x128xbf16, #tpu.memory_space<vmem>>, %arg4: memref<128x512xbf16, #tpu.memory_space<vmem>>, %arg5: memref<1x512xf32, #tpu.memory_space<vmem>>, %arg6: memref<128x512xf32, #tpu.memory_space<vmem>>) attributes {dimension_semantics = [#tpu.dimension_semantics<parallel>, #tpu.dimension_semantics<parallel>, #tpu.dimension_semantics<arbitrary>], iteration_bounds = array<i64: 1, 1, 1>, scalar_prefetch = 0 : i64, scratch_operands = 0 : i64, tpu.core_type = #tpu.core_type<tc>, window_params = [{transform_indices = @transform_0, window_bounds = array<i64: 128, 128>}, {transform_indices = @transform_1, window_bounds = array<i64: 128, 512>}, {transform_indices = @transform_2, window_bounds = array<i64: 1, 512>}, {transform_indices = @transform_3, window_bounds = array<i64: 128, 512>}]} {
    %c0_i32 = arith.constant 0 : i32
    %0 = arith.cmpi eq, %arg2, %c0_i32 : i32
    %1 = arith.extui %0 : i1 to i32
    %c0_i32_0 = arith.constant 0 : i32
    %2 = arith.cmpi ne, %1, %c0_i32_0 : i32
    scf.if %2 {
      %cst_10 = arith.constant 0.000000e+00 : f32
      %12 = vector.broadcast %cst_10 : f32 to vector<128x512xf32>
      %c0_11 = arith.constant 0 : index
      %c0_12 = arith.constant 0 : index
      %13 = vector.load %arg6[%c0_11, %c0_12] : memref<128x512xf32, #tpu.memory_space<vmem>>, vector<128x512xf32>
      tpu.vector_store %arg6[%c0_11, %c0_12], %12 {strides = array<i32>} : memref<128x512xf32, #tpu.memory_space<vmem>>, vector<128x512xf32>,
    } else {
    }
    %c0 = arith.constant 0 : index
    %c0_1 = arith.constant 0 : index
    %3 = vector.load %arg6[%c0, %c0_1] : memref<128x512xf32, #tpu.memory_space<vmem>>, vector<128x512xf32>
    %c0_2 = arith.constant 0 : index
    %c0_3 = arith.constant 0 : index
    %4 = vector.load %arg3[%c0_2, %c0_3] : memref<128x128xbf16, #tpu.memory_space<vmem>>, vector<128x128xbf16>
    %c0_4 = arith.constant 0 : index
    %c0_5 = arith.constant 0 : index
    %5 = vector.load %arg4[%c0_4, %c0_5] : memref<128x512xbf16, #tpu.memory_space<vmem>>, vector<128x512xbf16>
    %cst = arith.constant dense<0.000000e+00> : vector<128x512xf32>
    %6 = tpu.matmul %4, %5, %cst {dimension_numbers = #tpu.dot_dimension_numbers<[1], [0], [0], [1], [0, 0, 1, 1], [], []>} : vector<128x128xbf16>, vector<128x512xbf16>, vector<128x512xf32> -> vector<128x512xf32>
    %7 = arith.addf %3, %6 : vector<128x512xf32>
    %c0_6 = arith.constant 0 : index
    %c0_7 = arith.constant 0 : index
    %8 = vector.load %arg6[%c0_6, %c0_7] : memref<128x512xf32, #tpu.memory_space<vmem>>, vector<128x512xf32>
    tpu.vector_store %arg6[%c0_6, %c0_7], %7 {strides = array<i32>} : memref<128x512xf32, #tpu.memory_space<vmem>>, vector<128x512xf32>,
    %c0_i32_8 = arith.constant 0 : i32
    %9 = arith.cmpi eq, %arg2, %c0_i32_8 : i32
    %10 = arith.extui %9 : i1 to i32
    %c0_i32_9 = arith.constant 0 : i32
    %11 = arith.cmpi ne, %10, %c0_i32_9 : i32
    scf.if %11 {
      %c0_10 = arith.constant 0 : index
      %c0_11 = arith.constant 0 : index
      %12 = vector.load %arg6[%c0_10, %c0_11] : memref<128x512xf32, #tpu.memory_space<vmem>>, vector<128x512xf32>
      %c0_12 = arith.constant 0 : index
      %c0_13 = arith.constant 0 : index
      %13 = vector.load %arg5[%c0_12, %c0_13] : memref<1x512xf32, #tpu.memory_space<vmem>>, vector<1x512xf32>
      %14 = vector.broadcast %13 : vector<1x512xf32> to vector<128x512xf32>
      %15 = arith.addf %12, %14 : vector<128x512xf32>
      %cst_14 = arith.constant 0.000000e+00 : f32
      %16 = vector.broadcast %cst_14 : f32 to vector<128x512xf32>
      %17 = arith.cmpf oge, %15, %16 : vector<128x512xf32>
      %cst_15 = arith.constant 2.000000e-01 : f32
      %18 = vector.broadcast %cst_15 : f32 to vector<128x512xf32>
      %19 = arith.mulf %18, %15 : vector<128x512xf32>
      %20 = arith.select %17, %15, %19 : vector<128x512xi1>, vector<128x512xf32>
      %cst_16 = arith.constant 1.000000e+00 : f32
      %21 = vector.broadcast %cst_16 : f32 to vector<128x512xf32>
      %22 = arith.mulf %20, %21 : vector<128x512xf32>
      %c0_17 = arith.constant 0 : index
      %c0_18 = arith.constant 0 : index
      %23 = vector.load %arg6[%c0_17, %c0_18] : memref<128x512xf32, #tpu.memory_space<vmem>>, vector<128x512xf32>
      tpu.vector_store %arg6[%c0_17, %c0_18], %22 {strides = array<i32>} : memref<128x512xf32, #tpu.memory_space<vmem>>, vector<128x512xf32>,
    } else {
    }
    return
  }
  func.func @transform_0(%arg0: i32, %arg1: i32, %arg2: i32) -> (i32, i32) {
    %c0_i32 = arith.constant 0 : i32
    return %arg0, %arg2 : i32, i32
  }
  func.func @transform_1(%arg0: i32, %arg1: i32, %arg2: i32) -> (i32, i32) {
    %c0_i32 = arith.constant 0 : i32
    return %arg2, %arg1 : i32, i32
  }
  func.func @transform_2(%arg0: i32, %arg1: i32, %arg2: i32) -> (i32, i32) {
    %c0_i32 = arith.constant 0 : i32
    %c0_i32_0 = arith.constant 0 : i32
    return %c0_i32, %arg1 : i32, i32
  }
  func.func @transform_3(%arg0: i32, %arg1: i32, %arg2: i32) -> (i32, i32) {
    %c0_i32 = arith.constant 0 : i32
    return %arg0, %arg1 : i32, i32
  }
}

module attributes {stable_mosaic.version = 11 : i64} {
  func.func @_mm_kernel(%arg0: i32, %arg1: i32, %arg2: i32, %arg3: memref<128x256xbf16, #tpu.memory_space<vmem>>, %arg4: memref<256x512xbf16, #tpu.memory_space<vmem>>, %arg5: memref<1x512xf32, #tpu.memory_space<vmem>>, %arg6: memref<128x512xf32, #tpu.memory_space<vmem>>) attributes {dimension_semantics = [#tpu.dimension_semantics<parallel>, #tpu.dimension_semantics<parallel>, #tpu.dimension_semantics<arbitrary>], iteration_bounds = array<i64: 1, 1, 15>, scalar_prefetch = 0 : i64, scratch_operands = 0 : i64, tpu.core_type = #tpu.core_type<tc>, window_params = [{transform_indices = @transform_0, window_bounds = array<i64: 128, 256>}, {transform_indices = @transform_1, window_bounds = array<i64: 256, 512>}, {transform_indices = @transform_2, window_bounds = array<i64: 1, 512>}, {transform_indices = @transform_3, window_bounds = array<i64: 128, 512>}]} {
    %c0_i32 = arith.constant 0 : i32
    %0 = arith.cmpi eq, %arg2, %c0_i32 : i32
    %1 = arith.extui %0 : i1 to i32
    %c0_i32_0 = arith.constant 0 : i32
    %2 = arith.cmpi ne, %1, %c0_i32_0 : i32
    scf.if %2 {
      %cst_9 = arith.constant 0.000000e+00 : f32
      %12 = vector.broadcast %cst_9 : f32 to vector<128x512xf32>
      %c0_10 = arith.constant 0 : index
      %c0_11 = arith.constant 0 : index
      %13 = vector.load %arg6[%c0_10, %c0_11] : memref<128x512xf32, #tpu.memory_space<vmem>>, vector<128x512xf32>
      tpu.vector_store %arg6[%c0_10, %c0_11], %12 {strides = array<i32>} : memref<128x512xf32, #tpu.memory_space<vmem>>, vector<128x512xf32>,
    } else {
    }
    %c0 = arith.constant 0 : index
    %c0_1 = arith.constant 0 : index
    %3 = vector.load %arg6[%c0, %c0_1] : memref<128x512xf32, #tpu.memory_space<vmem>>, vector<128x512xf32>
    %c0_2 = arith.constant 0 : index
    %c0_3 = arith.constant 0 : index
    %4 = vector.load %arg3[%c0_2, %c0_3] : memref<128x256xbf16, #tpu.memory_space<vmem>>, vector<128x256xbf16>
    %c0_4 = arith.constant 0 : index
    %c0_5 = arith.constant 0 : index
    %5 = vector.load %arg4[%c0_4, %c0_5] : memref<256x512xbf16, #tpu.memory_space<vmem>>, vector<256x512xbf16>
    %cst = arith.constant dense<0.000000e+00> : vector<128x512xf32>
    %6 = tpu.matmul %4, %5, %cst {dimension_numbers = #tpu.dot_dimension_numbers<[1], [0], [0], [1], [0, 0, 1, 1], [], []>} : vector<128x256xbf16>, vector<256x512xbf16>, vector<128x512xf32> -> vector<128x512xf32>
    %7 = arith.addf %3, %6 : vector<128x512xf32>
    %c0_6 = arith.constant 0 : index
    %c0_7 = arith.constant 0 : index
    %8 = vector.load %arg6[%c0_6, %c0_7] : memref<128x512xf32, #tpu.memory_space<vmem>>, vector<128x512xf32>
    tpu.vector_store %arg6[%c0_6, %c0_7], %7 {strides = array<i32>} : memref<128x512xf32, #tpu.memory_space<vmem>>, vector<128x512xf32>,
    %c14_i32 = arith.constant 14 : i32
    %9 = arith.cmpi eq, %arg2, %c14_i32 : i32
    %10 = arith.extui %9 : i1 to i32
    %c0_i32_8 = arith.constant 0 : i32
    %11 = arith.cmpi ne, %10, %c0_i32_8 : i32
    scf.if %11 {
      %c0_9 = arith.constant 0 : index
      %c0_10 = arith.constant 0 : index
      %12 = vector.load %arg6[%c0_9, %c0_10] : memref<128x512xf32, #tpu.memory_space<vmem>>, vector<128x512xf32>
      %c0_11 = arith.constant 0 : index
      %c0_12 = arith.constant 0 : index
      %13 = vector.load %arg5[%c0_11, %c0_12] : memref<1x512xf32, #tpu.memory_space<vmem>>, vector<1x512xf32>
      %14 = vector.broadcast %13 : vector<1x512xf32> to vector<128x512xf32>
      %15 = arith.addf %12, %14 : vector<128x512xf32>
      %cst_13 = arith.constant 0.000000e+00 : f32
      %16 = vector.broadcast %cst_13 : f32 to vector<128x512xf32>
      %17 = arith.cmpf oge, %15, %16 : vector<128x512xf32>
      %cst_14 = arith.constant 2.000000e-01 : f32
      %18 = vector.broadcast %cst_14 : f32 to vector<128x512xf32>
      %19 = arith.mulf %18, %15 : vector<128x512xf32>
      %20 = arith.select %17, %15, %19 : vector<128x512xi1>, vector<128x512xf32>
      %cst_15 = arith.constant 1.000000e+00 : f32
      %21 = vector.broadcast %cst_15 : f32 to vector<128x512xf32>
      %22 = arith.mulf %20, %21 : vector<128x512xf32>
      %c0_16 = arith.constant 0 : index
      %c0_17 = arith.constant 0 : index
      %23 = vector.load %arg6[%c0_16, %c0_17] : memref<128x512xf32, #tpu.memory_space<vmem>>, vector<128x512xf32>
      tpu.vector_store %arg6[%c0_16, %c0_17], %22 {strides = array<i32>} : memref<128x512xf32, #tpu.memory_space<vmem>>, vector<128x512xf32>,
    } else {
    }
    return
  }
  func.func @transform_0(%arg0: i32, %arg1: i32, %arg2: i32) -> (i32, i32) {
    %c0_i32 = arith.constant 0 : i32
    return %arg0, %arg2 : i32, i32
  }
  func.func @transform_1(%arg0: i32, %arg1: i32, %arg2: i32) -> (i32, i32) {
    %c0_i32 = arith.constant 0 : i32
    return %arg2, %arg1 : i32, i32
  }
  func.func @transform_2(%arg0: i32, %arg1: i32, %arg2: i32) -> (i32, i32) {
    %c0_i32 = arith.constant 0 : i32
    %c0_i32_0 = arith.constant 0 : i32
    return %c0_i32, %arg1 : i32, i32
  }
  func.func @transform_3(%arg0: i32, %arg1: i32, %arg2: i32) -> (i32, i32) {
    %c0_i32 = arith.constant 0 : i32
    return %arg0, %arg1 : i32, i32
  }
}

module attributes {stable_mosaic.version = 11 : i64} {
  func.func @_mm_kernel(%arg0: i32, %arg1: i32, %arg2: i32, %arg3: memref<32x128xbf16, #tpu.memory_space<vmem>>, %arg4: memref<128x512xbf16, #tpu.memory_space<vmem>>, %arg5: memref<1x512xf32, #tpu.memory_space<vmem>>, %arg6: memref<32x512xf32, #tpu.memory_space<vmem>>) attributes {dimension_semantics = [#tpu.dimension_semantics<parallel>, #tpu.dimension_semantics<parallel>, #tpu.dimension_semantics<arbitrary>], iteration_bounds = array<i64: 1, 1, 1>, scalar_prefetch = 0 : i64, scratch_operands = 0 : i64, tpu.core_type = #tpu.core_type<tc>, window_params = [{transform_indices = @transform_0, window_bounds = array<i64: 32, 128>}, {transform_indices = @transform_1, window_bounds = array<i64: 128, 512>}, {transform_indices = @transform_2, window_bounds = array<i64: 1, 512>}, {transform_indices = @transform_3, window_bounds = array<i64: 32, 512>}]} {
    %c0_i32 = arith.constant 0 : i32
    %0 = arith.cmpi eq, %arg2, %c0_i32 : i32
    %1 = arith.extui %0 : i1 to i32
    %c0_i32_0 = arith.constant 0 : i32
    %2 = arith.cmpi ne, %1, %c0_i32_0 : i32
    scf.if %2 {
      %cst_10 = arith.constant 0.000000e+00 : f32
      %12 = vector.broadcast %cst_10 : f32 to vector<32x512xf32>
      %c0_11 = arith.constant 0 : index
      %c0_12 = arith.constant 0 : index
      %13 = vector.load %arg6[%c0_11, %c0_12] : memref<32x512xf32, #tpu.memory_space<vmem>>, vector<32x512xf32>
      tpu.vector_store %arg6[%c0_11, %c0_12], %12 {strides = array<i32>} : memref<32x512xf32, #tpu.memory_space<vmem>>, vector<32x512xf32>,
    } else {
    }
    %c0 = arith.constant 0 : index
    %c0_1 = arith.constant 0 : index
    %3 = vector.load %arg6[%c0, %c0_1] : memref<32x512xf32, #tpu.memory_space<vmem>>, vector<32x512xf32>
    %c0_2 = arith.constant 0 : index
    %c0_3 = arith.constant 0 : index
    %4 = vector.load %arg3[%c0_2, %c0_3] : memref<32x128xbf16, #tpu.memory_space<vmem>>, vector<32x128xbf16>
    %c0_4 = arith.constant 0 : index
    %c0_5 = arith.constant 0 : index
    %5 = vector.load %arg4[%c0_4, %c0_5] : memref<128x512xbf16, #tpu.memory_space<vmem>>, vector<128x512xbf16>
    %cst = arith.constant dense<0.000000e+00> : vector<32x512xf32>
    %6 = tpu.matmul %4, %5, %cst {dimension_numbers = #tpu.dot_dimension_numbers<[1], [0], [0], [1], [0, 0, 1, 1], [], []>} : vector<32x128xbf16>, vector<128x512xbf16>, vector<32x512xf32> -> vector<32x512xf32>
    %7 = arith.addf %3, %6 : vector<32x512xf32>
    %c0_6 = arith.constant 0 : index
    %c0_7 = arith.constant 0 : index
    %8 = vector.load %arg6[%c0_6, %c0_7] : memref<32x512xf32, #tpu.memory_space<vmem>>, vector<32x512xf32>
    tpu.vector_store %arg6[%c0_6, %c0_7], %7 {strides = array<i32>} : memref<32x512xf32, #tpu.memory_space<vmem>>, vector<32x512xf32>,
    %c0_i32_8 = arith.constant 0 : i32
    %9 = arith.cmpi eq, %arg2, %c0_i32_8 : i32
    %10 = arith.extui %9 : i1 to i32
    %c0_i32_9 = arith.constant 0 : i32
    %11 = arith.cmpi ne, %10, %c0_i32_9 : i32
    scf.if %11 {
      %c0_10 = arith.constant 0 : index
      %c0_11 = arith.constant 0 : index
      %12 = vector.load %arg6[%c0_10, %c0_11] : memref<32x512xf32, #tpu.memory_space<vmem>>, vector<32x512xf32>
      %c0_12 = arith.constant 0 : index
      %c0_13 = arith.constant 0 : index
      %13 = vector.load %arg5[%c0_12, %c0_13] : memref<1x512xf32, #tpu.memory_space<vmem>>, vector<1x512xf32>
      %14 = vector.broadcast %13 : vector<1x512xf32> to vector<32x512xf32>
      %15 = arith.addf %12, %14 : vector<32x512xf32>
      %cst_14 = arith.constant 0.000000e+00 : f32
      %16 = vector.broadcast %cst_14 : f32 to vector<32x512xf32>
      %17 = arith.cmpf oge, %15, %16 : vector<32x512xf32>
      %cst_15 = arith.constant 2.000000e-01 : f32
      %18 = vector.broadcast %cst_15 : f32 to vector<32x512xf32>
      %19 = arith.mulf %18, %15 : vector<32x512xf32>
      %20 = arith.select %17, %15, %19 : vector<32x512xi1>, vector<32x512xf32>
      %cst_16 = arith.constant 1.000000e+00 : f32
      %21 = vector.broadcast %cst_16 : f32 to vector<32x512xf32>
      %22 = arith.mulf %20, %21 : vector<32x512xf32>
      %c0_17 = arith.constant 0 : index
      %c0_18 = arith.constant 0 : index
      %23 = vector.load %arg6[%c0_17, %c0_18] : memref<32x512xf32, #tpu.memory_space<vmem>>, vector<32x512xf32>
      tpu.vector_store %arg6[%c0_17, %c0_18], %22 {strides = array<i32>} : memref<32x512xf32, #tpu.memory_space<vmem>>, vector<32x512xf32>,
    } else {
    }
    return
  }
  func.func @transform_0(%arg0: i32, %arg1: i32, %arg2: i32) -> (i32, i32) {
    %c0_i32 = arith.constant 0 : i32
    return %arg0, %arg2 : i32, i32
  }
  func.func @transform_1(%arg0: i32, %arg1: i32, %arg2: i32) -> (i32, i32) {
    %c0_i32 = arith.constant 0 : i32
    return %arg2, %arg1 : i32, i32
  }
  func.func @transform_2(%arg0: i32, %arg1: i32, %arg2: i32) -> (i32, i32) {
    %c0_i32 = arith.constant 0 : i32
    %c0_i32_0 = arith.constant 0 : i32
    return %c0_i32, %arg1 : i32, i32
  }
  func.func @transform_3(%arg0: i32, %arg1: i32, %arg2: i32) -> (i32, i32) {
    %c0_i32 = arith.constant 0 : i32
    return %arg0, %arg1 : i32, i32
  }
}

module attributes {stable_mosaic.version = 11 : i64} {
  func.func @_mm_kernel(%arg0: i32, %arg1: i32, %arg2: i32, %arg3: memref<32x256xbf16, #tpu.memory_space<vmem>>, %arg4: memref<256x512xbf16, #tpu.memory_space<vmem>>, %arg5: memref<1x512xf32, #tpu.memory_space<vmem>>, %arg6: memref<32x512xf32, #tpu.memory_space<vmem>>) attributes {dimension_semantics = [#tpu.dimension_semantics<parallel>, #tpu.dimension_semantics<parallel>, #tpu.dimension_semantics<arbitrary>], iteration_bounds = array<i64: 1, 1, 15>, scalar_prefetch = 0 : i64, scratch_operands = 0 : i64, tpu.core_type = #tpu.core_type<tc>, window_params = [{transform_indices = @transform_0, window_bounds = array<i64: 32, 256>}, {transform_indices = @transform_1, window_bounds = array<i64: 256, 512>}, {transform_indices = @transform_2, window_bounds = array<i64: 1, 512>}, {transform_indices = @transform_3, window_bounds = array<i64: 32, 512>}]} {
    %c0_i32 = arith.constant 0 : i32
    %0 = arith.cmpi eq, %arg2, %c0_i32 : i32
    %1 = arith.extui %0 : i1 to i32
    %c0_i32_0 = arith.constant 0 : i32
    %2 = arith.cmpi ne, %1, %c0_i32_0 : i32
    scf.if %2 {
      %cst_9 = arith.constant 0.000000e+00 : f32
      %12 = vector.broadcast %cst_9 : f32 to vector<32x512xf32>
      %c0_10 = arith.constant 0 : index
      %c0_11 = arith.constant 0 : index
      %13 = vector.load %arg6[%c0_10, %c0_11] : memref<32x512xf32, #tpu.memory_space<vmem>>, vector<32x512xf32>
      tpu.vector_store %arg6[%c0_10, %c0_11], %12 {strides = array<i32>} : memref<32x512xf32, #tpu.memory_space<vmem>>, vector<32x512xf32>,
    } else {
    }
    %c0 = arith.constant 0 : index
    %c0_1 = arith.constant 0 : index
    %3 = vector.load %arg6[%c0, %c0_1] : memref<32x512xf32, #tpu.memory_space<vmem>>, vector<32x512xf32>
    %c0_2 = arith.constant 0 : index
    %c0_3 = arith.constant 0 : index
    %4 = vector.load %arg3[%c0_2, %c0_3] : memref<32x256xbf16, #tpu.memory_space<vmem>>, vector<32x256xbf16>
    %c0_4 = arith.constant 0 : index
    %c0_5 = arith.constant 0 : index
    %5 = vector.load %arg4[%c0_4, %c0_5] : memref<256x512xbf16, #tpu.memory_space<vmem>>, vector<256x512xbf16>
    %cst = arith.constant dense<0.000000e+00> : vector<32x512xf32>
    %6 = tpu.matmul %4, %5, %cst {dimension_numbers = #tpu.dot_dimension_numbers<[1], [0], [0], [1], [0, 0, 1, 1], [], []>} : vector<32x256xbf16>, vector<256x512xbf16>, vector<32x512xf32> -> vector<32x512xf32>
    %7 = arith.addf %3, %6 : vector<32x512xf32>
    %c0_6 = arith.constant 0 : index
    %c0_7 = arith.constant 0 : index
    %8 = vector.load %arg6[%c0_6, %c0_7] : memref<32x512xf32, #tpu.memory_space<vmem>>, vector<32x512xf32>
    tpu.vector_store %arg6[%c0_6, %c0_7], %7 {strides = array<i32>} : memref<32x512xf32, #tpu.memory_space<vmem>>, vector<32x512xf32>,
    %c14_i32 = arith.constant 14 : i32
    %9 = arith.cmpi eq, %arg2, %c14_i32 : i32
    %10 = arith.extui %9 : i1 to i32
    %c0_i32_8 = arith.constant 0 : i32
    %11 = arith.cmpi ne, %10, %c0_i32_8 : i32
    scf.if %11 {
      %c0_9 = arith.constant 0 : index
      %c0_10 = arith.constant 0 : index
      %12 = vector.load %arg6[%c0_9, %c0_10] : memref<32x512xf32, #tpu.memory_space<vmem>>, vector<32x512xf32>
      %c0_11 = arith.constant 0 : index
      %c0_12 = arith.constant 0 : index
      %13 = vector.load %arg5[%c0_11, %c0_12] : memref<1x512xf32, #tpu.memory_space<vmem>>, vector<1x512xf32>
      %14 = vector.broadcast %13 : vector<1x512xf32> to vector<32x512xf32>
      %15 = arith.addf %12, %14 : vector<32x512xf32>
      %cst_13 = arith.constant 0.000000e+00 : f32
      %16 = vector.broadcast %cst_13 : f32 to vector<32x512xf32>
      %17 = arith.cmpf oge, %15, %16 : vector<32x512xf32>
      %cst_14 = arith.constant 2.000000e-01 : f32
      %18 = vector.broadcast %cst_14 : f32 to vector<32x512xf32>
      %19 = arith.mulf %18, %15 : vector<32x512xf32>
      %20 = arith.select %17, %15, %19 : vector<32x512xi1>, vector<32x512xf32>
      %cst_15 = arith.constant 1.000000e+00 : f32
      %21 = vector.broadcast %cst_15 : f32 to vector<32x512xf32>
      %22 = arith.mulf %20, %21 : vector<32x512xf32>
      %c0_16 = arith.constant 0 : index
      %c0_17 = arith.constant 0 : index
      %23 = vector.load %arg6[%c0_16, %c0_17] : memref<32x512xf32, #tpu.memory_space<vmem>>, vector<32x512xf32>
      tpu.vector_store %arg6[%c0_16, %c0_17], %22 {strides = array<i32>} : memref<32x512xf32, #tpu.memory_space<vmem>>, vector<32x512xf32>,
    } else {
    }
    return
  }
  func.func @transform_0(%arg0: i32, %arg1: i32, %arg2: i32) -> (i32, i32) {
    %c0_i32 = arith.constant 0 : i32
    return %arg0, %arg2 : i32, i32
  }
  func.func @transform_1(%arg0: i32, %arg1: i32, %arg2: i32) -> (i32, i32) {
    %c0_i32 = arith.constant 0 : i32
    return %arg2, %arg1 : i32, i32
  }
  func.func @transform_2(%arg0: i32, %arg1: i32, %arg2: i32) -> (i32, i32) {
    %c0_i32 = arith.constant 0 : i32
    %c0_i32_0 = arith.constant 0 : i32
    return %c0_i32, %arg1 : i32, i32
  }
  func.func @transform_3(%arg0: i32, %arg1: i32, %arg2: i32) -> (i32, i32) {
    %c0_i32 = arith.constant 0 : i32
    return %arg0, %arg1 : i32, i32
  }
}

module attributes {stable_mosaic.version = 11 : i64} {
  func.func @_mm_kernel(%arg0: i32, %arg1: i32, %arg2: i32, %arg3: memref<8x256xbf16, #tpu.memory_space<vmem>>, %arg4: memref<256x128xbf16, #tpu.memory_space<vmem>>, %arg5: memref<1x128xf32, #tpu.memory_space<vmem>>, %arg6: memref<8x128xf32, #tpu.memory_space<vmem>>) attributes {dimension_semantics = [#tpu.dimension_semantics<parallel>, #tpu.dimension_semantics<parallel>, #tpu.dimension_semantics<arbitrary>], iteration_bounds = array<i64: 1, 1, 7>, scalar_prefetch = 0 : i64, scratch_operands = 0 : i64, tpu.core_type = #tpu.core_type<tc>, window_params = [{transform_indices = @transform_0, window_bounds = array<i64: 8, 256>}, {transform_indices = @transform_1, window_bounds = array<i64: 256, 128>}, {transform_indices = @transform_2, window_bounds = array<i64: 1, 128>}, {transform_indices = @transform_3, window_bounds = array<i64: 8, 128>}]} {
    %c0_i32 = arith.constant 0 : i32
    %0 = arith.cmpi eq, %arg2, %c0_i32 : i32
    %1 = arith.extui %0 : i1 to i32
    %c0_i32_0 = arith.constant 0 : i32
    %2 = arith.cmpi ne, %1, %c0_i32_0 : i32
    scf.if %2 {
      %cst_9 = arith.constant 0.000000e+00 : f32
      %12 = vector.broadcast %cst_9 : f32 to vector<8x128xf32>
      %c0_10 = arith.constant 0 : index
      %c0_11 = arith.constant 0 : index
      %13 = vector.load %arg6[%c0_10, %c0_11] : memref<8x128xf32, #tpu.memory_space<vmem>>, vector<8x128xf32>
      tpu.vector_store %arg6[%c0_10, %c0_11], %12 {strides = array<i32>} : memref<8x128xf32, #tpu.memory_space<vmem>>, vector<8x128xf32>,
    } else {
    }
    %c0 = arith.constant 0 : index
    %c0_1 = arith.constant 0 : index
    %3 = vector.load %arg6[%c0, %c0_1] : memref<8x128xf32, #tpu.memory_space<vmem>>, vector<8x128xf32>
    %c0_2 = arith.constant 0 : index
    %c0_3 = arith.constant 0 : index
    %4 = vector.load %arg3[%c0_2, %c0_3] : memref<8x256xbf16, #tpu.memory_space<vmem>>, vector<8x256xbf16>
    %c0_4 = arith.constant 0 : index
    %c0_5 = arith.constant 0 : index
    %5 = vector.load %arg4[%c0_4, %c0_5] : memref<256x128xbf16, #tpu.memory_space<vmem>>, vector<256x128xbf16>
    %cst = arith.constant dense<0.000000e+00> : vector<8x128xf32>
    %6 = tpu.matmul %4, %5, %cst {dimension_numbers = #tpu.dot_dimension_numbers<[1], [0], [0], [1], [0, 0, 1, 1], [], []>} : vector<8x256xbf16>, vector<256x128xbf16>, vector<8x128xf32> -> vector<8x128xf32>
    %7 = arith.addf %3, %6 : vector<8x128xf32>
    %c0_6 = arith.constant 0 : index
    %c0_7 = arith.constant 0 : index
    %8 = vector.load %arg6[%c0_6, %c0_7] : memref<8x128xf32, #tpu.memory_space<vmem>>, vector<8x128xf32>
    tpu.vector_store %arg6[%c0_6, %c0_7], %7 {strides = array<i32>} : memref<8x128xf32, #tpu.memory_space<vmem>>, vector<8x128xf32>,
    %c6_i32 = arith.constant 6 : i32
    %9 = arith.cmpi eq, %arg2, %c6_i32 : i32
    %10 = arith.extui %9 : i1 to i32
    %c0_i32_8 = arith.constant 0 : i32
    %11 = arith.cmpi ne, %10, %c0_i32_8 : i32
    scf.if %11 {
      %c0_9 = arith.constant 0 : index
      %c0_10 = arith.constant 0 : index
      %12 = vector.load %arg6[%c0_9, %c0_10] : memref<8x128xf32, #tpu.memory_space<vmem>>, vector<8x128xf32>
      %c0_11 = arith.constant 0 : index
      %c0_12 = arith.constant 0 : index
      %13 = vector.load %arg5[%c0_11, %c0_12] : memref<1x128xf32, #tpu.memory_space<vmem>>, vector<1x128xf32>
      %14 = vector.broadcast %13 : vector<1x128xf32> to vector<8x128xf32>
      %15 = arith.addf %12, %14 : vector<8x128xf32>
      %cst_13 = arith.constant 1.000000e+00 : f32
      %16 = vector.broadcast %cst_13 : f32 to vector<8x128xf32>
      %17 = arith.mulf %15, %16 : vector<8x128xf32>
      %c0_14 = arith.constant 0 : index
      %c0_15 = arith.constant 0 : index
      %18 = vector.load %arg6[%c0_14, %c0_15] : memref<8x128xf32, #tpu.memory_space<vmem>>, vector<8x128xf32>
      tpu.vector_store %arg6[%c0_14, %c0_15], %17 {strides = array<i32>} : memref<8x128xf32, #tpu.memory_space<vmem>>, vector<8x128xf32>,
    } else {
    }
    return
  }
  func.func @transform_0(%arg0: i32, %arg1: i32, %arg2: i32) -> (i32, i32) {
    %c0_i32 = arith.constant 0 : i32
    return %arg0, %arg2 : i32, i32
  }
  func.func @transform_1(%arg0: i32, %arg1: i32, %arg2: i32) -> (i32, i32) {
    %c0_i32 = arith.constant 0 : i32
    return %arg2, %arg1 : i32, i32
  }
  func.func @transform_2(%arg0: i32, %arg1: i32, %arg2: i32) -> (i32, i32) {
    %c0_i32 = arith.constant 0 : i32
    %c0_i32_0 = arith.constant 0 : i32
    return %c0_i32, %arg1 : i32, i32
  }
  func.func @transform_3(%arg0: i32, %arg1: i32, %arg2: i32) -> (i32, i32) {
    %c0_i32 = arith.constant 0 : i32
    return %arg0, %arg1 : i32, i32
  }
}

</mosaic_0001>

<bundles_post_ra>
// kernel: progressive_discriminator.7
= control target key start
LH: loop header
LB: loop body
LE: loop exit
PB: predicated region body
PF: predicated region fallthrough
CT: control target
= control target key end

     0   :  { %v1268_v1 = vmov 0   ;;  %v826_v41 = vlaneseq  ;;  %s1749_s1 = inlined_call_operand.vmem [shape: bf16[128,512], index: 1, kind: input, shape index: {}]   ;;  %s1750_s0 = inlined_call_operand.vmem [shape: bf16[128,128], index: 0, kind: input, shape index: {}]   ;;  %s1751_s2 = inlined_call_operand.vmem [shape: f32[1,512], index: 2, kind: input, shape index: {}]   ;;  %s1752_s3 = inlined_call_operand.vmem [shape: f32[128,512], index: 3, kind: output, shape index: {}]  }
   0x1   :  { %v1212_v0 = vld [vmem:[%s1749_s1 + $0x4] ss:$16 sps:$4 sm:$0xff]   ;;  %435 = vmatprep.mubr.bf16.mxu0 %v1268_v1  ;;  %548 = vmatprep.mubr.bf16.mxu1 %v1268_v1  ;;  %v1214_v2 = vld [vmem:[%s1749_s1 + $0xc] ss:$16 sps:$4 sm:$0xff]   ;;  %v1216_v3 = vld [vmem:[%s1749_s1] ss:$16 sps:$4 sm:$0xff]  }
   0x2   :  { %403 = vmatprep.subr.bf16.mxu0 %v1212_v0  ;;  %v1217_v4 = vld [vmem:[%s1749_s1 + $0x8] ss:$16 sps:$4 sm:$0xff]   ;;  %516 = vmatprep.subr.bf16.mxu1 %v1214_v2  ;;  %v1218_v5 = vld [vmem:[%s1749_s1 + $0x24] ss:$16 sps:$4 sm:$0xff]   ;;  %v1220_v6 = vld [vmem:[%s1749_s1 + $0x2c] ss:$16 sps:$4 sm:$0xff]  }
   0x3   :  { %404 = vmatpush1.bf16.msra.mxu0 %v1216_v3  ;;  %517 = vmatpush1.bf16.msra.mxu1 %v1217_v4  ;;  %v1222_v7 = vld [vmem:[%s1749_s1 + $0x20] ss:$16 sps:$4 sm:$0xff]   ;;  %v1223_v8 = vld [vmem:[%s1749_s1 + $0x28] ss:$16 sps:$4 sm:$0xff]   ;;  %v1224_v9 = vld [vmem:[%s1749_s1 + $0x44] ss:$16 sps:$4 sm:$0xff]  }
   0x4   :  { %405 = vmatprep.subr.bf16.mxu0 %v1218_v5  ;;  %518 = vmatprep.subr.bf16.mxu1 %v1220_v6  ;;  %v1226_v10 = vld [vmem:[%s1749_s1 + $0x4c] ss:$16 sps:$4 sm:$0xff]   ;;  %v1228_v11 = vld [vmem:[%s1749_s1 + $0x40] ss:$16 sps:$4 sm:$0xff]   ;;  %v1229_v12 = vld [vmem:[%s1749_s1 + $0x48] ss:$16 sps:$4 sm:$0xff]  }
   0x5   :  { %v1230_v13 = vld [vmem:[%s1749_s1 + $0x64] ss:$16 sps:$4 sm:$0xff]   ;;  %v1232_v14 = vld [vmem:[%s1749_s1 + $0x6c] ss:$16 sps:$4 sm:$0xff]   ;;  %v1234_v15 = vld [vmem:[%s1749_s1 + $0x60] ss:$16 sps:$4 sm:$0xff]  }
   0x6   :  { %v1235_v16 = vld [vmem:[%s1749_s1 + $0x68] ss:$16 sps:$4 sm:$0xff]   ;;  %v1236_v17 = vld [vmem:[%s1749_s1 + $0x84] ss:$16 sps:$4 sm:$0xff]   ;;  %v1238_v18 = vld [vmem:[%s1749_s1 + $0x8c] ss:$16 sps:$4 sm:$0xff]  }
   0x7   :  { %406 = vmatpush1.bf16.msra.mxu0 %v1222_v7  ;;  %519 = vmatpush1.bf16.msra.mxu1 %v1223_v8  ;;  %v1240_v19 = vld [vmem:[%s1749_s1 + $0x80] ss:$16 sps:$4 sm:$0xff]   ;;  %v1241_v20 = vld [vmem:[%s1749_s1 + $0x88] ss:$16 sps:$4 sm:$0xff]   ;;  %v1242_v21 = vld [vmem:[%s1749_s1 + $0xa4] ss:$16 sps:$4 sm:$0xff]  }
   0x8   :  { %407 = vmatprep.subr.bf16.mxu0 %v1224_v9  ;;  %520 = vmatprep.subr.bf16.mxu1 %v1226_v10  ;;  %v1244_v22 = vld [vmem:[%s1749_s1 + $0xac] ss:$16 sps:$4 sm:$0xff]   ;;  %v1246_v23 = vld [vmem:[%s1749_s1 + $0xa0] ss:$16 sps:$4 sm:$0xff]   ;;  %v1247_v24 = vld [vmem:[%s1749_s1 + $0xa8] ss:$16 sps:$4 sm:$0xff]  }
   0x9   :  { %v1248_v25 = vld [vmem:[%s1749_s1 + $0xc4] ss:$16 sps:$4 sm:$0xff]   ;;  %v1250_v26 = vld [vmem:[%s1749_s1 + $0xcc] ss:$16 sps:$4 sm:$0xff]   ;;  %v1252_v27 = vld [vmem:[%s1749_s1 + $0xc0] ss:$16 sps:$4 sm:$0xff]  }
   0xa   :  { %v1253_v28 = vld [vmem:[%s1749_s1 + $0xc8] ss:$16 sps:$4 sm:$0xff]   ;;  %v1254_v29 = vld [vmem:[%s1749_s1 + $0xe4] ss:$16 sps:$4 sm:$0xff]   ;;  %v1256_v30 = vld [vmem:[%s1749_s1 + $0xec] ss:$16 sps:$4 sm:$0xff]  }
   0xb   :  { %408 = vmatpush1.bf16.msra.mxu0 %v1228_v11  ;;  %521 = vmatpush1.bf16.msra.mxu1 %v1229_v12  ;;  %v1258_v31 = vld [vmem:[%s1749_s1 + $0xe0] ss:$16 sps:$4 sm:$0xff]   ;;  %v1259_v32 = vld [vmem:[%s1749_s1 + $0xe8] ss:$16 sps:$4 sm:$0xff]   ;;  %v827_v42 = vshrl.u32 %v826_v41, 7 }
   0xc   :  { %409 = vmatprep.subr.bf16.mxu0 %v1230_v13  ;;  %522 = vmatprep.subr.bf16.mxu1 %v1232_v14  ;;  %v1260_v33 = vld [vmem:[%s1750_s0] sm:$0xff]   ;;  %v1261_v34 = vld [vmem:[%s1750_s0 + $0x8] sm:$0xff]   ;;  %v1262_v35 = vld [vmem:[%s1750_s0 + $0x10] sm:$0xff]  }
   0xd   :  { %v1263_v36 = vld [vmem:[%s1750_s0 + $0x18] sm:$0xff]   ;;  %v1264_v37 = vld [vmem:[%s1750_s0 + $0x20] sm:$0xff]   ;;  %v1265_v38 = vld [vmem:[%s1750_s0 + $0x28] sm:$0xff]   ;;  %v828_v43 = vsub.s32 0, %v827_v42  ;;  %v836_v44 = vsub.s32 2, %v827_v42  ;;  %v832_v46 = vsub.s32 1, %v827_v42 }
   0xe   :  { %v1266_v39 = vld [vmem:[%s1750_s0 + $0x30] sm:$0xff]   ;;  %v1267_v40 = vld [vmem:[%s1750_s0 + $0x38] sm:$0xff]   ;;  %v824_v45 = vld [vmem:[%s1751_s2] sm:$0xf]  ;;  %v840_v47 = vsub.s32 3, %v827_v42 }
   0xf   :  { %410 = vmatpush1.bf16.msra.mxu0 %v1234_v15  ;;  %523 = vmatpush1.bf16.msra.mxu1 %v1235_v16  ;;  %v1428_v48 = vrot.slane %v824_v45, %v828_v43  ;;  %v1430_v49 = vrot.slane %v824_v45, %v836_v44  ;;  %v1432_v52 = vrot.slane %v824_v45, %v832_v46 }
  0x10   :  { %411 = vmatprep.subr.bf16.mxu0 %v1236_v17  ;;  %524 = vmatprep.subr.bf16.mxu1 %v1238_v18  ;;  %v1434_v53 = vrot.slane %v824_v45, %v840_v47 }
  0x13   :  { %412 = vmatpush1.bf16.msra.mxu0 %v1240_v19  ;;  %525 = vmatpush1.bf16.msra.mxu1 %v1241_v20 }
  0x14   :  { %413 = vmatprep.subr.bf16.mxu0 %v1242_v21  ;;  %526 = vmatprep.subr.bf16.mxu1 %v1244_v22 }
  0x17   :  { %414 = vmatpush1.bf16.msra.mxu0 %v1246_v23  ;;  %527 = vmatpush1.bf16.msra.mxu1 %v1247_v24 }
  0x18   :  { %415 = vmatprep.subr.bf16.mxu0 %v1248_v25  ;;  %528 = vmatprep.subr.bf16.mxu1 %v1250_v26 }
  0x1b   :  { %416 = vmatpush1.bf16.msra.mxu0 %v1252_v27  ;;  %529 = vmatpush1.bf16.msra.mxu1 %v1253_v28 }
  0x1c   :  { %417 = vmatprep.subr.bf16.mxu0 %v1254_v29  ;;  %530 = vmatprep.subr.bf16.mxu1 %v1256_v30 }
  0x1f   :  { %418 = vmatpush1.bf16.msra.mxu0 %v1258_v31  ;;  %531 = vmatpush1.bf16.msra.mxu1 %v1259_v32 }
  0x22   :  { %436 = vmatmul.mubr.bf16.vlgmr.msra.gmra.mrb[0].mxu0 %v1260_v33  ;;  %549 = vmatmul.mubr.bf16.vlgmr.msra.gmra.mrb[0].mxu1 %v1260_v33 }
  0x23   :  { %445 = vmatprep.mubr.bf16.mxu0 %v1268_v1  ;;  %558 = vmatprep.mubr.bf16.mxu1 %v1268_v1 }
  0x2a   :  { %446 = vmatmul.mubr.bf16.gmra.mrb[4].mxu0 %v1261_v34  ;;  %559 = vmatmul.mubr.bf16.gmra.mrb[4].mxu1 %v1261_v34 }
  0x2b   :  { %455 = vmatprep.mubr.bf16.mxu0 %v1268_v1  ;;  %568 = vmatprep.mubr.bf16.mxu1 %v1268_v1 }
  0x32   :  { %456 = vmatmul.mubr.bf16.gmra.mrb[8].mxu0 %v1262_v35  ;;  %569 = vmatmul.mubr.bf16.gmra.mrb[8].mxu1 %v1262_v35 }
  0x33   :  { %465 = vmatprep.mubr.bf16.mxu0 %v1268_v1  ;;  %578 = vmatprep.mubr.bf16.mxu1 %v1268_v1 }
  0x3a   :  { %466 = vmatmul.mubr.bf16.gmra.mrb[12].mxu0 %v1263_v36  ;;  %579 = vmatmul.mubr.bf16.gmra.mrb[12].mxu1 %v1263_v36 }
  0x3b   :  { %475 = vmatprep.mubr.bf16.mxu0 %v1268_v1  ;;  %588 = vmatprep.mubr.bf16.mxu1 %v1268_v1 }
  0x42   :  { %476 = vmatmul.mubr.bf16.gmra.mrb[16].mxu0 %v1264_v37  ;;  %589 = vmatmul.mubr.bf16.gmra.mrb[16].mxu1 %v1264_v37 }
  0x43   :  { %485 = vmatprep.mubr.bf16.mxu0 %v1268_v1  ;;  %598 = vmatprep.mubr.bf16.mxu1 %v1268_v1 }
  0x4a   :  { %486 = vmatmul.mubr.bf16.gmra.mrb[20].mxu0 %v1265_v38  ;;  %599 = vmatmul.mubr.bf16.gmra.mrb[20].mxu1 %v1265_v38 }
  0x4b   :  { %495 = vmatprep.mubr.bf16.mxu0 %v1268_v1  ;;  %608 = vmatprep.mubr.bf16.mxu1 %v1268_v1 }
  0x52   :  { %496 = vmatmul.mubr.bf16.gmra.mrb[24].mxu0 %v1266_v39  ;;  %609 = vmatmul.mubr.bf16.gmra.mrb[24].mxu1 %v1266_v39 }
  0x53   :  { %505 = vmatprep.mubr.bf16.mxu0 %v1268_v1  ;;  %618 = vmatprep.mubr.bf16.mxu1 %v1268_v1 }
  0x5a   :  { %506 = vmatmul.mubr.bf16.gmra.mrb[28].mxu0 %v1267_v40  ;;  %619 = vmatmul.mubr.bf16.gmra.mrb[28].mxu1 %v1267_v40 }
  0xf5   :  { %v437_v50 = vpop.f32.mrb[0].mxu0  ;;  %v550_v51 = vpop.f32.mrb[0].mxu1 }
  0xf6   :  { %v439_v54 = vpop.f32.mrb[1].mxu0  ;;  %v552_v55 = vpop.f32.mrb[1].mxu1  ;;  %v846_v58 = vadd.f32 %v1428_v48, %v437_v50  ;;  %v848_v59 = vadd.f32 %v1430_v49, %v550_v51 }
  0xf7   :  { %v441_v56 = vpop.f32.mrb[2].mxu0  ;;  %v554_v57 = vpop.f32.mrb[2].mxu1  ;;  %v847_v62 = vadd.f32 %v1432_v52, %v439_v54  ;;  %v849_v63 = vadd.f32 %v1434_v53, %v552_v55 }
  0xf8   :  { %v443_v60 = vpop.f32.mrb[3].mxu0  ;;  %v556_v61 = vpop.f32.mrb[3].mxu1  ;;  %vm910_vm0 = vcmp.ge.f32.partialorder %v846_v58, 0.0  ;;  %v974_v0 = vmul.f32 0.2, %v846_v58  ;;  %vm912_vm1 = vcmp.ge.f32.partialorder %v848_v59, 0.0  ;;  %v850_v6 = vadd.f32 %v1428_v48, %v441_v56 }
  0xf9   :  { %v976_v1 = vmul.f32 0.2, %v848_v59  ;;  %vm911_vm2 = vcmp.ge.f32.partialorder %v847_v62, 0.0  ;;  %v975_v2 = vmul.f32 0.2, %v847_v62  ;;  %vm913_vm3 = vcmp.ge.f32.partialorder %v849_v63, 0.0 }
  0xfa   :  { %v977_v3 = vmul.f32 0.2, %v849_v63  ;;  %v1038_v4 = vsel %vm910_vm0, %v846_v58, %v974_v0  ;;  %v852_v7 = vadd.f32 %v1430_v49, %v554_v57  ;;  %v851_v10 = vadd.f32 %v1432_v52, %v443_v60 }
  0xfb   :  { %v1040_v5 = vsel %vm912_vm1, %v848_v59, %v976_v1  ;;  %1102 = vst [vmem:[%s1752_s3] sm:$0xff] %v1038_v4  ;;  %v1039_v8 = vsel %vm911_vm2, %v847_v62, %v975_v2  ;;  %v853_v11 = vadd.f32 %v1434_v53, %v556_v61  ;;  %vm914_vm4 = vcmp.ge.f32.partialorder %v850_v6, 0.0 }
  0xfc   :  { %1104 = vst [vmem:[%s1752_s3 + $0x10] sm:$0xff] %v1040_v5  ;;  %v1041_v9 = vsel %vm913_vm3, %v849_v63, %v977_v3  ;;  %1103 = vst [vmem:[%s1752_s3 + $0x8] sm:$0xff] %v1039_v8  ;;  %v978_v14 = vmul.f32 0.2, %v850_v6  ;;  %vm916_vm5 = vcmp.ge.f32.partialorder %v852_v7, 0.0  ;;  %vm915_vm6 = vcmp.ge.f32.partialorder %v851_v10, 0.0 }
  0xfd   :  { %v447_v12 = vpop.f32.mrb[4].mxu0  ;;  %v560_v13 = vpop.f32.mrb[4].mxu1  ;;  %1105 = vst [vmem:[%s1752_s3 + $0x18] sm:$0xff] %v1041_v9  ;;  %v980_v15 = vmul.f32 0.2, %v852_v7  ;;  %vm917_vm7 = vcmp.ge.f32.partialorder %v853_v11, 0.0 }
  0xfe   :  { %v979_v16 = vmul.f32 0.2, %v851_v10  ;;  %v981_v17 = vmul.f32 0.2, %v853_v11  ;;  %v1042_v18 = vsel %vm914_vm4, %v850_v6, %v978_v14  ;;  %v449_v20 = vpop.f32.mrb[5].mxu0  ;;  %v562_v21 = vpop.f32.mrb[5].mxu1  ;;  %v854_v26 = vadd.f32 %v1428_v48, %v447_v12 }
  0xff   :  { %v1044_v19 = vsel %vm916_vm5, %v852_v7, %v980_v15  ;;  %1106 = vst [vmem:[%s1752_s3 + $0x20] sm:$0xff] %v1042_v18  ;;  %v451_v24 = vpop.f32.mrb[6].mxu0  ;;  %v564_v25 = vpop.f32.mrb[6].mxu1  ;;  %v856_v27 = vadd.f32 %v1430_v49, %v560_v13  ;;  %v855_v30 = vadd.f32 %v1432_v52, %v449_v20  ;;  %v857_v31 = vadd.f32 %v1434_v53, %v562_v21 }
 0x100   :  { %1108 = vst [vmem:[%s1752_s3 + $0x30] sm:$0xff] %v1044_v19  ;;  %v1043_v22 = vsel %vm915_vm6, %v851_v10, %v979_v16  ;;  %v1045_v23 = vsel %vm917_vm7, %v853_v11, %v981_v17  ;;  %v453_v28 = vpop.f32.mrb[7].mxu0  ;;  %v566_v29 = vpop.f32.mrb[7].mxu1  ;;  %vm918_vm8 = vcmp.ge.f32.partialorder %v854_v26, 0.0  ;;  %v982_v32 = vmul.f32 0.2, %v854_v26 }
 0x101   :  { %1107 = vst [vmem:[%s1752_s3 + $0x28] sm:$0xff] %v1043_v22  ;;  %1109 = vst [vmem:[%s1752_s3 + $0x38] sm:$0xff] %v1045_v23  ;;  %vm920_vm9 = vcmp.ge.f32.partialorder %v856_v27, 0.0  ;;  %v984_v33 = vmul.f32 0.2, %v856_v27  ;;  %vm919_vm10 = vcmp.ge.f32.partialorder %v855_v30, 0.0  ;;  %v858_v38 = vadd.f32 %v1428_v48, %v451_v24 }
 0x102   :  { %v983_v34 = vmul.f32 0.2, %v855_v30  ;;  %vm921_vm11 = vcmp.ge.f32.partialorder %v857_v31, 0.0  ;;  %v985_v35 = vmul.f32 0.2, %v857_v31  ;;  %v1046_v36 = vsel %vm918_vm8, %v854_v26, %v982_v32 }
 0x103   :  { %v1048_v37 = vsel %vm920_vm9, %v856_v27, %v984_v33  ;;  %v860_v39 = vadd.f32 %v1430_v49, %v564_v25  ;;  %1110 = vst [vmem:[%s1752_s3 + $0x40] sm:$0xff] %v1046_v36  ;;  %v859_v44 = vadd.f32 %v1432_v52, %v453_v28  ;;  %v861_v45 = vadd.f32 %v1434_v53, %v566_v29 }
 0x104   :  { %1112 = vst [vmem:[%s1752_s3 + $0x50] sm:$0xff] %v1048_v37  ;;  %v1047_v42 = vsel %vm919_vm10, %v855_v30, %v983_v34  ;;  %v1049_v43 = vsel %vm921_vm11, %v857_v31, %v985_v35  ;;  %vm922_vm12 = vcmp.ge.f32.partialorder %v858_v38, 0.0  ;;  %v986_v50 = vmul.f32 0.2, %v858_v38 }
 0x105   :  { %v457_v40 = vpop.f32.mrb[8].mxu0  ;;  %v570_v41 = vpop.f32.mrb[8].mxu1  ;;  %1111 = vst [vmem:[%s1752_s3 + $0x48] sm:$0xff] %v1047_v42  ;;  %1113 = vst [vmem:[%s1752_s3 + $0x58] sm:$0xff] %v1049_v43  ;;  %vm924_vm13 = vcmp.ge.f32.partialorder %v860_v39, 0.0  ;;  %vm923_vm14 = vcmp.ge.f32.partialorder %v859_v44, 0.0 }
 0x106   :  { %v459_v46 = vpop.f32.mrb[9].mxu0  ;;  %v572_v47 = vpop.f32.mrb[9].mxu1  ;;  %v988_v51 = vmul.f32 0.2, %v860_v39  ;;  %v987_v54 = vmul.f32 0.2, %v859_v44  ;;  %v1050_v56 = vsel %vm922_vm12, %v858_v38, %v986_v50  ;;  %v862_v0 = vadd.f32 %v1428_v48, %v457_v40 }
 0x107   :  { %vm925_vm15 = vcmp.ge.f32.partialorder %v861_v45, 0.0  ;;  %v989_v55 = vmul.f32 0.2, %v861_v45  ;;  %v461_v58 = vpop.f32.mrb[10].mxu0  ;;  %v574_v59 = vpop.f32.mrb[10].mxu1  ;;  %1114 = vst [vmem:[%s1752_s3 + $0x60] sm:$0xff] %v1050_v56  ;;  %v864_v1 = vadd.f32 %v1430_v49, %v570_v41  ;;  %v863_v2 = vadd.f32 %v1432_v52, %v459_v46 }
 0x108   :  { %v1052_v57 = vsel %vm924_vm13, %v860_v39, %v988_v51  ;;  %v1051_v60 = vsel %vm923_vm14, %v859_v44, %v987_v54  ;;  %v463_v62 = vpop.f32.mrb[11].mxu0  ;;  %v576_v63 = vpop.f32.mrb[11].mxu1  ;;  %v865_v3 = vadd.f32 %v1434_v53, %v572_v47  ;;  %vm926_vm0 = vcmp.ge.f32.partialorder %v862_v0, 0.0 }
 0x109   :  { %1116 = vst [vmem:[%s1752_s3 + $0x70] sm:$0xff] %v1052_v57  ;;  %v1053_v61 = vsel %vm925_vm15, %v861_v45, %v989_v55  ;;  %1115 = vst [vmem:[%s1752_s3 + $0x68] sm:$0xff] %v1051_v60  ;;  %v990_v6 = vmul.f32 0.2, %v862_v0  ;;  %vm928_vm1 = vcmp.ge.f32.partialorder %v864_v1, 0.0  ;;  %vm927_vm2 = vcmp.ge.f32.partialorder %v863_v2, 0.0 }
 0x10a   :  { %1117 = vst [vmem:[%s1752_s3 + $0x78] sm:$0xff] %v1053_v61  ;;  %v992_v7 = vmul.f32 0.2, %v864_v1  ;;  %v991_v8 = vmul.f32 0.2, %v863_v2  ;;  %vm929_vm3 = vcmp.ge.f32.partialorder %v865_v3, 0.0  ;;  %v866_v12 = vadd.f32 %v1428_v48, %v461_v58 }
 0x10b   :  { %v993_v9 = vmul.f32 0.2, %v865_v3  ;;  %v1054_v10 = vsel %vm926_vm0, %v862_v0, %v990_v6  ;;  %v868_v13 = vadd.f32 %v1430_v49, %v574_v59  ;;  %v867_v18 = vadd.f32 %v1432_v52, %v463_v62 }
 0x10c   :  { %v1056_v11 = vsel %vm928_vm1, %v864_v1, %v992_v7  ;;  %1118 = vst [vmem:[%s1752_s3 + $0x80] sm:$0xff] %v1054_v10  ;;  %v1055_v16 = vsel %vm927_vm2, %v863_v2, %v991_v8  ;;  %v869_v19 = vadd.f32 %v1434_v53, %v576_v63  ;;  %vm930_vm4 = vcmp.ge.f32.partialorder %v866_v12, 0.0 }
 0x10d   :  { %v467_v4 = vpop.f32.mrb[12].mxu0  ;;  %v580_v5 = vpop.f32.mrb[12].mxu1  ;;  %1120 = vst [vmem:[%s1752_s3 + $0x90] sm:$0xff] %v1056_v11  ;;  %v1057_v17 = vsel %vm929_vm3, %v865_v3, %v993_v9  ;;  %1119 = vst [vmem:[%s1752_s3 + $0x88] sm:$0xff] %v1055_v16  ;;  %v994_v22 = vmul.f32 0.2, %v866_v12 }
 0x10e   :  { %v469_v14 = vpop.f32.mrb[13].mxu0  ;;  %v582_v15 = vpop.f32.mrb[13].mxu1  ;;  %1121 = vst [vmem:[%s1752_s3 + $0x98] sm:$0xff] %v1057_v17  ;;  %vm932_vm5 = vcmp.ge.f32.partialorder %v868_v13, 0.0  ;;  %v996_v23 = vmul.f32 0.2, %v868_v13  ;;  %v870_v34 = vadd.f32 %v1428_v48, %v467_v4  ;;  %v872_v35 = vadd.f32 %v1430_v49, %v580_v5 }
 0x10f   :  { %v471_v20 = vpop.f32.mrb[14].mxu0  ;;  %v584_v21 = vpop.f32.mrb[14].mxu1  ;;  %vm931_vm6 = vcmp.ge.f32.partialorder %v867_v18, 0.0  ;;  %v995_v24 = vmul.f32 0.2, %v867_v18  ;;  %vm933_vm7 = vcmp.ge.f32.partialorder %v869_v19, 0.0  ;;  %v1058_v26 = vsel %vm930_vm4, %v866_v12, %v994_v22 }
 0x110   :  { %v997_v25 = vmul.f32 0.2, %v869_v19  ;;  %v1060_v27 = vsel %vm932_vm5, %v868_v13, %v996_v23  ;;  %v473_v28 = vpop.f32.mrb[15].mxu0  ;;  %v586_v29 = vpop.f32.mrb[15].mxu1  ;;  %1122 = vst [vmem:[%s1752_s3 + $0xa0] sm:$0xff] %v1058_v26  ;;  %v871_v38 = vadd.f32 %v1432_v52, %v469_v14  ;;  %v873_v39 = vadd.f32 %v1434_v53, %v582_v15 }
 0x111   :  { %1124 = vst [vmem:[%s1752_s3 + $0xb0] sm:$0xff] %v1060_v27  ;;  %v1059_v30 = vsel %vm931_vm6, %v867_v18, %v995_v24  ;;  %vm934_vm8 = vcmp.ge.f32.partialorder %v870_v34, 0.0  ;;  %v998_v42 = vmul.f32 0.2, %v870_v34  ;;  %vm936_vm9 = vcmp.ge.f32.partialorder %v872_v35, 0.0 }
 0x112   :  { %v1061_v31 = vsel %vm933_vm7, %v869_v19, %v997_v25  ;;  %1123 = vst [vmem:[%s1752_s3 + $0xa8] sm:$0xff] %v1059_v30  ;;  %v1000_v43 = vmul.f32 0.2, %v872_v35  ;;  %vm935_vm10 = vcmp.ge.f32.partialorder %v871_v38, 0.0  ;;  %v999_v44 = vmul.f32 0.2, %v871_v38 }
 0x113   :  { %1125 = vst [vmem:[%s1752_s3 + $0xb8] sm:$0xff] %v1061_v31  ;;  %vm937_vm11 = vcmp.ge.f32.partialorder %v873_v39, 0.0  ;;  %v1001_v45 = vmul.f32 0.2, %v873_v39  ;;  %v1062_v46 = vsel %vm934_vm8, %v870_v34, %v998_v42  ;;  %v874_v50 = vadd.f32 %v1428_v48, %v471_v20 }
 0x114   :  { %v1064_v47 = vsel %vm936_vm9, %v872_v35, %v1000_v43  ;;  %v876_v51 = vadd.f32 %v1430_v49, %v584_v21  ;;  %1126 = vst [vmem:[%s1752_s3 + $0xc0] sm:$0xff] %v1062_v46  ;;  %v1063_v56 = vsel %vm935_vm10, %v871_v38, %v999_v44  ;;  %v875_v58 = vadd.f32 %v1432_v52, %v473_v28 }
 0x115   :  { %v477_v32 = vpop.f32.mrb[16].mxu0  ;;  %v590_v33 = vpop.f32.mrb[16].mxu1  ;;  %1128 = vst [vmem:[%s1752_s3 + $0xd0] sm:$0xff] %v1064_v47  ;;  %v1065_v57 = vsel %vm937_vm11, %v873_v39, %v1001_v45  ;;  %v877_v59 = vadd.f32 %v1434_v53, %v586_v29  ;;  %1127 = vst [vmem:[%s1752_s3 + $0xc8] sm:$0xff] %v1063_v56  ;;  %vm938_vm12 = vcmp.ge.f32.partialorder %v874_v50, 0.0 }
 0x116   :  { %v479_v36 = vpop.f32.mrb[17].mxu0  ;;  %v592_v37 = vpop.f32.mrb[17].mxu1  ;;  %1129 = vst [vmem:[%s1752_s3 + $0xd8] sm:$0xff] %v1065_v57  ;;  %v1002_v60 = vmul.f32 0.2, %v874_v50  ;;  %vm940_vm13 = vcmp.ge.f32.partialorder %v876_v51, 0.0  ;;  %v878_v8 = vadd.f32 %v1428_v48, %v477_v32  ;;  %v880_v9 = vadd.f32 %v1430_v49, %v590_v33 }
 0x117   :  { %v1536_v40 = vpop.f32.mrb[18].mxu0  ;;  %v594_v41 = vpop.f32.mrb[18].mxu1  ;;  %v1004_v61 = vmul.f32 0.2, %v876_v51  ;;  %vm939_vm14 = vcmp.ge.f32.partialorder %v875_v58, 0.0  ;;  %vm941_vm15 = vcmp.ge.f32.partialorder %v877_v59, 0.0  ;;  %v879_v12 = vadd.f32 %v1432_v52, %v479_v36 }
 0x118   :  { %v483_v54 = vpop.f32.mrb[19].mxu0  ;;  %v596_v55 = vpop.f32.mrb[19].mxu1  ;;  %v1003_v62 = vmul.f32 0.2, %v875_v58  ;;  %v1005_v63 = vmul.f32 0.2, %v877_v59  ;;  %v1066_v0 = vsel %vm938_vm12, %v874_v50, %v1002_v60  ;;  %v881_v13 = vadd.f32 %v1434_v53, %v592_v37 }
 0x119   :  { %v1068_v1 = vsel %vm940_vm13, %v876_v51, %v1004_v61  ;;  %1130 = vst [vmem:[%s1752_s3 + $0xe0] sm:$0xff] %v1066_v0  ;;  %vm942_vm0 = vcmp.ge.f32.partialorder %v878_v8, 0.0  ;;  %v1006_v16 = vmul.f32 0.2, %v878_v8  ;;  %vm944_vm1 = vcmp.ge.f32.partialorder %v880_v9, 0.0 }
 0x11a   :  { %1132 = vst [vmem:[%s1752_s3 + $0xf0] sm:$0xff] %v1068_v1  ;;  %v1067_v4 = vsel %vm939_vm14, %v875_v58, %v1003_v62  ;;  %v1069_v5 = vsel %vm941_vm15, %v877_v59, %v1005_v63  ;;  %v1008_v17 = vmul.f32 0.2, %v880_v9  ;;  %vm943_vm2 = vcmp.ge.f32.partialorder %v879_v12, 0.0 }
 0x11b   :  { %1131 = vst [vmem:[%s1752_s3 + $0xe8] sm:$0xff] %v1067_v4  ;;  %1133 = vst [vmem:[%s1752_s3 + $0xf8] sm:$0xff] %v1069_v5  ;;  %v1007_v18 = vmul.f32 0.2, %v879_v12  ;;  %vm945_vm3 = vcmp.ge.f32.partialorder %v881_v13, 0.0  ;;  %v1070_v20 = vsel %vm942_vm0, %v878_v8, %v1006_v16  ;;  %v882_v22 = vadd.f32 %v1428_v48, %v1536_v40 }
 0x11c   :  { %v1009_v19 = vmul.f32 0.2, %v881_v13  ;;  %v1072_v21 = vsel %vm944_vm1, %v880_v9, %v1008_v17  ;;  %v884_v23 = vadd.f32 %v1430_v49, %v594_v41  ;;  %1134 = vst [vmem:[%s1752_s3 + $0x100] sm:$0xff] %v1070_v20  ;;  %v883_v26 = vadd.f32 %v1432_v52, %v483_v54 }
 0x11d   :  { %v487_v2 = vpop.f32.mrb[20].mxu0  ;;  %v600_v3 = vpop.f32.mrb[20].mxu1  ;;  %1136 = vst [vmem:[%s1752_s3 + $0x110] sm:$0xff] %v1072_v21  ;;  %v1071_v24 = vsel %vm943_vm2, %v879_v12, %v1007_v18  ;;  %v885_v27 = vadd.f32 %v1434_v53, %v596_v55  ;;  %vm946_vm4 = vcmp.ge.f32.partialorder %v882_v22, 0.0  ;;  %v1010_v30 = vmul.f32 0.2, %v882_v22 }
 0x11e   :  { %v489_v6 = vpop.f32.mrb[21].mxu0  ;;  %v602_v7 = vpop.f32.mrb[21].mxu1  ;;  %v1073_v25 = vsel %vm945_vm3, %v881_v13, %v1009_v19  ;;  %1135 = vst [vmem:[%s1752_s3 + $0x108] sm:$0xff] %v1071_v24  ;;  %vm948_vm5 = vcmp.ge.f32.partialorder %v884_v23, 0.0  ;;  %v1012_v31 = vmul.f32 0.2, %v884_v23  ;;  %v886_v42 = vadd.f32 %v1428_v48, %v487_v2 }
 0x11f   :  { %v1568_v10 = vpop.f32.mrb[22].mxu0  ;;  %v1570_v11 = vpop.f32.mrb[22].mxu1  ;;  %1137 = vst [vmem:[%s1752_s3 + $0x118] sm:$0xff] %v1073_v25  ;;  %vm947_vm6 = vcmp.ge.f32.partialorder %v883_v26, 0.0  ;;  %v1011_v32 = vmul.f32 0.2, %v883_v26  ;;  %v1074_v34 = vsel %vm946_vm4, %v882_v22, %v1010_v30  ;;  %v888_v43 = vadd.f32 %v1430_v49, %v600_v3 }
 0x120   :  { %v1574_v14 = vpop.f32.mrb[23].mxu0  ;;  %v1576_v15 = vpop.f32.mrb[23].mxu1  ;;  %vm949_vm7 = vcmp.ge.f32.partialorder %v885_v27, 0.0  ;;  %v1013_v33 = vmul.f32 0.2, %v885_v27  ;;  %v1076_v35 = vsel %vm948_vm5, %v884_v23, %v1012_v31  ;;  %1138 = vst [vmem:[%s1752_s3 + $0x120] sm:$0xff] %v1074_v34  ;;  %v887_v46 = vadd.f32 %v1432_v52, %v489_v6 }
 0x121   :  { %1140 = vst [vmem:[%s1752_s3 + $0x130] sm:$0xff] %v1076_v35  ;;  %v1075_v38 = vsel %vm947_vm6, %v883_v26, %v1011_v32  ;;  %v889_v47 = vadd.f32 %v1434_v53, %v602_v7  ;;  %vm950_vm8 = vcmp.ge.f32.partialorder %v886_v42, 0.0  ;;  %v1014_v50 = vmul.f32 0.2, %v886_v42 }
 0x122   :  { %v1077_v39 = vsel %vm949_vm7, %v885_v27, %v1013_v33  ;;  %1139 = vst [vmem:[%s1752_s3 + $0x128] sm:$0xff] %v1075_v38  ;;  %vm952_vm9 = vcmp.ge.f32.partialorder %v888_v43, 0.0  ;;  %v1016_v51 = vmul.f32 0.2, %v888_v43  ;;  %vm951_vm10 = vcmp.ge.f32.partialorder %v887_v46, 0.0 }
 0x123   :  { %1141 = vst [vmem:[%s1752_s3 + $0x138] sm:$0xff] %v1077_v39  ;;  %v1015_v54 = vmul.f32 0.2, %v887_v46  ;;  %vm953_vm11 = vcmp.ge.f32.partialorder %v889_v47, 0.0  ;;  %v1017_v55 = vmul.f32 0.2, %v889_v47  ;;  %v1078_v56 = vsel %vm950_vm8, %v886_v42, %v1014_v50 }
 0x124   :  { %v1080_v57 = vsel %vm952_vm9, %v888_v43, %v1016_v51  ;;  %v890_v58 = vadd.f32 %v1428_v48, %v1568_v10  ;;  %v892_v59 = vadd.f32 %v1430_v49, %v1570_v11  ;;  %1142 = vst [vmem:[%s1752_s3 + $0x140] sm:$0xff] %v1078_v56  ;;  %v891_v0 = vadd.f32 %v1432_v52, %v1574_v14 }
 0x125   :  { %v1589_v28 = vpop.f32.mrb[24].mxu0  ;;  %v1591_v29 = vpop.f32.mrb[24].mxu1  ;;  %1144 = vst [vmem:[%s1752_s3 + $0x150] sm:$0xff] %v1080_v57  ;;  %v1079_v62 = vsel %vm951_vm10, %v887_v46, %v1015_v54  ;;  %v1081_v63 = vsel %vm953_vm11, %v889_v47, %v1017_v55  ;;  %v893_v1 = vadd.f32 %v1434_v53, %v1576_v15 }
 0x126   :  { %v499_v36 = vpop.f32.mrb[25].mxu0  ;;  %v612_v37 = vpop.f32.mrb[25].mxu1  ;;  %1143 = vst [vmem:[%s1752_s3 + $0x148] sm:$0xff] %v1079_v62  ;;  %1145 = vst [vmem:[%s1752_s3 + $0x158] sm:$0xff] %v1081_v63  ;;  %vm954_vm12 = vcmp.ge.f32.partialorder %v890_v58, 0.0  ;;  %vm956_vm13 = vcmp.ge.f32.partialorder %v892_v59, 0.0  ;;  %v894_v16 = vadd.f32 %v1428_v48, %v1589_v28  ;;  %v896_v17 = vadd.f32 %v1430_v49, %v1591_v29 }
 0x127   :  { %v1605_v40 = vpop.f32.mrb[26].mxu0  ;;  %v1607_v41 = vpop.f32.mrb[26].mxu1  ;;  %v1018_v4 = vmul.f32 0.2, %v890_v58  ;;  %v1020_v5 = vmul.f32 0.2, %v892_v59  ;;  %v895_v18 = vadd.f32 %v1432_v52, %v499_v36  ;;  %v897_v19 = vadd.f32 %v1434_v53, %v612_v37 }
 0x128   :  { %v1617_v44 = vpop.f32.mrb[27].mxu0  ;;  %v1619_v45 = vpop.f32.mrb[27].mxu1  ;;  %vm955_vm14 = vcmp.ge.f32.partialorder %v891_v0, 0.0  ;;  %v1019_v6 = vmul.f32 0.2, %v891_v0  ;;  %vm957_vm15 = vcmp.ge.f32.partialorder %v893_v1, 0.0  ;;  %v898_v26 = vadd.f32 %v1428_v48, %v1605_v40 }
 0x129   :  { %v1021_v7 = vmul.f32 0.2, %v893_v1  ;;  %v1082_v8 = vsel %vm954_vm12, %v890_v58, %v1018_v4  ;;  %v1084_v9 = vsel %vm956_vm13, %v892_v59, %v1020_v5  ;;  %vm958_vm0 = vcmp.ge.f32.partialorder %v894_v16, 0.0 }
 0x12a   :  { %1146 = vst [vmem:[%s1752_s3 + $0x160] sm:$0xff] %v1082_v8  ;;  %1148 = vst [vmem:[%s1752_s3 + $0x170] sm:$0xff] %v1084_v9  ;;  %v1083_v12 = vsel %vm955_vm14, %v891_v0, %v1019_v6  ;;  %v1022_v20 = vmul.f32 0.2, %v894_v16  ;;  %vm960_vm1 = vcmp.ge.f32.partialorder %v896_v17, 0.0  ;;  %vm959_vm2 = vcmp.ge.f32.partialorder %v895_v18, 0.0 }
 0x12b   :  { %v1085_v13 = vsel %vm957_vm15, %v893_v1, %v1021_v7  ;;  %1147 = vst [vmem:[%s1752_s3 + $0x168] sm:$0xff] %v1083_v12  ;;  %v1024_v21 = vmul.f32 0.2, %v896_v17  ;;  %v1023_v22 = vmul.f32 0.2, %v895_v18  ;;  %vm961_vm3 = vcmp.ge.f32.partialorder %v897_v19, 0.0 }
 0x12c   :  { %1149 = vst [vmem:[%s1752_s3 + $0x178] sm:$0xff] %v1085_v13  ;;  %v1025_v23 = vmul.f32 0.2, %v897_v19  ;;  %v1086_v24 = vsel %vm958_vm0, %v894_v16, %v1022_v20  ;;  %v900_v27 = vadd.f32 %v1430_v49, %v1607_v41  ;;  %v899_v30 = vadd.f32 %v1432_v52, %v1617_v44 }
 0x12d   :  { %v1627_v60 = vpop.f32.mrb[28].mxu0  ;;  %v1629_v61 = vpop.f32.mrb[28].mxu1  ;;  %v1088_v25 = vsel %vm960_vm1, %v896_v17, %v1024_v21  ;;  %1150 = vst [vmem:[%s1752_s3 + $0x180] sm:$0xff] %v1086_v24  ;;  %v1087_v28 = vsel %vm959_vm2, %v895_v18, %v1023_v22  ;;  %v901_v31 = vadd.f32 %v1434_v53, %v1619_v45  ;;  %vm962_vm4 = vcmp.ge.f32.partialorder %v898_v26, 0.0 }
 0x12e   :  { %v1641_v2 = vpop.f32.mrb[29].mxu0  ;;  %v1643_v3 = vpop.f32.mrb[29].mxu1  ;;  %1152 = vst [vmem:[%s1752_s3 + $0x190] sm:$0xff] %v1088_v25  ;;  %v1089_v29 = vsel %vm961_vm3, %v897_v19, %v1025_v23  ;;  %1151 = vst [vmem:[%s1752_s3 + $0x188] sm:$0xff] %v1087_v28  ;;  %v1026_v32 = vmul.f32 0.2, %v898_v26  ;;  %v902_v40 = vadd.f32 %v1428_v48, %v1627_v60  ;;  %v904_v41 = vadd.f32 %v1430_v49, %v1629_v61 }
 0x12f   :  { %v1651_v10 = vpop.f32.mrb[30].mxu0  ;;  %v1653_v11 = vpop.f32.mrb[30].mxu1  ;;  %1153 = vst [vmem:[%s1752_s3 + $0x198] sm:$0xff] %v1089_v29  ;;  %vm964_vm5 = vcmp.ge.f32.partialorder %v900_v27, 0.0  ;;  %v1028_v33 = vmul.f32 0.2, %v900_v27  ;;  %v903_v42 = vadd.f32 %v1432_v52, %v1641_v2  ;;  %v905_v43 = vadd.f32 %v1434_v53, %v1643_v3 }
 0x130   :  { %v1661_v14 = vpop.f32.mrb[31].mxu0  ;;  %v1663_v15 = vpop.f32.mrb[31].mxu1  ;;  %vm963_vm6 = vcmp.ge.f32.partialorder %v899_v30, 0.0  ;;  %v1027_v34 = vmul.f32 0.2, %v899_v30  ;;  %vm965_vm7 = vcmp.ge.f32.partialorder %v901_v31, 0.0  ;;  %v1090_v36 = vsel %vm962_vm4, %v898_v26, %v1026_v32 }
 0x131   :  { %v1029_v35 = vmul.f32 0.2, %v901_v31  ;;  %v1092_v37 = vsel %vm964_vm5, %v900_v27, %v1028_v33  ;;  %1154 = vst [vmem:[%s1752_s3 + $0x1a0] sm:$0xff] %v1090_v36  ;;  %vm966_vm8 = vcmp.ge.f32.partialorder %v902_v40, 0.0  ;;  %v1030_v44 = vmul.f32 0.2, %v902_v40 }
 0x132   :  { %1156 = vst [vmem:[%s1752_s3 + $0x1b0] sm:$0xff] %v1092_v37  ;;  %v1091_v38 = vsel %vm963_vm6, %v899_v30, %v1027_v34  ;;  %vm968_vm9 = vcmp.ge.f32.partialorder %v904_v41, 0.0  ;;  %v1032_v45 = vmul.f32 0.2, %v904_v41  ;;  %vm967_vm10 = vcmp.ge.f32.partialorder %v903_v42, 0.0 }
 0x133   :  { %v1093_v39 = vsel %vm965_vm7, %v901_v31, %v1029_v35  ;;  %1155 = vst [vmem:[%s1752_s3 + $0x1a8] sm:$0xff] %v1091_v38  ;;  %v1031_v46 = vmul.f32 0.2, %v903_v42  ;;  %vm969_vm11 = vcmp.ge.f32.partialorder %v905_v43, 0.0  ;;  %v1033_v47 = vmul.f32 0.2, %v905_v43 }
 0x134   :  { %1157 = vst [vmem:[%s1752_s3 + $0x1b8] sm:$0xff] %v1093_v39  ;;  %v1094_v50 = vsel %vm966_vm8, %v902_v40, %v1030_v44  ;;  %v1096_v51 = vsel %vm968_vm9, %v904_v41, %v1032_v45  ;;  %v906_v54 = vadd.f32 %v1428_v48, %v1651_v10  ;;  %v908_v55 = vadd.f32 %v1430_v49, %v1653_v11 }
 0x135   :  { %1158 = vst [vmem:[%s1752_s3 + $0x1c0] sm:$0xff] %v1094_v50  ;;  %1160 = vst [vmem:[%s1752_s3 + $0x1d0] sm:$0xff] %v1096_v51  ;;  %v1095_v56 = vsel %vm967_vm10, %v903_v42, %v1031_v46  ;;  %v1097_v57 = vsel %vm969_vm11, %v905_v43, %v1033_v47  ;;  %v907_v58 = vadd.f32 %v1432_v52, %v1661_v14 }
 0x136   :  { %v909_v59 = vadd.f32 %v1434_v53, %v1663_v15  ;;  %1159 = vst [vmem:[%s1752_s3 + $0x1c8] sm:$0xff] %v1095_v56  ;;  %1161 = vst [vmem:[%s1752_s3 + $0x1d8] sm:$0xff] %v1097_v57  ;;  %vm970_vm12 = vcmp.ge.f32.partialorder %v906_v54, 0.0  ;;  %v1034_v48 = vmul.f32 0.2, %v906_v54  ;;  %vm972_vm13 = vcmp.ge.f32.partialorder %v908_v55, 0.0 }
 0x137   :  { %v1036_v49 = vmul.f32 0.2, %v908_v55  ;;  %vm971_vm14 = vcmp.ge.f32.partialorder %v907_v58, 0.0  ;;  %v1035_v60 = vmul.f32 0.2, %v907_v58 }
 0x138   :  { %vm973_vm15 = vcmp.ge.f32.partialorder %v909_v59, 0.0  ;;  %v1037_v61 = vmul.f32 0.2, %v909_v59  ;;  %v1098_v52 = vsel %vm970_vm12, %v906_v54, %v1034_v48 }
 0x139   :  { %v1100_v62 = vsel %vm972_vm13, %v908_v55, %v1036_v49  ;;  %1162 = vst [vmem:[%s1752_s3 + $0x1e0] sm:$0xff] %v1098_v52  ;;  %v1099_v53 = vsel %vm971_vm14, %v907_v58, %v1035_v60 }
 0x13a   :  { %1164 = vst [vmem:[%s1752_s3 + $0x1f0] sm:$0xff] %v1100_v62  ;;  %v1101_v63 = vsel %vm973_vm15, %v909_v59, %v1037_v61  ;;  %1163 = vst [vmem:[%s1752_s3 + $0x1e8] sm:$0xff] %v1099_v53 }
 0x13b   :  { %1165 = vst [vmem:[%s1752_s3 + $0x1f8] sm:$0xff] %v1101_v63 }

// kernel: progressive_discriminator.8
= control target key start
LH: loop header
LB: loop body
LE: loop exit
PB: predicated region body
PF: predicated region fallthrough
CT: control target
= control target key end

     0   :  { %s2187_s12 = smov 0   ;;  %s2189_s13 = smov 0   ;;  %s3455_s0 = inlined_call_operand.vmem [shape: bf16[128,3840], index: 0, kind: input, shape index: {}]   ;;  %s3456_s1 = inlined_call_operand.vmem [shape: bf16[3840,512], index: 1, kind: input, shape index: {}]   ;;  %s3457_s2 = inlined_call_operand.vmem [shape: f32[1,512], index: 2, kind: input, shape index: {}]   ;;  %s3458_s3 = inlined_call_operand.vmem [shape: f32[128,512], index: 3, kind: output, shape index: {}]  }
   0x1   :  { %s2191_s14 = smov 0   ;;  %s2193_s15 = smov 0  }
   0x2   :  { %s2195_s16 = smov 0  }
   0x3 LB: > { %s25_s17 = sadd.s32 1, %s2160_s15  ;;  %p48_p1 = scmp.ne.s32.totalorder %s2152_s13, %s2148_s12  ;;  %s2164_s16 = sphi %s2195_s16, %s13_s16   ;;  %s2160_s15 = sphi %s2193_s15, %s3462_s15   ;;  %s2156_s14 = sphi %s2191_s14, %s3461_s14   ;;  %s2152_s13 = sphi %s2189_s13, %s3460_s13   ;;  %s2148_s12 = sphi %s2187_s12, %s3459_s12  }
   0x4   : > { %p26_p0 = scmp.ge.s32.totalorder %s25_s17, 15  ;;  %p49_p2 = scmp.eq.s32.totalorder %s2164_s16, 0 }
   0x5   : > { %s41_s19 = sadd.s32 1, %s2152_s13  ;;  %p1868_p5 = scmp.ge.s32.totalorder %s2164_s16, 15 }
   0x6   : > { %s3464_s17 = smov (%p26_p0, %s25_s17), 0  ;;  %p50_p3 = por %p49_p2, %p48_p1 }
   0x7   : > { %s37_s18 = ssub.s32 %s2160_s15, %s3464_s17  ;;  %164 = sbr.rel (%p1868_p5) target bundleno = 26 (0x1a), region = 20 }
   0x8   : > { %p39_p4 = scmp.eq.s32.totalorder %s37_s18, 0 }
   0xa   : > { %s2222_s20 = scalar_select %p39_p4, %s2152_s13, %s41_s19  }
   0xe   : > { %167 = sbr.rel (!%p50_p3) target bundleno = 26 (0x1a), region = 24  ;;  %s169_s21 = sand.u32 (%p50_p3), 1, %s2152_s13  }
   0xf   : > { %s1963_s22 = sshll.u32 (%p50_p3), %s2160_s15, 3  ;;  %s1869_s23 = sshll.u32 (%p50_p3), %s169_s21, 7 }
  0x10   : > { %s2230_s26 = scalar_lea.vmem (%p50_p3), %s3455_s0, %s1963_s22  ;;  %s171_s27 = scalar_lea.vmem (%p50_p3), [#allocation2], %s1869_s23 }
  0x11   : > { %v235_v0 = vld [vmem:[%s2230_s26] sm:$0xff] (%p50_p3)  ;;  %v237_v1 = vld [vmem:[%s2230_s26 + $0x78] sm:$0xff] (%p50_p3)  ;;  %v239_v2 = vld [vmem:[%s2230_s26 + $0xf0] sm:$0xff] (%p50_p3) }
  0x12   : > { %236 = vst [vmem:[%s171_s27] sm:$0xff] (%p50_p3), %v235_v0  ;;  %238 = vst [vmem:[%s171_s27 + $0x8] sm:$0xff] (%p50_p3), %v237_v1  ;;  %v241_v3 = vld [vmem:[%s2230_s26 + $0x168] sm:$0xff] (%p50_p3)  ;;  %v243_v4 = vld [vmem:[%s2230_s26 + $0x1e0] sm:$0xff] (%p50_p3) }
  0x13   : > { %240 = vst [vmem:[%s171_s27 + $0x10] sm:$0xff] (%p50_p3), %v239_v2  ;;  %v245_v5 = vld [vmem:[%s2230_s26 + $0x258] sm:$0xff] (%p50_p3)  ;;  %242 = vst [vmem:[%s171_s27 + $0x18] sm:$0xff] (%p50_p3), %v241_v3  ;;  %v247_v6 = vld [vmem:[%s2230_s26 + $0x2d0] sm:$0xff] (%p50_p3) }
  0x14   : > { %244 = vst [vmem:[%s171_s27 + $0x20] sm:$0xff] (%p50_p3), %v243_v4  ;;  %246 = vst [vmem:[%s171_s27 + $0x28] sm:$0xff] (%p50_p3), %v245_v5  ;;  %v249_v7 = vld [vmem:[%s2230_s26 + $0x348] sm:$0xff] (%p50_p3)  ;;  %v251_v8 = vld [vmem:[%s2230_s26 + $0x3c0] sm:$0xff] (%p50_p3) }
  0x15   : > { %248 = vst [vmem:[%s171_s27 + $0x30] sm:$0xff] %v247_v6  ;;  %250 = vst [vmem:[%s171_s27 + $0x38] sm:$0xff] %v249_v7  ;;  %v253_v9 = vld [vmem:[%s2230_s26 + $0x438] sm:$0xff]  ;;  %v255_v10 = vld [vmem:[%s2230_s26 + $0x4b0] sm:$0xff] }
  0x16   : > { %252 = vst [vmem:[%s171_s27 + $0x40] sm:$0xff] %v251_v8  ;;  %v257_v11 = vld [vmem:[%s2230_s26 + $0x528] sm:$0xff]  ;;  %254 = vst [vmem:[%s171_s27 + $0x48] sm:$0xff] %v253_v9  ;;  %v259_v12 = vld [vmem:[%s2230_s26 + $0x5a0] sm:$0xff] }
  0x17   : > { %256 = vst [vmem:[%s171_s27 + $0x50] sm:$0xff] %v255_v10  ;;  %258 = vst [vmem:[%s171_s27 + $0x58] sm:$0xff] %v257_v11  ;;  %v261_v13 = vld [vmem:[%s2230_s26 + $0x618] sm:$0xff]  ;;  %v263_v14 = vld [vmem:[%s2230_s26 + $0x690] sm:$0xff] }
  0x18   : > { %260 = vst [vmem:[%s171_s27 + $0x60] sm:$0xff] %v259_v12  ;;  %262 = vst [vmem:[%s171_s27 + $0x68] sm:$0xff] %v261_v13  ;;  %v265_v15 = vld [vmem:[%s2230_s26 + $0x708] sm:$0xff] }
  0x19   : > { %264 = vst [vmem:[%s171_s27 + $0x70] sm:$0xff] %v263_v14  ;;  %266 = vst [vmem:[%s171_s27 + $0x78] sm:$0xff] %v265_v15 }
  0x1a PF: > { %p1872_p6 = scmp.ge.s32.totalorder %s2164_s16, 1  ;;  %p286_p7 = scmp.lt.s32.totalorder %s2164_s16, 16 }
  0x1c   : > { %p287_p8 = pnand %p1872_p6, %p286_p7 }
  0x1d   : > { %s293_s28 = sand.u32 (!%p287_p8), 1, %s2148_s12   ;;  %s1874_s29 = sshll.u32 (!%p287_p8), %s2156_s14, 5 }
  0x1e   : > { %290 = sbr.rel (%p287_p8) target bundleno = 469 (0x1d5), region = 66  ;;  %s1873_s30 = sshll.u32 (!%p287_p8), %s293_s28, 7 }
  0x1f   : > { %p339_p9 = scmp.lt.s32.totalorder (!%p287_p8), %s1874_s29, 479  ;;  %s2257_s8 = scalar_lea.vmem (!%p287_p8), [#allocation2], %s1873_s30 }
  0x20   : > { %p1877_p10 = scmp.ne.s32.totalorder (!%p287_p8), %s2156_s14, 0 }
  0x25   : > { %s3466_s29 = smov (!%p339_p9, %s1874_s29), 479  ;;  %369 = sbr.rel (%p1877_p10) target bundleno = 71 (0x47), region = 74 }
  0x26   : > { %s1964_s4 = sshll.u32 %s3466_s29, 4  ;;  %v2166_v16 = vmov (!%p1877_p10), 0.0  }
  0x27   : > { %s2255_s7 = scalar_lea.vmem %s3456_s1, %s1964_s4  ;;  %370 = vst [vmem:[%s3458_s3] sm:$0xff] (!%p1877_p10), %v2166_v16  ;;  %371 = vst [vmem:[%s3458_s3 + $0x8] sm:$0xff] (!%p1877_p10), %v2166_v16 }
  0x28   : > { %372 = vst [vmem:[%s3458_s3 + $0x10] sm:$0xff] (!%p1877_p10), %v2166_v16  ;;  %373 = vst [vmem:[%s3458_s3 + $0x18] sm:$0xff] (!%p1877_p10), %v2166_v16 }
  0x29   : > { %374 = vst [vmem:[%s3458_s3 + $0x20] sm:$0xff] (!%p1877_p10), %v2166_v16  ;;  %375 = vst [vmem:[%s3458_s3 + $0x28] sm:$0xff] (!%p1877_p10), %v2166_v16 }
  0x2a   : > { %376 = vst [vmem:[%s3458_s3 + $0x30] sm:$0xff] (!%p1877_p10), %v2166_v16  ;;  %377 = vst [vmem:[%s3458_s3 + $0x38] sm:$0xff] (!%p1877_p10), %v2166_v16 }
  0x2b   : > { %378 = vst [vmem:[%s3458_s3 + $0x40] sm:$0xff] (!%p1877_p10), %v2166_v16  ;;  %379 = vst [vmem:[%s3458_s3 + $0x48] sm:$0xff] (!%p1877_p10), %v2166_v16 }
  0x2c   : > { %380 = vst [vmem:[%s3458_s3 + $0x50] sm:$0xff] %v2166_v16  ;;  %381 = vst [vmem:[%s3458_s3 + $0x58] sm:$0xff] %v2166_v16 }
  0x2d   : > { %382 = vst [vmem:[%s3458_s3 + $0x60] sm:$0xff] %v2166_v16  ;;  %383 = vst [vmem:[%s3458_s3 + $0x68] sm:$0xff] %v2166_v16 }
  0x2e   : > { %384 = vst [vmem:[%s3458_s3 + $0x70] sm:$0xff] %v2166_v16  ;;  %385 = vst [vmem:[%s3458_s3 + $0x78] sm:$0xff] %v2166_v16 }
  0x2f   : > { %386 = vst [vmem:[%s3458_s3 + $0x80] sm:$0xff] %v2166_v16  ;;  %387 = vst [vmem:[%s3458_s3 + $0x88] sm:$0xff] %v2166_v16 }
  0x30   : > { %388 = vst [vmem:[%s3458_s3 + $0x90] sm:$0xff] %v2166_v16  ;;  %389 = vst [vmem:[%s3458_s3 + $0x98] sm:$0xff] %v2166_v16 }
  0x31   : > { %390 = vst [vmem:[%s3458_s3 + $0xa0] sm:$0xff] %v2166_v16  ;;  %391 = vst [vmem:[%s3458_s3 + $0xa8] sm:$0xff] %v2166_v16 }
  0x32   : > { %392 = vst [vmem:[%s3458_s3 + $0xb0] sm:$0xff] %v2166_v16  ;;  %393 = vst [vmem:[%s3458_s3 + $0xb8] sm:$0xff] %v2166_v16 }
  0x33   : > { %394 = vst [vmem:[%s3458_s3 + $0xc0] sm:$0xff] %v2166_v16  ;;  %395 = vst [vmem:[%s3458_s3 + $0xc8] sm:$0xff] %v2166_v16 }
  0x34   : > { %396 = vst [vmem:[%s3458_s3 + $0xd0] sm:$0xff] %v2166_v16  ;;  %397 = vst [vmem:[%s3458_s3 + $0xd8] sm:$0xff] %v2166_v16 }
  0x35   : > { %398 = vst [vmem:[%s3458_s3 + $0xe0] sm:$0xff] %v2166_v16  ;;  %399 = vst [vmem:[%s3458_s3 + $0xe8] sm:$0xff] %v2166_v16 }
  0x36   : > { %400 = vst [vmem:[%s3458_s3 + $0xf0] sm:$0xff] %v2166_v16  ;;  %401 = vst [vmem:[%s3458_s3 + $0xf8] sm:$0xff] %v2166_v16 }
  0x37   : > { %402 = vst [vmem:[%s3458_s3 + $0x100] sm:$0xff] %v2166_v16  ;;  %403 = vst [vmem:[%s3458_s3 + $0x108] sm:$0xff] %v2166_v16 }
  0x38   : > { %404 = vst [vmem:[%s3458_s3 + $0x110] sm:$0xff] %v2166_v16  ;;  %405 = vst [vmem:[%s3458_s3 + $0x118] sm:$0xff] %v2166_v16 }
  0x39   : > { %406 = vst [vmem:[%s3458_s3 + $0x120] sm:$0xff] %v2166_v16  ;;  %407 = vst [vmem:[%s3458_s3 + $0x128] sm:$0xff] %v2166_v16 }
  0x3a   : > { %408 = vst [vmem:[%s3458_s3 + $0x130] sm:$0xff] %v2166_v16  ;;  %409 = vst [vmem:[%s3458_s3 + $0x138] sm:$0xff] %v2166_v16 }
  0x3b   : > { %410 = vst [vmem:[%s3458_s3 + $0x140] sm:$0xff] %v2166_v16  ;;  %411 = vst [vmem:[%s3458_s3 + $0x148] sm:$0xff] %v2166_v16 }
  0x3c   : > { %412 = vst [vmem:[%s3458_s3 + $0x150] sm:$0xff] %v2166_v16  ;;  %413 = vst [vmem:[%s3458_s3 + $0x158] sm:$0xff] %v2166_v16 }
  0x3d   : > { %414 = vst [vmem:[%s3458_s3 + $0x160] sm:$0xff] %v2166_v16  ;;  %415 = vst [vmem:[%s3458_s3 + $0x168] sm:$0xff] %v2166_v16 }
  0x3e   : > { %416 = vst [vmem:[%s3458_s3 + $0x170] sm:$0xff] %v2166_v16  ;;  %417 = vst [vmem:[%s3458_s3 + $0x178] sm:$0xff] %v2166_v16 }
  0x3f   : > { %418 = vst [vmem:[%s3458_s3 + $0x180] sm:$0xff] %v2166_v16  ;;  %419 = vst [vmem:[%s3458_s3 + $0x188] sm:$0xff] %v2166_v16 }
  0x40   : > { %420 = vst [vmem:[%s3458_s3 + $0x190] sm:$0xff] %v2166_v16  ;;  %421 = vst [vmem:[%s3458_s3 + $0x198] sm:$0xff] %v2166_v16 }
  0x41   : > { %422 = vst [vmem:[%s3458_s3 + $0x1a0] sm:$0xff] %v2166_v16  ;;  %423 = vst [vmem:[%s3458_s3 + $0x1a8] sm:$0xff] %v2166_v16 }
  0x42   : > { %424 = vst [vmem:[%s3458_s3 + $0x1b0] sm:$0xff] %v2166_v16  ;;  %425 = vst [vmem:[%s3458_s3 + $0x1b8] sm:$0xff] %v2166_v16 }
  0x43   : > { %426 = vst [vmem:[%s3458_s3 + $0x1c0] sm:$0xff] %v2166_v16  ;;  %427 = vst [vmem:[%s3458_s3 + $0x1c8] sm:$0xff] %v2166_v16 }
  0x44   : > { %428 = vst [vmem:[%s3458_s3 + $0x1d0] sm:$0xff] %v2166_v16  ;;  %429 = vst [vmem:[%s3458_s3 + $0x1d8] sm:$0xff] %v2166_v16 }
  0x45   : > { %430 = vst [vmem:[%s3458_s3 + $0x1e0] sm:$0xff] %v2166_v16  ;;  %431 = vst [vmem:[%s3458_s3 + $0x1e8] sm:$0xff] %v2166_v16 }
  0x46   : > { %432 = vst [vmem:[%s3458_s3 + $0x1f0] sm:$0xff] %v2166_v16  ;;  %433 = vst [vmem:[%s3458_s3 + $0x1f8] sm:$0xff] %v2166_v16 }
  0x47 PF: > { %v2006_v17 = vld [vmem:[%s2255_s7 + $0x4] ss:$16 sps:$4 sm:$0xff]   ;;  %v2008_v18 = vld [vmem:[%s2255_s7 + $0xc] ss:$16 sps:$4 sm:$0xff]   ;;  %v2010_v19 = vld [vmem:[%s2255_s7] ss:$16 sps:$4 sm:$0xff]  }
  0x48   : > { %978 = vmatprep.subr.bf16.mxu0 %v2006_v17  ;;  %v2011_v20 = vld [vmem:[%s2255_s7 + $0x8] ss:$16 sps:$4 sm:$0xff]   ;;  %1091 = vmatprep.subr.bf16.mxu1 %v2008_v18  ;;  %v2012_v21 = vld [vmem:[%s2255_s7 + $0x24] ss:$16 sps:$4 sm:$0xff]   ;;  %v2014_v22 = vld [vmem:[%s2255_s7 + $0x2c] ss:$16 sps:$4 sm:$0xff]  }
  0x49   : > { %979 = vmatpush1.bf16.msra.mxu0 %v2010_v19  ;;  %1092 = vmatpush1.bf16.msra.mxu1 %v2011_v20  ;;  %v2016_v23 = vld [vmem:[%s2255_s7 + $0x20] ss:$16 sps:$4 sm:$0xff]   ;;  %v2017_v24 = vld [vmem:[%s2255_s7 + $0x28] ss:$16 sps:$4 sm:$0xff]   ;;  %v2018_v25 = vld [vmem:[%s2255_s7 + $0x44] ss:$16 sps:$4 sm:$0xff]  }
  0x4a   : > { %980 = vmatprep.subr.bf16.mxu0 %v2012_v21  ;;  %1093 = vmatprep.subr.bf16.mxu1 %v2014_v22  ;;  %v2020_v26 = vld [vmem:[%s2255_s7 + $0x4c] ss:$16 sps:$4 sm:$0xff]   ;;  %v2022_v27 = vld [vmem:[%s2255_s7 + $0x40] ss:$16 sps:$4 sm:$0xff]   ;;  %v2023_v28 = vld [vmem:[%s2255_s7 + $0x48] ss:$16 sps:$4 sm:$0xff]  }
  0x4b   : > { %v2024_v29 = vld [vmem:[%s2255_s7 + $0x64] ss:$16 sps:$4 sm:$0xff]   ;;  %v2026_v30 = vld [vmem:[%s2255_s7 + $0x6c] ss:$16 sps:$4 sm:$0xff]   ;;  %v2028_v31 = vld [vmem:[%s2255_s7 + $0x60] ss:$16 sps:$4 sm:$0xff]  }
  0x4c   : > { %v2029_v32 = vld [vmem:[%s2255_s7 + $0x68] ss:$16 sps:$4 sm:$0xff]   ;;  %v2030_v33 = vld [vmem:[%s2255_s7 + $0x84] ss:$16 sps:$4 sm:$0xff]   ;;  %v2032_v34 = vld [vmem:[%s2255_s7 + $0x8c] ss:$16 sps:$4 sm:$0xff]  }
  0x4d   : > { %981 = vmatpush1.bf16.msra.mxu0 %v2016_v23  ;;  %1094 = vmatpush1.bf16.msra.mxu1 %v2017_v24  ;;  %v2034_v35 = vld [vmem:[%s2255_s7 + $0x80] ss:$16 sps:$4 sm:$0xff]   ;;  %v2035_v36 = vld [vmem:[%s2255_s7 + $0x88] ss:$16 sps:$4 sm:$0xff]   ;;  %v2036_v37 = vld [vmem:[%s2255_s7 + $0xa4] ss:$16 sps:$4 sm:$0xff]  }
  0x4e   : > { %982 = vmatprep.subr.bf16.mxu0 %v2018_v25  ;;  %1095 = vmatprep.subr.bf16.mxu1 %v2020_v26  ;;  %v2038_v38 = vld [vmem:[%s2255_s7 + $0xac] ss:$16 sps:$4 sm:$0xff]   ;;  %v2040_v39 = vld [vmem:[%s2255_s7 + $0xa0] ss:$16 sps:$4 sm:$0xff]   ;;  %v2041_v40 = vld [vmem:[%s2255_s7 + $0xa8] ss:$16 sps:$4 sm:$0xff]  }
  0x4f   : > { %v2042_v41 = vld [vmem:[%s2255_s7 + $0xc4] ss:$16 sps:$4 sm:$0xff]   ;;  %v2044_v42 = vld [vmem:[%s2255_s7 + $0xcc] ss:$16 sps:$4 sm:$0xff]   ;;  %v2046_v43 = vld [vmem:[%s2255_s7 + $0xc0] ss:$16 sps:$4 sm:$0xff]  }
  0x50   : > { %v2047_v44 = vld [vmem:[%s2255_s7 + $0xc8] ss:$16 sps:$4 sm:$0xff]   ;;  %v2048_v45 = vld [vmem:[%s2255_s7 + $0xe4] ss:$16 sps:$4 sm:$0xff]   ;;  %v2050_v46 = vld [vmem:[%s2255_s7 + $0xec] ss:$16 sps:$4 sm:$0xff]  }
  0x51   : > { %983 = vmatpush1.bf16.msra.mxu0 %v2022_v27  ;;  %1096 = vmatpush1.bf16.msra.mxu1 %v2023_v28  ;;  %v2052_v47 = vld [vmem:[%s2255_s7 + $0xe0] ss:$16 sps:$4 sm:$0xff]   ;;  %v2053_v48 = vld [vmem:[%s2255_s7 + $0xe8] ss:$16 sps:$4 sm:$0xff]   ;;  %v2054_v49 = vld [vmem:[%s2255_s7 + $0x104] ss:$16 sps:$4 sm:$0xff]  }
  0x52   : > { %984 = vmatprep.subr.bf16.mxu0 %v2024_v29  ;;  %1097 = vmatprep.subr.bf16.mxu1 %v2026_v30  ;;  %v2056_v50 = vld [vmem:[%s2255_s7 + $0x10c] ss:$16 sps:$4 sm:$0xff]   ;;  %v2058_v51 = vld [vmem:[%s2255_s7 + $0x100] ss:$16 sps:$4 sm:$0xff]   ;;  %v2059_v52 = vld [vmem:[%s2255_s7 + $0x108] ss:$16 sps:$4 sm:$0xff]  }
  0x53   : > { %v2060_v53 = vld [vmem:[%s2255_s7 + $0x124] ss:$16 sps:$4 sm:$0xff]   ;;  %v2062_v54 = vld [vmem:[%s2255_s7 + $0x12c] ss:$16 sps:$4 sm:$0xff]   ;;  %v2064_v55 = vld [vmem:[%s2255_s7 + $0x120] ss:$16 sps:$4 sm:$0xff]  }
  0x54   : > { %v2065_v56 = vld [vmem:[%s2255_s7 + $0x128] ss:$16 sps:$4 sm:$0xff]   ;;  %v2066_v57 = vld [vmem:[%s2255_s7 + $0x144] ss:$16 sps:$4 sm:$0xff]   ;;  %v2068_v58 = vld [vmem:[%s2255_s7 + $0x14c] ss:$16 sps:$4 sm:$0xff]  }
  0x55   : > { %985 = vmatpush1.bf16.msra.mxu0 %v2028_v31  ;;  %1098 = vmatpush1.bf16.msra.mxu1 %v2029_v32  ;;  %v2070_v59 = vld [vmem:[%s2255_s7 + $0x140] ss:$16 sps:$4 sm:$0xff]   ;;  %v2071_v60 = vld [vmem:[%s2255_s7 + $0x148] ss:$16 sps:$4 sm:$0xff]   ;;  %v2072_v61 = vld [vmem:[%s2255_s7 + $0x164] ss:$16 sps:$4 sm:$0xff]  }
  0x56   : > { %986 = vmatprep.subr.bf16.mxu0 %v2030_v33  ;;  %1099 = vmatprep.subr.bf16.mxu1 %v2032_v34  ;;  %v2074_v62 = vld [vmem:[%s2255_s7 + $0x16c] ss:$16 sps:$4 sm:$0xff]   ;;  %v2076_v63 = vld [vmem:[%s2255_s7 + $0x160] ss:$16 sps:$4 sm:$0xff]   ;;  %v2077_v0 = vld [vmem:[%s2255_s7 + $0x168] ss:$16 sps:$4 sm:$0xff]  }
  0x57   : > { %v2104_v1 = vld [vmem:[%s2257_s8 + $0x4] ss:$8 sps:$4 sm:$0xff]   ;;  %v2082_v4 = vld [vmem:[%s2255_s7 + $0x180] ss:$16 sps:$4 sm:$0xff]   ;;  %v2083_v5 = vld [vmem:[%s2255_s7 + $0x188] ss:$16 sps:$4 sm:$0xff]  }
  0x58   : > { %v2078_v2 = vld [vmem:[%s2255_s7 + $0x184] ss:$16 sps:$4 sm:$0xff]   ;;  %v2080_v3 = vld [vmem:[%s2255_s7 + $0x18c] ss:$16 sps:$4 sm:$0xff]   ;;  %1010 = vmatprep.mubr.bf16.mxu0 %v2104_v1  ;;  %1123 = vmatprep.mubr.bf16.mxu1 %v2104_v1  ;;  %v2088_v8 = vld [vmem:[%s2255_s7 + $0x1a0] ss:$16 sps:$4 sm:$0xff]  }
  0x59   : > { %987 = vmatpush1.bf16.msra.mxu0 %v2034_v35  ;;  %1100 = vmatpush1.bf16.msra.mxu1 %v2035_v36  ;;  %v2084_v6 = vld [vmem:[%s2255_s7 + $0x1a4] ss:$16 sps:$4 sm:$0xff]   ;;  %v2086_v7 = vld [vmem:[%s2255_s7 + $0x1ac] ss:$16 sps:$4 sm:$0xff]   ;;  %v2089_v9 = vld [vmem:[%s2255_s7 + $0x1a8] ss:$16 sps:$4 sm:$0xff]  }
  0x5a   : > { %988 = vmatprep.subr.bf16.mxu0 %v2036_v37  ;;  %1101 = vmatprep.subr.bf16.mxu1 %v2038_v38  ;;  %v2090_v10 = vld [vmem:[%s2255_s7 + $0x1c4] ss:$16 sps:$4 sm:$0xff]   ;;  %v2092_v11 = vld [vmem:[%s2255_s7 + $0x1cc] ss:$16 sps:$4 sm:$0xff]   ;;  %v2094_v12 = vld [vmem:[%s2255_s7 + $0x1c0] ss:$16 sps:$4 sm:$0xff]  }
  0x5b   : > { %v2095_v13 = vld [vmem:[%s2255_s7 + $0x1c8] ss:$16 sps:$4 sm:$0xff]   ;;  %v2096_v14 = vld [vmem:[%s2255_s7 + $0x1e4] ss:$16 sps:$4 sm:$0xff]   ;;  %v2098_v15 = vld [vmem:[%s2255_s7 + $0x1ec] ss:$16 sps:$4 sm:$0xff]  }
  0x5c   : > { %v2100_v16 = vld [vmem:[%s2255_s7 + $0x1e0] ss:$16 sps:$4 sm:$0xff]   ;;  %v2101_v17 = vld [vmem:[%s2255_s7 + $0x1e8] ss:$16 sps:$4 sm:$0xff]   ;;  %v2105_v19 = vld [vmem:[%s2257_s8 + $0x14] ss:$8 sps:$4 sm:$0xff]  }
  0x5d   : > { %989 = vmatpush1.bf16.msra.mxu0 %v2040_v39  ;;  %1102 = vmatpush1.bf16.msra.mxu1 %v2041_v40  ;;  %v2102_v18 = vld [vmem:[%s2257_s8] ss:$8 sps:$4 sm:$0xff]   ;;  %v2107_v20 = vld [vmem:[%s2257_s8 + $0x10] ss:$8 sps:$4 sm:$0xff]   ;;  %v2108_v21 = vld [vmem:[%s2257_s8 + $0x24] ss:$8 sps:$4 sm:$0xff]  }
  0x5e   : > { %990 = vmatprep.subr.bf16.mxu0 %v2042_v41  ;;  %1103 = vmatprep.subr.bf16.mxu1 %v2044_v42  ;;  %v2110_v22 = vld [vmem:[%s2257_s8 + $0x20] ss:$8 sps:$4 sm:$0xff]   ;;  %v2111_v23 = vld [vmem:[%s2257_s8 + $0x34] ss:$8 sps:$4 sm:$0xff]   ;;  %v2113_v24 = vld [vmem:[%s2257_s8 + $0x30] ss:$8 sps:$4 sm:$0xff]  }
  0x5f   : > { %v2114_v25 = vld [vmem:[%s2257_s8 + $0x44] ss:$8 sps:$4 sm:$0xff]   ;;  %v2116_v26 = vld [vmem:[%s2257_s8 + $0x40] ss:$8 sps:$4 sm:$0xff]   ;;  %v2117_v27 = vld [vmem:[%s2257_s8 + $0x54] ss:$8 sps:$4 sm:$0xff]  }
  0x60   : > { %v2119_v28 = vld [vmem:[%s2257_s8 + $0x50] ss:$8 sps:$4 sm:$0xff]   ;;  %v2120_v29 = vld [vmem:[%s2257_s8 + $0x64] ss:$8 sps:$4 sm:$0xff]   ;;  %v2122_v30 = vld [vmem:[%s2257_s8 + $0x60] ss:$8 sps:$4 sm:$0xff]  }
  0x61   : > { %991 = vmatpush1.bf16.msra.mxu0 %v2046_v43  ;;  %1104 = vmatpush1.bf16.msra.mxu1 %v2047_v44  ;;  %v2123_v31 = vld [vmem:[%s2257_s8 + $0x74] ss:$8 sps:$4 sm:$0xff]   ;;  %v2125_v32 = vld [vmem:[%s2257_s8 + $0x70] ss:$8 sps:$4 sm:$0xff]   ;;  %v434_v33 = vld [vmem:[%s3458_s3] sm:$0xff]  ;;  %p1958_p11 = scmp.ne.s32.totalorder %s2156_s14, 14 }
  0x62   : > { %992 = vmatprep.subr.bf16.mxu0 %v2048_v45  ;;  %1105 = vmatprep.subr.bf16.mxu1 %v2050_v46  ;;  %v436_v34 = vld [vmem:[%s3458_s3 + $0x10] sm:$0xff]  ;;  %v435_v35 = vld [vmem:[%s3458_s3 + $0x8] sm:$0xff]  ;;  %v437_v36 = vld [vmem:[%s3458_s3 + $0x18] sm:$0xff] }
  0x63   : > { %v438_v39 = vld [vmem:[%s3458_s3 + $0x20] sm:$0xff]  ;;  %v440_v40 = vld [vmem:[%s3458_s3 + $0x30] sm:$0xff]  ;;  %v439_v45 = vld [vmem:[%s3458_s3 + $0x28] sm:$0xff] }
  0x64   : > { %v441_v46 = vld [vmem:[%s3458_s3 + $0x38] sm:$0xff] }
  0x65   : > { %993 = vmatpush1.bf16.msra.mxu0 %v2052_v47  ;;  %1106 = vmatpush1.bf16.msra.mxu1 %v2053_v48 }
  0x66   : > { %994 = vmatprep.subr.bf16.mxu0 %v2054_v49  ;;  %1107 = vmatprep.subr.bf16.mxu1 %v2056_v50 }
  0x69   : > { %995 = vmatpush1.bf16.msra.mxu0 %v2058_v51  ;;  %1108 = vmatpush1.bf16.msra.mxu1 %v2059_v52 }
  0x6a   : > { %996 = vmatprep.subr.bf16.mxu0 %v2060_v53  ;;  %1109 = vmatprep.subr.bf16.mxu1 %v2062_v54 }
  0x6d   : > { %997 = vmatpush1.bf16.msra.mxu0 %v2064_v55  ;;  %1110 = vmatpush1.bf16.msra.mxu1 %v2065_v56 }
  0x6e   : > { %998 = vmatprep.subr.bf16.mxu0 %v2066_v57  ;;  %1111 = vmatprep.subr.bf16.mxu1 %v2068_v58  ;;  %v442_v57 = vld [vmem:[%s3458_s3 + $0x40] sm:$0xff]  ;;  %v444_v58 = vld [vmem:[%s3458_s3 + $0x50] sm:$0xff] }
  0x71   : > { %999 = vmatpush1.bf16.msra.mxu0 %v2070_v59  ;;  %1112 = vmatpush1.bf16.msra.mxu1 %v2071_v60  ;;  %v443_v59 = vld [vmem:[%s3458_s3 + $0x48] sm:$0xff]  ;;  %v445_v60 = vld [vmem:[%s3458_s3 + $0x58] sm:$0xff] }
  0x72   : > { %1000 = vmatprep.subr.bf16.mxu0 %v2072_v61  ;;  %1113 = vmatprep.subr.bf16.mxu1 %v2074_v62 }
  0x75   : > { %1001 = vmatpush1.bf16.msra.mxu0 %v2076_v63  ;;  %1114 = vmatpush1.bf16.msra.mxu1 %v2077_v0  ;;  %v446_v63 = vld [vmem:[%s3458_s3 + $0x60] sm:$0xff]  ;;  %v448_v0 = vld [vmem:[%s3458_s3 + $0x70] sm:$0xff] }
  0x76   : > { %1002 = vmatprep.subr.bf16.mxu0 %v2078_v2  ;;  %1115 = vmatprep.subr.bf16.mxu1 %v2080_v3 }
  0x79   : > { %1003 = vmatpush1.bf16.msra.mxu0 %v2082_v4  ;;  %1116 = vmatpush1.bf16.msra.mxu1 %v2083_v5  ;;  %v447_v5 = vld [vmem:[%s3458_s3 + $0x68] sm:$0xff] }
  0x7a   : > { %1004 = vmatprep.subr.bf16.mxu0 %v2084_v6  ;;  %1117 = vmatprep.subr.bf16.mxu1 %v2086_v7  ;;  %v449_v6 = vld [vmem:[%s3458_s3 + $0x78] sm:$0xff] }
  0x7d   : > { %1005 = vmatpush1.bf16.msra.mxu0 %v2088_v8  ;;  %1118 = vmatpush1.bf16.msra.mxu1 %v2089_v9 }
  0x7e   : > { %1006 = vmatprep.subr.bf16.mxu0 %v2090_v10  ;;  %1119 = vmatprep.subr.bf16.mxu1 %v2092_v11 }
  0x81   : > { %1007 = vmatpush1.bf16.msra.mxu0 %v2094_v12  ;;  %1120 = vmatpush1.bf16.msra.mxu1 %v2095_v13 }
  0x82   : > { %1008 = vmatprep.subr.bf16.mxu0 %v2096_v14  ;;  %1121 = vmatprep.subr.bf16.mxu1 %v2098_v15 }
  0x85   : > { %1009 = vmatpush1.bf16.msra.mxu0 %v2100_v16  ;;  %1122 = vmatpush1.bf16.msra.mxu1 %v2101_v17  ;;  %v450_v17 = vld [vmem:[%s3458_s3 + $0x80] sm:$0xff] }
  0x88   : > { %1011 = vmatmul.mubr.bf16.vlgmr.msra.gmra.mrb[0].mxu0 %v2102_v18  ;;  %1124 = vmatmul.mubr.bf16.vlgmr.msra.gmra.mrb[0].mxu1 %v2102_v18  ;;  %v452_v18 = vld [vmem:[%s3458_s3 + $0x90] sm:$0xff] }
  0x89   : > { %1020 = vmatprep.mubr.bf16.mxu0 %v2105_v19  ;;  %1133 = vmatprep.mubr.bf16.mxu1 %v2105_v19  ;;  %v451_v19 = vld [vmem:[%s3458_s3 + $0x88] sm:$0xff] }
  0x90   : > { %1021 = vmatmul.mubr.bf16.gmra.mrb[4].mxu0 %v2107_v20  ;;  %1134 = vmatmul.mubr.bf16.gmra.mrb[4].mxu1 %v2107_v20  ;;  %v453_v20 = vld [vmem:[%s3458_s3 + $0x98] sm:$0xff] }
  0x91   : > { %1030 = vmatprep.mubr.bf16.mxu0 %v2108_v21  ;;  %1143 = vmatprep.mubr.bf16.mxu1 %v2108_v21 }
  0x98   : > { %1031 = vmatmul.mubr.bf16.gmra.mrb[8].mxu0 %v2110_v22  ;;  %1144 = vmatmul.mubr.bf16.gmra.mrb[8].mxu1 %v2110_v22 }
  0x99   : > { %1040 = vmatprep.mubr.bf16.mxu0 %v2111_v23  ;;  %1153 = vmatprep.mubr.bf16.mxu1 %v2111_v23  ;;  %v454_v23 = vld [vmem:[%s3458_s3 + $0xa0] sm:$0xff] }
  0xa0   : > { %1041 = vmatmul.mubr.bf16.gmra.mrb[12].mxu0 %v2113_v24  ;;  %1154 = vmatmul.mubr.bf16.gmra.mrb[12].mxu1 %v2113_v24  ;;  %v456_v24 = vld [vmem:[%s3458_s3 + $0xb0] sm:$0xff] }
  0xa1   : > { %1050 = vmatprep.mubr.bf16.mxu0 %v2114_v25  ;;  %1163 = vmatprep.mubr.bf16.mxu1 %v2114_v25 }
  0xa8   : > { %1051 = vmatmul.mubr.bf16.gmra.mrb[16].mxu0 %v2116_v26  ;;  %1164 = vmatmul.mubr.bf16.gmra.mrb[16].mxu1 %v2116_v26 }
  0xa9   : > { %1060 = vmatprep.mubr.bf16.mxu0 %v2117_v27  ;;  %1173 = vmatprep.mubr.bf16.mxu1 %v2117_v27 }
  0xb0   : > { %1061 = vmatmul.mubr.bf16.gmra.mrb[20].mxu0 %v2119_v28  ;;  %1174 = vmatmul.mubr.bf16.gmra.mrb[20].mxu1 %v2119_v28 }
  0xb1   : > { %1070 = vmatprep.mubr.bf16.mxu0 %v2120_v29  ;;  %1183 = vmatprep.mubr.bf16.mxu1 %v2120_v29  ;;  %v455_v29 = vld [vmem:[%s3458_s3 + $0xa8] sm:$0xff] }
  0xb8   : > { %1071 = vmatmul.mubr.bf16.gmra.mrb[24].mxu0 %v2122_v30  ;;  %1184 = vmatmul.mubr.bf16.gmra.mrb[24].mxu1 %v2122_v30  ;;  %v457_v30 = vld [vmem:[%s3458_s3 + $0xb8] sm:$0xff] }
  0xb9   : > { %1080 = vmatprep.mubr.bf16.mxu0 %v2123_v31  ;;  %1193 = vmatprep.mubr.bf16.mxu1 %v2123_v31 }
  0xc0   : > { %1081 = vmatmul.mubr.bf16.gmra.mrb[28].mxu0 %v2125_v32  ;;  %1194 = vmatmul.mubr.bf16.gmra.mrb[28].mxu1 %v2125_v32 }
 0x15b   : > { %v1012_v37 = vpop.f32.mrb[0].mxu0  ;;  %v1125_v38 = vpop.f32.mrb[0].mxu1 }
 0x15c   : > { %v1204_v41 = vadd.f32 %v1012_v37, %v434_v33  ;;  %v1206_v42 = vadd.f32 %v1125_v38, %v436_v34  ;;  %v1014_v43 = vpop.f32.mrb[1].mxu0  ;;  %v1127_v44 = vpop.f32.mrb[1].mxu1 }
 0x15d   : > { %v1205_v47 = vadd.f32 %v1014_v43, %v435_v35  ;;  %v1207_v48 = vadd.f32 %v1127_v44, %v437_v36  ;;  %v1016_v49 = vpop.f32.mrb[2].mxu0  ;;  %v1129_v50 = vpop.f32.mrb[2].mxu1  ;;  %v459_v43 = vld [vmem:[%s3458_s3 + $0xc8] sm:$0xff]  ;;  %v461_v44 = vld [vmem:[%s3458_s3 + $0xd8] sm:$0xff] }
 0x15e   : > { %1268 = vst [vmem:[%s3458_s3] sm:$0xff] %v1204_v41  ;;  %1270 = vst [vmem:[%s3458_s3 + $0x10] sm:$0xff] %v1206_v42  ;;  %v1208_v51 = vadd.f32 %v1016_v49, %v438_v39  ;;  %v1210_v52 = vadd.f32 %v1129_v50, %v440_v40  ;;  %v1018_v53 = vpop.f32.mrb[3].mxu0  ;;  %v1131_v54 = vpop.f32.mrb[3].mxu1  ;;  %v458_v41 = vld [vmem:[%s3458_s3 + $0xc0] sm:$0xff]  ;;  %v460_v42 = vld [vmem:[%s3458_s3 + $0xd0] sm:$0xff] }
 0x15f   : > { %1269 = vst [vmem:[%s3458_s3 + $0x8] sm:$0xff] %v1205_v47  ;;  %1271 = vst [vmem:[%s3458_s3 + $0x18] sm:$0xff] %v1207_v48  ;;  %v1209_v55 = vadd.f32 %v1018_v53, %v439_v45  ;;  %v1211_v56 = vadd.f32 %v1131_v54, %v441_v46  ;;  %v462_v47 = vld [vmem:[%s3458_s3 + $0xe0] sm:$0xff]  ;;  %v464_v48 = vld [vmem:[%s3458_s3 + $0xf0] sm:$0xff] }
 0x160   : > { %1272 = vst [vmem:[%s3458_s3 + $0x20] sm:$0xff] %v1208_v51  ;;  %1274 = vst [vmem:[%s3458_s3 + $0x30] sm:$0xff] %v1210_v52  ;;  %v463_v53 = vld [vmem:[%s3458_s3 + $0xe8] sm:$0xff]  ;;  %v465_v54 = vld [vmem:[%s3458_s3 + $0xf8] sm:$0xff] }
 0x161   : > { %1273 = vst [vmem:[%s3458_s3 + $0x28] sm:$0xff] %v1209_v55  ;;  %1275 = vst [vmem:[%s3458_s3 + $0x38] sm:$0xff] %v1211_v56 }
 0x163   : > { %v1022_v61 = vpop.f32.mrb[4].mxu0  ;;  %v1135_v62 = vpop.f32.mrb[4].mxu1 }
 0x164   : > { %v1212_v1 = vadd.f32 %v1022_v61, %v442_v57  ;;  %v1214_v2 = vadd.f32 %v1135_v62, %v444_v58  ;;  %v1024_v3 = vpop.f32.mrb[5].mxu0  ;;  %v1137_v4 = vpop.f32.mrb[5].mxu1 }
 0x165   : > { %v1213_v7 = vadd.f32 %v1024_v3, %v443_v59  ;;  %v1215_v8 = vadd.f32 %v1137_v4, %v445_v60  ;;  %v1026_v9 = vpop.f32.mrb[6].mxu0  ;;  %v1139_v10 = vpop.f32.mrb[6].mxu1  ;;  %v467_v3 = vld [vmem:[%s3458_s3 + $0x108] sm:$0xff]  ;;  %v469_v4 = vld [vmem:[%s3458_s3 + $0x118] sm:$0xff] }
 0x166   : > { %1276 = vst [vmem:[%s3458_s3 + $0x40] sm:$0xff] %v1212_v1  ;;  %1278 = vst [vmem:[%s3458_s3 + $0x50] sm:$0xff] %v1214_v2  ;;  %v1216_v11 = vadd.f32 %v1026_v9, %v446_v63  ;;  %v1218_v12 = vadd.f32 %v1139_v10, %v448_v0  ;;  %v1028_v13 = vpop.f32.mrb[7].mxu0  ;;  %v1141_v14 = vpop.f32.mrb[7].mxu1  ;;  %v466_v1 = vld [vmem:[%s3458_s3 + $0x100] sm:$0xff]  ;;  %v468_v2 = vld [vmem:[%s3458_s3 + $0x110] sm:$0xff] }
 0x167   : > { %1277 = vst [vmem:[%s3458_s3 + $0x48] sm:$0xff] %v1213_v7  ;;  %1279 = vst [vmem:[%s3458_s3 + $0x58] sm:$0xff] %v1215_v8  ;;  %v1217_v15 = vadd.f32 %v1028_v13, %v447_v5  ;;  %v1219_v16 = vadd.f32 %v1141_v14, %v449_v6  ;;  %v470_v7 = vld [vmem:[%s3458_s3 + $0x120] sm:$0xff]  ;;  %v472_v8 = vld [vmem:[%s3458_s3 + $0x130] sm:$0xff] }
 0x168   : > { %1280 = vst [vmem:[%s3458_s3 + $0x60] sm:$0xff] %v1216_v11  ;;  %1282 = vst [vmem:[%s3458_s3 + $0x70] sm:$0xff] %v1218_v12  ;;  %v471_v13 = vld [vmem:[%s3458_s3 + $0x128] sm:$0xff]  ;;  %v473_v14 = vld [vmem:[%s3458_s3 + $0x138] sm:$0xff] }
 0x169   : > { %1281 = vst [vmem:[%s3458_s3 + $0x68] sm:$0xff] %v1217_v15  ;;  %1283 = vst [vmem:[%s3458_s3 + $0x78] sm:$0xff] %v1219_v16 }
 0x16b   : > { %v1032_v21 = vpop.f32.mrb[8].mxu0  ;;  %v1145_v22 = vpop.f32.mrb[8].mxu1 }
 0x16c   : > { %v1220_v25 = vadd.f32 %v1032_v21, %v450_v17  ;;  %v1222_v26 = vadd.f32 %v1145_v22, %v452_v18  ;;  %v1034_v27 = vpop.f32.mrb[9].mxu0  ;;  %v1147_v28 = vpop.f32.mrb[9].mxu1 }
 0x16d   : > { %v1221_v31 = vadd.f32 %v1034_v27, %v451_v19  ;;  %v1223_v32 = vadd.f32 %v1147_v28, %v453_v20  ;;  %v1036_v33 = vpop.f32.mrb[10].mxu0  ;;  %v1149_v34 = vpop.f32.mrb[10].mxu1  ;;  %v475_v27 = vld [vmem:[%s3458_s3 + $0x148] sm:$0xff]  ;;  %v477_v28 = vld [vmem:[%s3458_s3 + $0x158] sm:$0xff] }
 0x16e   : > { %1284 = vst [vmem:[%s3458_s3 + $0x80] sm:$0xff] %v1220_v25  ;;  %1286 = vst [vmem:[%s3458_s3 + $0x90] sm:$0xff] %v1222_v26  ;;  %v1224_v35 = vadd.f32 %v1036_v33, %v454_v23  ;;  %v1226_v36 = vadd.f32 %v1149_v34, %v456_v24  ;;  %v1038_v37 = vpop.f32.mrb[11].mxu0  ;;  %v1151_v38 = vpop.f32.mrb[11].mxu1  ;;  %v474_v25 = vld [vmem:[%s3458_s3 + $0x140] sm:$0xff]  ;;  %v476_v26 = vld [vmem:[%s3458_s3 + $0x150] sm:$0xff] }
 0x16f   : > { %1285 = vst [vmem:[%s3458_s3 + $0x88] sm:$0xff] %v1221_v31  ;;  %1287 = vst [vmem:[%s3458_s3 + $0x98] sm:$0xff] %v1223_v32  ;;  %v1225_v39 = vadd.f32 %v1038_v37, %v455_v29  ;;  %v1227_v40 = vadd.f32 %v1151_v38, %v457_v30  ;;  %v478_v31 = vld [vmem:[%s3458_s3 + $0x160] sm:$0xff]  ;;  %v480_v32 = vld [vmem:[%s3458_s3 + $0x170] sm:$0xff] }
 0x170   : > { %1288 = vst [vmem:[%s3458_s3 + $0xa0] sm:$0xff] %v1224_v35  ;;  %1290 = vst [vmem:[%s3458_s3 + $0xb0] sm:$0xff] %v1226_v36  ;;  %v479_v37 = vld [vmem:[%s3458_s3 + $0x168] sm:$0xff]  ;;  %v481_v38 = vld [vmem:[%s3458_s3 + $0x178] sm:$0xff] }
 0x171   : > { %1289 = vst [vmem:[%s3458_s3 + $0xa8] sm:$0xff] %v1225_v39  ;;  %1291 = vst [vmem:[%s3458_s3 + $0xb8] sm:$0xff] %v1227_v40 }
 0x173   : > { %v1042_v45 = vpop.f32.mrb[12].mxu0  ;;  %v1155_v46 = vpop.f32.mrb[12].mxu1 }
 0x174   : > { %v1228_v49 = vadd.f32 %v1042_v45, %v458_v41  ;;  %v1230_v50 = vadd.f32 %v1155_v46, %v460_v42  ;;  %v1044_v51 = vpop.f32.mrb[13].mxu0  ;;  %v1157_v52 = vpop.f32.mrb[13].mxu1 }
 0x175   : > { %v1229_v55 = vadd.f32 %v1044_v51, %v459_v43  ;;  %v1231_v56 = vadd.f32 %v1157_v52, %v461_v44  ;;  %v1046_v57 = vpop.f32.mrb[14].mxu0  ;;  %v1159_v58 = vpop.f32.mrb[14].mxu1  ;;  %v483_v51 = vld [vmem:[%s3458_s3 + $0x188] sm:$0xff]  ;;  %v485_v52 = vld [vmem:[%s3458_s3 + $0x198] sm:$0xff] }
 0x176   : > { %1292 = vst [vmem:[%s3458_s3 + $0xc0] sm:$0xff] %v1228_v49  ;;  %1294 = vst [vmem:[%s3458_s3 + $0xd0] sm:$0xff] %v1230_v50  ;;  %v1232_v59 = vadd.f32 %v1046_v57, %v462_v47  ;;  %v1234_v60 = vadd.f32 %v1159_v58, %v464_v48  ;;  %v1048_v61 = vpop.f32.mrb[15].mxu0  ;;  %v1161_v62 = vpop.f32.mrb[15].mxu1  ;;  %v482_v49 = vld [vmem:[%s3458_s3 + $0x180] sm:$0xff]  ;;  %v484_v50 = vld [vmem:[%s3458_s3 + $0x190] sm:$0xff] }
 0x177   : > { %1293 = vst [vmem:[%s3458_s3 + $0xc8] sm:$0xff] %v1229_v55  ;;  %1295 = vst [vmem:[%s3458_s3 + $0xd8] sm:$0xff] %v1231_v56  ;;  %v1233_v63 = vadd.f32 %v1048_v61, %v463_v53  ;;  %v1235_v0 = vadd.f32 %v1161_v62, %v465_v54  ;;  %v486_v55 = vld [vmem:[%s3458_s3 + $0x1a0] sm:$0xff]  ;;  %v488_v56 = vld [vmem:[%s3458_s3 + $0x1b0] sm:$0xff] }
 0x178   : > { %1296 = vst [vmem:[%s3458_s3 + $0xe0] sm:$0xff] %v1232_v59  ;;  %1298 = vst [vmem:[%s3458_s3 + $0xf0] sm:$0xff] %v1234_v60  ;;  %v487_v61 = vld [vmem:[%s3458_s3 + $0x1a8] sm:$0xff]  ;;  %v489_v62 = vld [vmem:[%s3458_s3 + $0x1b8] sm:$0xff] }
 0x179   : > { %1297 = vst [vmem:[%s3458_s3 + $0xe8] sm:$0xff] %v1233_v63  ;;  %1299 = vst [vmem:[%s3458_s3 + $0xf8] sm:$0xff] %v1235_v0 }
 0x17b   : > { %v1052_v5 = vpop.f32.mrb[16].mxu0  ;;  %v1165_v6 = vpop.f32.mrb[16].mxu1 }
 0x17c   : > { %v1236_v9 = vadd.f32 %v1052_v5, %v466_v1  ;;  %v1238_v10 = vadd.f32 %v1165_v6, %v468_v2  ;;  %v1054_v11 = vpop.f32.mrb[17].mxu0  ;;  %v1167_v12 = vpop.f32.mrb[17].mxu1 }
 0x17d   : > { %v1237_v15 = vadd.f32 %v1054_v11, %v467_v3  ;;  %v1239_v16 = vadd.f32 %v1167_v12, %v469_v4  ;;  %v1056_v17 = vpop.f32.mrb[18].mxu0  ;;  %v1169_v18 = vpop.f32.mrb[18].mxu1  ;;  %v491_v11 = vld [vmem:[%s3458_s3 + $0x1c8] sm:$0xff]  ;;  %v493_v12 = vld [vmem:[%s3458_s3 + $0x1d8] sm:$0xff] }
 0x17e   : > { %1300 = vst [vmem:[%s3458_s3 + $0x100] sm:$0xff] %v1236_v9  ;;  %1302 = vst [vmem:[%s3458_s3 + $0x110] sm:$0xff] %v1238_v10  ;;  %v1240_v19 = vadd.f32 %v1056_v17, %v470_v7  ;;  %v1242_v20 = vadd.f32 %v1169_v18, %v472_v8  ;;  %v1058_v21 = vpop.f32.mrb[19].mxu0  ;;  %v1171_v22 = vpop.f32.mrb[19].mxu1  ;;  %v490_v9 = vld [vmem:[%s3458_s3 + $0x1c0] sm:$0xff]  ;;  %v492_v10 = vld [vmem:[%s3458_s3 + $0x1d0] sm:$0xff] }
 0x17f   : > { %1301 = vst [vmem:[%s3458_s3 + $0x108] sm:$0xff] %v1237_v15  ;;  %1303 = vst [vmem:[%s3458_s3 + $0x118] sm:$0xff] %v1239_v16  ;;  %v1241_v23 = vadd.f32 %v1058_v21, %v471_v13  ;;  %v1243_v24 = vadd.f32 %v1171_v22, %v473_v14  ;;  %v494_v15 = vld [vmem:[%s3458_s3 + $0x1e0] sm:$0xff]  ;;  %v496_v16 = vld [vmem:[%s3458_s3 + $0x1f0] sm:$0xff] }
 0x180   : > { %1304 = vst [vmem:[%s3458_s3 + $0x120] sm:$0xff] %v1240_v19  ;;  %1306 = vst [vmem:[%s3458_s3 + $0x130] sm:$0xff] %v1242_v20  ;;  %v495_v21 = vld [vmem:[%s3458_s3 + $0x1e8] sm:$0xff]  ;;  %v497_v22 = vld [vmem:[%s3458_s3 + $0x1f8] sm:$0xff] }
 0x181   : > { %1305 = vst [vmem:[%s3458_s3 + $0x128] sm:$0xff] %v1241_v23  ;;  %1307 = vst [vmem:[%s3458_s3 + $0x138] sm:$0xff] %v1243_v24 }
 0x183   : > { %v1062_v29 = vpop.f32.mrb[20].mxu0  ;;  %v1175_v30 = vpop.f32.mrb[20].mxu1 }
 0x184   : > { %v1244_v33 = vadd.f32 %v1062_v29, %v474_v25  ;;  %v1246_v34 = vadd.f32 %v1175_v30, %v476_v26  ;;  %v1064_v35 = vpop.f32.mrb[21].mxu0  ;;  %v1177_v36 = vpop.f32.mrb[21].mxu1 }
 0x185   : > { %v1245_v39 = vadd.f32 %v1064_v35, %v475_v27  ;;  %v1247_v40 = vadd.f32 %v1177_v36, %v477_v28  ;;  %v1066_v41 = vpop.f32.mrb[22].mxu0  ;;  %v1179_v42 = vpop.f32.mrb[22].mxu1  ;;  %v1400_v35 = vld [vmem:[%s3457_s2] sm:$0xf] (!%p1958_p11) }
 0x186   : > { %1308 = vst [vmem:[%s3458_s3 + $0x140] sm:$0xff] %v1244_v33  ;;  %1310 = vst [vmem:[%s3458_s3 + $0x150] sm:$0xff] %v1246_v34  ;;  %v1248_v43 = vadd.f32 %v1066_v41, %v478_v31  ;;  %v1250_v44 = vadd.f32 %v1179_v42, %v480_v32  ;;  %v1068_v45 = vpop.f32.mrb[23].mxu0  ;;  %v1181_v46 = vpop.f32.mrb[23].mxu1  ;;  %v1402_v33 = vlaneseq (!%p1958_p11)  ;;  %v1336_v36 = vld [vmem:[%s3458_s3] sm:$0xff] (!%p1958_p11)  ;;  %v1338_v42 = vld [vmem:[%s3458_s3 + $0x10] sm:$0xff] (!%p1958_p11) }
 0x187   : > { %1309 = vst [vmem:[%s3458_s3 + $0x148] sm:$0xff] %v1245_v39  ;;  %1311 = vst [vmem:[%s3458_s3 + $0x158] sm:$0xff] %v1247_v40  ;;  %v1249_v47 = vadd.f32 %v1068_v45, %v479_v37  ;;  %v1251_v48 = vadd.f32 %v1181_v46, %v481_v38  ;;  %v1337_v38 = vld [vmem:[%s3458_s3 + $0x8] sm:$0xff] (!%p1958_p11) }
 0x188   : > { %1312 = vst [vmem:[%s3458_s3 + $0x160] sm:$0xff] %v1248_v43  ;;  %1314 = vst [vmem:[%s3458_s3 + $0x170] sm:$0xff] %v1250_v44  ;;  %v1403_v34 = vshrl.u32 (!%p1958_p11), %v1402_v33, 7  ;;  %v1339_v43 = vld [vmem:[%s3458_s3 + $0x18] sm:$0xff] (!%p1958_p11)  ;;  %v1340_v44 = vld [vmem:[%s3458_s3 + $0x20] sm:$0xff] (!%p1958_p11) }
 0x189   : > { %1313 = vst [vmem:[%s3458_s3 + $0x168] sm:$0xff] %v1249_v47  ;;  %1315 = vst [vmem:[%s3458_s3 + $0x178] sm:$0xff] %v1251_v48 }
 0x18a   : > { %v1404_v37 = vsub.s32 (!%p1958_p11), 0, %v1403_v34  ;;  %v1408_v39 = vsub.s32 (!%p1958_p11), 1, %v1403_v34  ;;  %v1412_v40 = vsub.s32 (!%p1958_p11), 2, %v1403_v34  ;;  %v1416_v41 = vsub.s32 (!%p1958_p11), 3, %v1403_v34 }
 0x18b   : > { %v1072_v53 = vpop.f32.mrb[24].mxu0  ;;  %v1185_v54 = vpop.f32.mrb[24].mxu1 }
 0x18c   : > { %v1252_v57 = vadd.f32 %v1072_v53, %v482_v49  ;;  %v1254_v58 = vadd.f32 %v1185_v54, %v484_v50  ;;  %v1074_v59 = vpop.f32.mrb[25].mxu0  ;;  %v1187_v60 = vpop.f32.mrb[25].mxu1  ;;  %v2999_v45 = vrot.slane (!%p1958_p11), %v1400_v35, %v1404_v37  ;;  %v3001_v46 = vrot.slane (!%p1958_p11), %v1400_v35, %v1408_v39  ;;  %v1341_v49 = vld [vmem:[%s3458_s3 + $0x28] sm:$0xff] (!%p1958_p11)  ;;  %v1342_v50 = vld [vmem:[%s3458_s3 + $0x30] sm:$0xff] (!%p1958_p11) }
 0x18d   : > { %v1253_v63 = vadd.f32 %v1074_v59, %v483_v51  ;;  %v1255_v0 = vadd.f32 %v1187_v60, %v485_v52  ;;  %v1076_v1 = vpop.f32.mrb[26].mxu0  ;;  %v1189_v2 = vpop.f32.mrb[26].mxu1  ;;  %v3003_v47 = vrot.slane (!%p1958_p11), %v1400_v35, %v1412_v40  ;;  %v3005_v48 = vrot.slane (!%p1958_p11), %v1400_v35, %v1416_v41  ;;  %v1343_v51 = vld [vmem:[%s3458_s3 + $0x38] sm:$0xff] (!%p1958_p11)  ;;  %v1354_v41 = vld [vmem:[%s3458_s3 + $0x90] sm:$0xff] (!%p1958_p11) }
 0x18e   : > { %1316 = vst [vmem:[%s3458_s3 + $0x180] sm:$0xff] %v1252_v57  ;;  %1318 = vst [vmem:[%s3458_s3 + $0x190] sm:$0xff] %v1254_v58  ;;  %v1256_v3 = vadd.f32 %v1076_v1, %v486_v55  ;;  %v1258_v4 = vadd.f32 %v1189_v2, %v488_v56  ;;  %v1078_v5 = vpop.f32.mrb[27].mxu0  ;;  %v1191_v6 = vpop.f32.mrb[27].mxu1  ;;  %v1422_v52 = vadd.f32 (!%p1958_p11), %v2999_v45, %v1336_v36  ;;  %v1353_v36 = vld [vmem:[%s3458_s3 + $0x88] sm:$0xff] (!%p1958_p11) }
 0x18f   : > { %1317 = vst [vmem:[%s3458_s3 + $0x188] sm:$0xff] %v1253_v63  ;;  %1319 = vst [vmem:[%s3458_s3 + $0x198] sm:$0xff] %v1255_v0  ;;  %v1257_v7 = vadd.f32 %v1078_v5, %v487_v61  ;;  %v1259_v8 = vadd.f32 %v1191_v6, %v489_v62  ;;  %v1423_v53 = vadd.f32 (!%p1958_p11), %v3001_v46, %v1337_v38 }
 0x190   : > { %1320 = vst [vmem:[%s3458_s3 + $0x1a0] sm:$0xff] %v1256_v3  ;;  %1322 = vst [vmem:[%s3458_s3 + $0x1b0] sm:$0xff] %v1258_v4  ;;  %v1424_v54 = vadd.f32 (!%p1958_p11), %v3003_v47, %v1338_v42  ;;  %v1425_v55 = vadd.f32 (!%p1958_p11), %v3005_v48, %v1339_v43  ;;  %v1426_v56 = vadd.f32 (!%p1958_p11), %v2999_v45, %v1340_v44  ;;  %vm1486_vm0 = vcmp.ge.f32.partialorder (!%p1958_p11), %v1422_v52, 0.0  ;;  %v1344_v3 = vld [vmem:[%s3458_s3 + $0x40] sm:$0xff] (!%p1958_p11)  ;;  %v1345_v4 = vld [vmem:[%s3458_s3 + $0x48] sm:$0xff] (!%p1958_p11) }
 0x191   : > { %1321 = vst [vmem:[%s3458_s3 + $0x1a8] sm:$0xff] %v1257_v7  ;;  %1323 = vst [vmem:[%s3458_s3 + $0x1b8] sm:$0xff] %v1259_v8  ;;  %v1427_v57 = vadd.f32 (!%p1958_p11), %v3001_v46, %v1341_v49  ;;  %v1428_v58 = vadd.f32 (!%p1958_p11), %v3003_v47, %v1342_v50  ;;  %v1429_v59 = vadd.f32 (!%p1958_p11), %v3005_v48, %v1343_v51  ;;  %v1550_v60 = vmul.f32 (!%p1958_p11), 0.2, %v1422_v52  ;;  %v1346_v8 = vld [vmem:[%s3458_s3 + $0x50] sm:$0xff] (!%p1958_p11)  ;;  %v1355_v42 = vld [vmem:[%s3458_s3 + $0x98] sm:$0xff] (!%p1958_p11) }
 0x192   : > { %vm1487_vm1 = vcmp.ge.f32.partialorder (!%p1958_p11), %v1423_v53, 0.0  ;;  %v1551_v61 = vmul.f32 (!%p1958_p11), 0.2, %v1423_v53  ;;  %vm1488_vm2 = vcmp.ge.f32.partialorder (!%p1958_p11), %v1424_v54, 0.0  ;;  %v1552_v62 = vmul.f32 (!%p1958_p11), 0.2, %v1424_v54 }
 0x193   : > { %v1082_v13 = vpop.f32.mrb[28].mxu0  ;;  %v1195_v14 = vpop.f32.mrb[28].mxu1  ;;  %1335 = sbr.rel (%p1958_p11) target bundleno = 469 (0x1d5), region = 78  ;;  %vm1489_vm3 = vcmp.ge.f32.partialorder (!%p1958_p11), %v1425_v55, 0.0  ;;  %v1553_v63 = vmul.f32 (!%p1958_p11), 0.2, %v1425_v55  ;;  %v1614_v0 = vsel (!%p1958_p11), %vm1486_vm0, %v1422_v52, %v1550_v60 }
 0x194   : > { %v1260_v17 = vadd.f32 %v1082_v13, %v490_v9  ;;  %v1262_v18 = vadd.f32 %v1195_v14, %v492_v10  ;;  %v1084_v19 = vpop.f32.mrb[29].mxu0  ;;  %v1197_v20 = vpop.f32.mrb[29].mxu1  ;;  %v1615_v1 = vsel (!%p1958_p11), %vm1487_vm1, %v1423_v53, %v1551_v61  ;;  %vm1490_vm4 = vcmp.ge.f32.partialorder (!%p1958_p11), %v1426_v56, 0.0  ;;  %1678 = vst [vmem:[%s3458_s3] sm:$0xff] (!%p1958_p11), %v1614_v0  ;;  %v1347_v9 = vld [vmem:[%s3458_s3 + $0x58] sm:$0xff] (!%p1958_p11)  ;;  %v1348_v10 = vld [vmem:[%s3458_s3 + $0x60] sm:$0xff] (!%p1958_p11)  ;;  %v1358_v61 = vld [vmem:[%s3458_s3 + $0xb0] sm:$0xff] (!%p1958_p11) }
 0x195   : > { %v1261_v23 = vadd.f32 %v1084_v19, %v491_v11  ;;  %v1263_v24 = vadd.f32 %v1197_v20, %v493_v12  ;;  %v1086_v25 = vpop.f32.mrb[30].mxu0  ;;  %v1199_v26 = vpop.f32.mrb[30].mxu1  ;;  %v1554_v2 = vmul.f32 (!%p1958_p11), 0.2, %v1426_v56  ;;  %1679 = vst [vmem:[%s3458_s3 + $0x8] sm:$0xff] (!%p1958_p11), %v1615_v1  ;;  %v1616_v5 = vsel (!%p1958_p11), %vm1488_vm2, %v1424_v54, %v1552_v62  ;;  %v1356_v43 = vld [vmem:[%s3458_s3 + $0xa0] sm:$0xff] (!%p1958_p11) }
 0x196   : > { %1324 = vst [vmem:[%s3458_s3 + $0x1c0] sm:$0xff] %v1260_v17  ;;  %1326 = vst [vmem:[%s3458_s3 + $0x1d0] sm:$0xff] %v1262_v18  ;;  %v1264_v27 = vadd.f32 %v1086_v25, %v494_v15  ;;  %v1266_v28 = vadd.f32 %v1199_v26, %v496_v16  ;;  %v1088_v29 = vpop.f32.mrb[31].mxu0  ;;  %v1201_v30 = vpop.f32.mrb[31].mxu1  ;;  %v1617_v6 = vsel (!%p1958_p11), %vm1489_vm3, %v1425_v55, %v1553_v63  ;;  %vm1491_vm5 = vcmp.ge.f32.partialorder (!%p1958_p11), %v1427_v57, 0.0  ;;  %v1351_v25 = vld [vmem:[%s3458_s3 + $0x78] sm:$0xff] (!%p1958_p11) }
 0x197   : > { %1325 = vst [vmem:[%s3458_s3 + $0x1c8] sm:$0xff] %v1261_v23  ;;  %1327 = vst [vmem:[%s3458_s3 + $0x1d8] sm:$0xff] %v1263_v24  ;;  %v1265_v31 = vadd.f32 %v1088_v29, %v495_v21  ;;  %v1267_v32 = vadd.f32 %v1201_v30, %v497_v22  ;;  %v1555_v7 = vmul.f32 (!%p1958_p11), 0.2, %v1427_v57  ;;  %v1618_v11 = vsel (!%p1958_p11), %vm1490_vm4, %v1426_v56, %v1554_v2  ;;  %v1349_v21 = vld [vmem:[%s3458_s3 + $0x68] sm:$0xff] (!%p1958_p11)  ;;  %v1350_v22 = vld [vmem:[%s3458_s3 + $0x70] sm:$0xff] (!%p1958_p11) }
 0x198   : > { %1328 = vst [vmem:[%s3458_s3 + $0x1e0] sm:$0xff] %v1264_v27  ;;  %1330 = vst [vmem:[%s3458_s3 + $0x1f0] sm:$0xff] %v1266_v28  ;;  %vm1492_vm6 = vcmp.ge.f32.partialorder (!%p1958_p11), %v1428_v58, 0.0  ;;  %v1556_v12 = vmul.f32 (!%p1958_p11), 0.2, %v1428_v58  ;;  %vm1493_vm7 = vcmp.ge.f32.partialorder (!%p1958_p11), %v1429_v59, 0.0  ;;  %v1430_v15 = vadd.f32 (!%p1958_p11), %v2999_v45, %v1344_v3 }
 0x199   : > { %1329 = vst [vmem:[%s3458_s3 + $0x1e8] sm:$0xff] %v1265_v31  ;;  %1331 = vst [vmem:[%s3458_s3 + $0x1f8] sm:$0xff] %v1267_v32  ;;  %v1619_v13 = vsel (!%p1958_p11), %vm1491_vm5, %v1427_v57, %v1555_v7  ;;  %v1557_v14 = vmul.f32 (!%p1958_p11), 0.2, %v1429_v59  ;;  %v1431_v16 = vadd.f32 (!%p1958_p11), %v3001_v46, %v1345_v4  ;;  %v1432_v18 = vadd.f32 (!%p1958_p11), %v3003_v47, %v1346_v8  ;;  %v1352_v26 = vld [vmem:[%s3458_s3 + $0x80] sm:$0xff] (!%p1958_p11)  ;;  %v1357_v56 = vld [vmem:[%s3458_s3 + $0xa8] sm:$0xff] (!%p1958_p11) }
 0x19a   : > { %1680 = vst [vmem:[%s3458_s3 + $0x10] sm:$0xff] %v1616_v5  ;;  %1681 = vst [vmem:[%s3458_s3 + $0x18] sm:$0xff] %v1617_v6  ;;  %v1620_v17 = vsel %vm1492_vm6, %v1428_v58, %v1556_v12  ;;  %v1433_v19 = vadd.f32 %v3005_v48, %v1347_v9  ;;  %v1434_v20 = vadd.f32 %v2999_v45, %v1348_v10  ;;  %vm1494_vm8 = vcmp.ge.f32.partialorder %v1430_v15, 0.0  ;;  %v1359_v62 = vld [vmem:[%s3458_s3 + $0xb8] sm:$0xff]  ;;  %v1360_v63 = vld [vmem:[%s3458_s3 + $0xc0] sm:$0xff] }
 0x19b   : > { %1682 = vst [vmem:[%s3458_s3 + $0x20] sm:$0xff] %v1618_v11  ;;  %1683 = vst [vmem:[%s3458_s3 + $0x28] sm:$0xff] %v1619_v13  ;;  %v1621_v23 = vsel %vm1493_vm7, %v1429_v59, %v1557_v14  ;;  %v1558_v24 = vmul.f32 0.2, %v1430_v15  ;;  %vm1495_vm9 = vcmp.ge.f32.partialorder %v1431_v16, 0.0  ;;  %vm1496_vm10 = vcmp.ge.f32.partialorder %v1432_v18, 0.0 }
 0x19c   : > { %1684 = vst [vmem:[%s3458_s3 + $0x30] sm:$0xff] %v1620_v17  ;;  %1685 = vst [vmem:[%s3458_s3 + $0x38] sm:$0xff] %v1621_v23  ;;  %v1559_v27 = vmul.f32 0.2, %v1431_v16  ;;  %v1560_v28 = vmul.f32 0.2, %v1432_v18  ;;  %v1435_v34 = vadd.f32 %v3001_v46, %v1349_v21  ;;  %v1436_v35 = vadd.f32 %v3003_v47, %v1350_v22 }
 0x19d   : > { %vm1497_vm11 = vcmp.ge.f32.partialorder %v1433_v19, 0.0  ;;  %v1622_v29 = vsel %vm1494_vm8, %v1430_v15, %v1558_v24  ;;  %v1561_v30 = vmul.f32 0.2, %v1433_v19  ;;  %vm1498_vm12 = vcmp.ge.f32.partialorder %v1434_v20, 0.0  ;;  %v1361_v8 = vld [vmem:[%s3458_s3 + $0xc8] sm:$0xff]  ;;  %v1362_v13 = vld [vmem:[%s3458_s3 + $0xd0] sm:$0xff] }
 0x19e   : > { %v1562_v31 = vmul.f32 0.2, %v1434_v20  ;;  %1686 = vst [vmem:[%s3458_s3 + $0x40] sm:$0xff] %v1622_v29  ;;  %v1623_v32 = vsel %vm1495_vm9, %v1431_v16, %v1559_v27  ;;  %v1624_v33 = vsel %vm1496_vm10, %v1432_v18, %v1560_v28  ;;  %v1437_v39 = vadd.f32 %v3005_v48, %v1351_v25  ;;  %v1363_v14 = vld [vmem:[%s3458_s3 + $0xd8] sm:$0xff]  ;;  %v1364_v15 = vld [vmem:[%s3458_s3 + $0xe0] sm:$0xff]  ;;  %v1365_v24 = vld [vmem:[%s3458_s3 + $0xe8] sm:$0xff] }
 0x19f   : > { %1687 = vst [vmem:[%s3458_s3 + $0x48] sm:$0xff] %v1623_v32  ;;  %1688 = vst [vmem:[%s3458_s3 + $0x50] sm:$0xff] %v1624_v33  ;;  %v1625_v37 = vsel %vm1497_vm11, %v1433_v19, %v1561_v30  ;;  %v1438_v40 = vadd.f32 %v2999_v45, %v1352_v26  ;;  %vm1499_vm13 = vcmp.ge.f32.partialorder %v1435_v34, 0.0  ;;  %v1563_v44 = vmul.f32 0.2, %v1435_v34  ;;  %v1366_v29 = vld [vmem:[%s3458_s3 + $0xf0] sm:$0xff] }
 0x1a0   : > { %v1626_v38 = vsel %vm1498_vm12, %v1434_v20, %v1562_v31  ;;  %1689 = vst [vmem:[%s3458_s3 + $0x58] sm:$0xff] %v1625_v37  ;;  %vm1500_vm14 = vcmp.ge.f32.partialorder %v1436_v35, 0.0  ;;  %v1564_v49 = vmul.f32 0.2, %v1436_v35  ;;  %vm1501_vm15 = vcmp.ge.f32.partialorder %v1437_v39, 0.0  ;;  %v1367_v30 = vld [vmem:[%s3458_s3 + $0xf8] sm:$0xff] }
 0x1a1   : > { %1690 = vst [vmem:[%s3458_s3 + $0x60] sm:$0xff] %v1626_v38  ;;  %v1565_v50 = vmul.f32 0.2, %v1437_v39  ;;  %vm1502_vm0 = vcmp.ge.f32.partialorder %v1438_v40, 0.0  ;;  %v1566_v51 = vmul.f32 0.2, %v1438_v40  ;;  %v1627_v52 = vsel %vm1499_vm13, %v1435_v34, %v1563_v44 }
 0x1a2   : > { %v1628_v53 = vsel %vm1500_vm14, %v1436_v35, %v1564_v49  ;;  %v1439_v54 = vadd.f32 %v3001_v46, %v1353_v36  ;;  %v1440_v55 = vadd.f32 %v3003_v47, %v1354_v41  ;;  %1691 = vst [vmem:[%s3458_s3 + $0x68] sm:$0xff] %v1627_v52  ;;  %v1441_v59 = vadd.f32 %v3005_v48, %v1355_v42  ;;  %v1368_v31 = vld [vmem:[%s3458_s3 + $0x100] sm:$0xff]  ;;  %v1370_v49 = vld [vmem:[%s3458_s3 + $0x110] sm:$0xff] }
 0x1a3   : > { %1692 = vst [vmem:[%s3458_s3 + $0x70] sm:$0xff] %v1628_v53  ;;  %v1629_v57 = vsel %vm1501_vm15, %v1437_v39, %v1565_v50  ;;  %v1630_v58 = vsel %vm1502_vm0, %v1438_v40, %v1566_v51  ;;  %v1442_v60 = vadd.f32 %v2999_v45, %v1356_v43  ;;  %v1443_v6 = vadd.f32 %v3001_v46, %v1357_v56  ;;  %v1369_v40 = vld [vmem:[%s3458_s3 + $0x108] sm:$0xff]  ;;  %v1371_v50 = vld [vmem:[%s3458_s3 + $0x118] sm:$0xff]  ;;  %v1372_v51 = vld [vmem:[%s3458_s3 + $0x120] sm:$0xff] }
 0x1a4   : > { %1693 = vst [vmem:[%s3458_s3 + $0x78] sm:$0xff] %v1629_v57  ;;  %1694 = vst [vmem:[%s3458_s3 + $0x80] sm:$0xff] %v1630_v58  ;;  %vm1503_vm1 = vcmp.ge.f32.partialorder %v1439_v54, 0.0  ;;  %v1567_v0 = vmul.f32 0.2, %v1439_v54  ;;  %vm1504_vm2 = vcmp.ge.f32.partialorder %v1440_v55, 0.0  ;;  %v1444_v7 = vadd.f32 %v3003_v47, %v1358_v61 }
 0x1a5   : > { %v1568_v1 = vmul.f32 0.2, %v1440_v55  ;;  %vm1505_vm3 = vcmp.ge.f32.partialorder %v1441_v59, 0.0  ;;  %v1569_v2 = vmul.f32 0.2, %v1441_v59  ;;  %vm1506_vm4 = vcmp.ge.f32.partialorder %v1442_v60, 0.0 }
 0x1a6   : > { %v1570_v3 = vmul.f32 0.2, %v1442_v60  ;;  %v1631_v4 = vsel %vm1503_vm1, %v1439_v54, %v1567_v0  ;;  %v1445_v11 = vadd.f32 %v3005_v48, %v1359_v62  ;;  %v1446_v12 = vadd.f32 %v2999_v45, %v1360_v63 }
 0x1a7   : > { %v1632_v5 = vsel %vm1504_vm2, %v1440_v55, %v1568_v1  ;;  %1695 = vst [vmem:[%s3458_s3 + $0x88] sm:$0xff] %v1631_v4  ;;  %v1633_v9 = vsel %vm1505_vm3, %v1441_v59, %v1569_v2  ;;  %vm1507_vm5 = vcmp.ge.f32.partialorder %v1443_v6, 0.0  ;;  %v1571_v16 = vmul.f32 0.2, %v1443_v6  ;;  %v1374_v1 = vld [vmem:[%s3458_s3 + $0x130] sm:$0xff]  ;;  %v1375_v2 = vld [vmem:[%s3458_s3 + $0x138] sm:$0xff] }
 0x1a8   : > { %1696 = vst [vmem:[%s3458_s3 + $0x90] sm:$0xff] %v1632_v5  ;;  %v1634_v10 = vsel %vm1506_vm4, %v1442_v60, %v1570_v3  ;;  %1697 = vst [vmem:[%s3458_s3 + $0x98] sm:$0xff] %v1633_v9  ;;  %vm1508_vm6 = vcmp.ge.f32.partialorder %v1444_v7, 0.0  ;;  %v1572_v17 = vmul.f32 0.2, %v1444_v7  ;;  %vm1509_vm7 = vcmp.ge.f32.partialorder %v1445_v11, 0.0 }
 0x1a9   : > { %1698 = vst [vmem:[%s3458_s3 + $0xa0] sm:$0xff] %v1634_v10  ;;  %v1573_v18 = vmul.f32 0.2, %v1445_v11  ;;  %vm1510_vm8 = vcmp.ge.f32.partialorder %v1446_v12, 0.0  ;;  %v1574_v19 = vmul.f32 0.2, %v1446_v12  ;;  %v1635_v20 = vsel %vm1507_vm5, %v1443_v6, %v1571_v16 }
 0x1aa   : > { %v1636_v21 = vsel %vm1508_vm6, %v1444_v7, %v1572_v17  ;;  %v1447_v22 = vadd.f32 %v3001_v46, %v1361_v8  ;;  %v1448_v23 = vadd.f32 %v3003_v47, %v1362_v13  ;;  %1699 = vst [vmem:[%s3458_s3 + $0xa8] sm:$0xff] %v1635_v20  ;;  %v1449_v27 = vadd.f32 %v3005_v48, %v1363_v14  ;;  %v1373_v60 = vld [vmem:[%s3458_s3 + $0x128] sm:$0xff]  ;;  %v1376_v3 = vld [vmem:[%s3458_s3 + $0x140] sm:$0xff]  ;;  %v1378_v17 = vld [vmem:[%s3458_s3 + $0x150] sm:$0xff] }
 0x1ab   : > { %1700 = vst [vmem:[%s3458_s3 + $0xb0] sm:$0xff] %v1636_v21  ;;  %v1637_v25 = vsel %vm1509_vm7, %v1445_v11, %v1573_v18  ;;  %v1638_v26 = vsel %vm1510_vm8, %v1446_v12, %v1574_v19  ;;  %v1450_v28 = vadd.f32 %v2999_v45, %v1364_v15  ;;  %v1451_v38 = vadd.f32 %v3001_v46, %v1365_v24  ;;  %v1377_v12 = vld [vmem:[%s3458_s3 + $0x148] sm:$0xff]  ;;  %v1379_v18 = vld [vmem:[%s3458_s3 + $0x158] sm:$0xff]  ;;  %v1380_v19 = vld [vmem:[%s3458_s3 + $0x160] sm:$0xff] }
 0x1ac   : > { %1701 = vst [vmem:[%s3458_s3 + $0xb8] sm:$0xff] %v1637_v25  ;;  %1702 = vst [vmem:[%s3458_s3 + $0xc0] sm:$0xff] %v1638_v26  ;;  %vm1511_vm9 = vcmp.ge.f32.partialorder %v1447_v22, 0.0  ;;  %v1575_v32 = vmul.f32 0.2, %v1447_v22  ;;  %vm1512_vm10 = vcmp.ge.f32.partialorder %v1448_v23, 0.0  ;;  %v1452_v39 = vadd.f32 %v3003_v47, %v1366_v29 }
 0x1ad   : > { %v1576_v33 = vmul.f32 0.2, %v1448_v23  ;;  %vm1513_vm11 = vcmp.ge.f32.partialorder %v1449_v27, 0.0  ;;  %v1577_v34 = vmul.f32 0.2, %v1449_v27  ;;  %vm1514_vm12 = vcmp.ge.f32.partialorder %v1450_v28, 0.0 }
 0x1ae   : > { %v1578_v35 = vmul.f32 0.2, %v1450_v28  ;;  %v1639_v36 = vsel %vm1511_vm9, %v1447_v22, %v1575_v32  ;;  %v1453_v43 = vadd.f32 %v3005_v48, %v1367_v30  ;;  %v1454_v44 = vadd.f32 %v2999_v45, %v1368_v31 }
 0x1af   : > { %v1640_v37 = vsel %vm1512_vm10, %v1448_v23, %v1576_v33  ;;  %1703 = vst [vmem:[%s3458_s3 + $0xc8] sm:$0xff] %v1639_v36  ;;  %v1641_v41 = vsel %vm1513_vm11, %v1449_v27, %v1577_v34  ;;  %vm1515_vm13 = vcmp.ge.f32.partialorder %v1451_v38, 0.0  ;;  %v1579_v52 = vmul.f32 0.2, %v1451_v38  ;;  %v1382_v33 = vld [vmem:[%s3458_s3 + $0x170] sm:$0xff]  ;;  %v1383_v34 = vld [vmem:[%s3458_s3 + $0x178] sm:$0xff] }
 0x1b0   : > { %1704 = vst [vmem:[%s3458_s3 + $0xd0] sm:$0xff] %v1640_v37  ;;  %v1642_v42 = vsel %vm1514_vm12, %v1450_v28, %v1578_v35  ;;  %1705 = vst [vmem:[%s3458_s3 + $0xd8] sm:$0xff] %v1641_v41  ;;  %vm1516_vm14 = vcmp.ge.f32.partialorder %v1452_v39, 0.0  ;;  %v1580_v53 = vmul.f32 0.2, %v1452_v39  ;;  %vm1517_vm15 = vcmp.ge.f32.partialorder %v1453_v43, 0.0 }
 0x1b1   : > { %1706 = vst [vmem:[%s3458_s3 + $0xe0] sm:$0xff] %v1642_v42  ;;  %v1581_v54 = vmul.f32 0.2, %v1453_v43  ;;  %vm1518_vm0 = vcmp.ge.f32.partialorder %v1454_v44, 0.0  ;;  %v1582_v55 = vmul.f32 0.2, %v1454_v44  ;;  %v1643_v56 = vsel %vm1515_vm13, %v1451_v38, %v1579_v52 }
 0x1b2   : > { %v1644_v57 = vsel %vm1516_vm14, %v1452_v39, %v1580_v53  ;;  %v1455_v58 = vadd.f32 %v3001_v46, %v1369_v40  ;;  %v1456_v59 = vadd.f32 %v3003_v47, %v1370_v49  ;;  %1707 = vst [vmem:[%s3458_s3 + $0xe8] sm:$0xff] %v1643_v56  ;;  %v1457_v63 = vadd.f32 %v3005_v48, %v1371_v50  ;;  %v1381_v28 = vld [vmem:[%s3458_s3 + $0x168] sm:$0xff]  ;;  %v1384_v35 = vld [vmem:[%s3458_s3 + $0x180] sm:$0xff]  ;;  %v1386_v53 = vld [vmem:[%s3458_s3 + $0x190] sm:$0xff] }
 0x1b3   : > { %1708 = vst [vmem:[%s3458_s3 + $0xf0] sm:$0xff] %v1644_v57  ;;  %v1645_v61 = vsel %vm1517_vm15, %v1453_v43, %v1581_v54  ;;  %v1646_v62 = vsel %vm1518_vm0, %v1454_v44, %v1582_v55  ;;  %v1458_v0 = vadd.f32 %v2999_v45, %v1372_v51  ;;  %v1459_v10 = vadd.f32 %v3001_v46, %v1373_v60  ;;  %v1385_v44 = vld [vmem:[%s3458_s3 + $0x188] sm:$0xff]  ;;  %v1387_v54 = vld [vmem:[%s3458_s3 + $0x198] sm:$0xff]  ;;  %v1388_v55 = vld [vmem:[%s3458_s3 + $0x1a0] sm:$0xff] }
 0x1b4   : > { %1709 = vst [vmem:[%s3458_s3 + $0xf8] sm:$0xff] %v1645_v61  ;;  %1710 = vst [vmem:[%s3458_s3 + $0x100] sm:$0xff] %v1646_v62  ;;  %vm1519_vm1 = vcmp.ge.f32.partialorder %v1455_v58, 0.0  ;;  %v1583_v4 = vmul.f32 0.2, %v1455_v58  ;;  %vm1520_vm2 = vcmp.ge.f32.partialorder %v1456_v59, 0.0  ;;  %v1460_v11 = vadd.f32 %v3003_v47, %v1374_v1 }
 0x1b5   : > { %v1584_v5 = vmul.f32 0.2, %v1456_v59  ;;  %vm1521_vm3 = vcmp.ge.f32.partialorder %v1457_v63, 0.0  ;;  %v1585_v6 = vmul.f32 0.2, %v1457_v63  ;;  %vm1522_vm4 = vcmp.ge.f32.partialorder %v1458_v0, 0.0 }
 0x1b6   : > { %v1586_v7 = vmul.f32 0.2, %v1458_v0  ;;  %v1647_v8 = vsel %vm1519_vm1, %v1455_v58, %v1583_v4  ;;  %v1461_v15 = vadd.f32 %v3005_v48, %v1375_v2  ;;  %v1462_v16 = vadd.f32 %v2999_v45, %v1376_v3 }
 0x1b7   : > { %v1648_v9 = vsel %vm1520_vm2, %v1456_v59, %v1584_v5  ;;  %1711 = vst [vmem:[%s3458_s3 + $0x108] sm:$0xff] %v1647_v8  ;;  %v1649_v13 = vsel %vm1521_vm3, %v1457_v63, %v1585_v6  ;;  %vm1523_vm5 = vcmp.ge.f32.partialorder %v1459_v10, 0.0  ;;  %v1587_v20 = vmul.f32 0.2, %v1459_v10  ;;  %v1390_v5 = vld [vmem:[%s3458_s3 + $0x1b0] sm:$0xff]  ;;  %v1391_v6 = vld [vmem:[%s3458_s3 + $0x1b8] sm:$0xff] }
 0x1b8   : > { %1712 = vst [vmem:[%s3458_s3 + $0x110] sm:$0xff] %v1648_v9  ;;  %v1650_v14 = vsel %vm1522_vm4, %v1458_v0, %v1586_v7  ;;  %1713 = vst [vmem:[%s3458_s3 + $0x118] sm:$0xff] %v1649_v13  ;;  %vm1524_vm6 = vcmp.ge.f32.partialorder %v1460_v11, 0.0  ;;  %v1588_v21 = vmul.f32 0.2, %v1460_v11  ;;  %vm1525_vm7 = vcmp.ge.f32.partialorder %v1461_v15, 0.0 }
 0x1b9   : > { %1714 = vst [vmem:[%s3458_s3 + $0x120] sm:$0xff] %v1650_v14  ;;  %v1589_v22 = vmul.f32 0.2, %v1461_v15  ;;  %vm1526_vm8 = vcmp.ge.f32.partialorder %v1462_v16, 0.0  ;;  %v1590_v23 = vmul.f32 0.2, %v1462_v16  ;;  %v1651_v24 = vsel %vm1523_vm5, %v1459_v10, %v1587_v20 }
 0x1ba   : > { %v1652_v25 = vsel %vm1524_vm6, %v1460_v11, %v1588_v21  ;;  %v1463_v26 = vadd.f32 %v3001_v46, %v1377_v12  ;;  %v1464_v27 = vadd.f32 %v3003_v47, %v1378_v17  ;;  %1715 = vst [vmem:[%s3458_s3 + $0x128] sm:$0xff] %v1651_v24  ;;  %v1465_v31 = vadd.f32 %v3005_v48, %v1379_v18  ;;  %v1389_v0 = vld [vmem:[%s3458_s3 + $0x1a8] sm:$0xff]  ;;  %v1392_v7 = vld [vmem:[%s3458_s3 + $0x1c0] sm:$0xff]  ;;  %v1394_v21 = vld [vmem:[%s3458_s3 + $0x1d0] sm:$0xff] }
 0x1bb   : > { %1716 = vst [vmem:[%s3458_s3 + $0x130] sm:$0xff] %v1652_v25  ;;  %v1653_v29 = vsel %vm1525_vm7, %v1461_v15, %v1589_v22  ;;  %v1654_v30 = vsel %vm1526_vm8, %v1462_v16, %v1590_v23  ;;  %v1466_v32 = vadd.f32 %v2999_v45, %v1380_v19  ;;  %v1467_v42 = vadd.f32 %v3001_v46, %v1381_v28  ;;  %v1393_v16 = vld [vmem:[%s3458_s3 + $0x1c8] sm:$0xff]  ;;  %v1395_v22 = vld [vmem:[%s3458_s3 + $0x1d8] sm:$0xff]  ;;  %v1396_v23 = vld [vmem:[%s3458_s3 + $0x1e0] sm:$0xff] }
 0x1bc   : > { %1717 = vst [vmem:[%s3458_s3 + $0x138] sm:$0xff] %v1653_v29  ;;  %1718 = vst [vmem:[%s3458_s3 + $0x140] sm:$0xff] %v1654_v30  ;;  %vm1527_vm9 = vcmp.ge.f32.partialorder %v1463_v26, 0.0  ;;  %v1591_v36 = vmul.f32 0.2, %v1463_v26  ;;  %vm1528_vm10 = vcmp.ge.f32.partialorder %v1464_v27, 0.0  ;;  %v1468_v43 = vadd.f32 %v3003_v47, %v1382_v33 }
 0x1bd   : > { %v1592_v37 = vmul.f32 0.2, %v1464_v27  ;;  %vm1529_vm11 = vcmp.ge.f32.partialorder %v1465_v31, 0.0  ;;  %v1593_v38 = vmul.f32 0.2, %v1465_v31  ;;  %vm1530_vm12 = vcmp.ge.f32.partialorder %v1466_v32, 0.0 }
 0x1be   : > { %v1594_v39 = vmul.f32 0.2, %v1466_v32  ;;  %v1655_v40 = vsel %vm1527_vm9, %v1463_v26, %v1591_v36  ;;  %v1469_v51 = vadd.f32 %v3005_v48, %v1383_v34  ;;  %v1470_v52 = vadd.f32 %v2999_v45, %v1384_v35  ;;  %v1397_v36 = vld [vmem:[%s3458_s3 + $0x1e8] sm:$0xff] }
 0x1bf   : > { %v1656_v41 = vsel %vm1528_vm10, %v1464_v27, %v1592_v37  ;;  %1719 = vst [vmem:[%s3458_s3 + $0x148] sm:$0xff] %v1655_v40  ;;  %v1657_v49 = vsel %vm1529_vm11, %v1465_v31, %v1593_v38  ;;  %vm1531_vm13 = vcmp.ge.f32.partialorder %v1467_v42, 0.0  ;;  %v1595_v56 = vmul.f32 0.2, %v1467_v42  ;;  %v1398_v37 = vld [vmem:[%s3458_s3 + $0x1f0] sm:$0xff]  ;;  %v1399_v38 = vld [vmem:[%s3458_s3 + $0x1f8] sm:$0xff] }
 0x1c0   : > { %1720 = vst [vmem:[%s3458_s3 + $0x150] sm:$0xff] %v1656_v41  ;;  %v1658_v50 = vsel %vm1530_vm12, %v1466_v32, %v1594_v39  ;;  %1721 = vst [vmem:[%s3458_s3 + $0x158] sm:$0xff] %v1657_v49  ;;  %vm1532_vm14 = vcmp.ge.f32.partialorder %v1468_v43, 0.0  ;;  %v1596_v57 = vmul.f32 0.2, %v1468_v43  ;;  %vm1533_vm15 = vcmp.ge.f32.partialorder %v1469_v51, 0.0 }
 0x1c1   : > { %1722 = vst [vmem:[%s3458_s3 + $0x160] sm:$0xff] %v1658_v50  ;;  %v1597_v58 = vmul.f32 0.2, %v1469_v51  ;;  %vm1534_vm0 = vcmp.ge.f32.partialorder %v1470_v52, 0.0  ;;  %v1598_v59 = vmul.f32 0.2, %v1470_v52  ;;  %v1659_v60 = vsel %vm1531_vm13, %v1467_v42, %v1595_v56 }
 0x1c2   : > { %v1660_v61 = vsel %vm1532_vm14, %v1468_v43, %v1596_v57  ;;  %v1471_v62 = vadd.f32 %v3001_v46, %v1385_v44  ;;  %v1472_v63 = vadd.f32 %v3003_v47, %v1386_v53  ;;  %1723 = vst [vmem:[%s3458_s3 + $0x168] sm:$0xff] %v1659_v60  ;;  %v1473_v3 = vadd.f32 %v3005_v48, %v1387_v54 }
 0x1c3   : > { %1724 = vst [vmem:[%s3458_s3 + $0x170] sm:$0xff] %v1660_v61  ;;  %v1661_v1 = vsel %vm1533_vm15, %v1469_v51, %v1597_v58  ;;  %v1662_v2 = vsel %vm1534_vm0, %v1470_v52, %v1598_v59  ;;  %v1474_v4 = vadd.f32 %v2999_v45, %v1388_v55  ;;  %v1475_v14 = vadd.f32 %v3001_v46, %v1389_v0 }
 0x1c4   : > { %1725 = vst [vmem:[%s3458_s3 + $0x178] sm:$0xff] %v1661_v1  ;;  %1726 = vst [vmem:[%s3458_s3 + $0x180] sm:$0xff] %v1662_v2  ;;  %vm1535_vm1 = vcmp.ge.f32.partialorder %v1471_v62, 0.0  ;;  %v1599_v8 = vmul.f32 0.2, %v1471_v62  ;;  %vm1536_vm2 = vcmp.ge.f32.partialorder %v1472_v63, 0.0  ;;  %v1476_v15 = vadd.f32 %v3003_v47, %v1390_v5 }
 0x1c5   : > { %v1600_v9 = vmul.f32 0.2, %v1472_v63  ;;  %vm1537_vm3 = vcmp.ge.f32.partialorder %v1473_v3, 0.0  ;;  %v1601_v10 = vmul.f32 0.2, %v1473_v3  ;;  %vm1538_vm4 = vcmp.ge.f32.partialorder %v1474_v4, 0.0 }
 0x1c6   : > { %v1602_v11 = vmul.f32 0.2, %v1474_v4  ;;  %v1663_v12 = vsel %vm1535_vm1, %v1471_v62, %v1599_v8  ;;  %v1477_v19 = vadd.f32 %v3005_v48, %v1391_v6  ;;  %v1478_v20 = vadd.f32 %v2999_v45, %v1392_v7 }
 0x1c7   : > { %v1664_v13 = vsel %vm1536_vm2, %v1472_v63, %v1600_v9  ;;  %1727 = vst [vmem:[%s3458_s3 + $0x188] sm:$0xff] %v1663_v12  ;;  %v1665_v17 = vsel %vm1537_vm3, %v1473_v3, %v1601_v10  ;;  %vm1539_vm5 = vcmp.ge.f32.partialorder %v1475_v14, 0.0  ;;  %v1603_v24 = vmul.f32 0.2, %v1475_v14 }
 0x1c8   : > { %1728 = vst [vmem:[%s3458_s3 + $0x190] sm:$0xff] %v1664_v13  ;;  %v1666_v18 = vsel %vm1538_vm4, %v1474_v4, %v1602_v11  ;;  %1729 = vst [vmem:[%s3458_s3 + $0x198] sm:$0xff] %v1665_v17  ;;  %vm1540_vm6 = vcmp.ge.f32.partialorder %v1476_v15, 0.0  ;;  %v1604_v25 = vmul.f32 0.2, %v1476_v15  ;;  %vm1541_vm7 = vcmp.ge.f32.partialorder %v1477_v19, 0.0 }
 0x1c9   : > { %1730 = vst [vmem:[%s3458_s3 + $0x1a0] sm:$0xff] %v1666_v18  ;;  %v1605_v26 = vmul.f32 0.2, %v1477_v19  ;;  %vm1542_vm8 = vcmp.ge.f32.partialorder %v1478_v20, 0.0  ;;  %v1606_v27 = vmul.f32 0.2, %v1478_v20  ;;  %v1667_v28 = vsel %vm1539_vm5, %v1475_v14, %v1603_v24 }
 0x1ca   : > { %v1668_v29 = vsel %vm1540_vm6, %v1476_v15, %v1604_v25  ;;  %v1479_v30 = vadd.f32 %v3001_v46, %v1393_v16  ;;  %v1480_v31 = vadd.f32 %v3003_v47, %v1394_v21  ;;  %1731 = vst [vmem:[%s3458_s3 + $0x1a8] sm:$0xff] %v1667_v28  ;;  %v1481_v34 = vadd.f32 %v3005_v48, %v1395_v22 }
 0x1cb   : > { %1732 = vst [vmem:[%s3458_s3 + $0x1b0] sm:$0xff] %v1668_v29  ;;  %v1669_v32 = vsel %vm1541_vm7, %v1477_v19, %v1605_v26  ;;  %v1670_v33 = vsel %vm1542_vm8, %v1478_v20, %v1606_v27  ;;  %v1482_v35 = vadd.f32 %v2999_v45, %v1396_v23  ;;  %v1483_v44 = vadd.f32 %v3001_v46, %v1397_v36 }
 0x1cc   : > { %1733 = vst [vmem:[%s3458_s3 + $0x1b8] sm:$0xff] %v1669_v32  ;;  %1734 = vst [vmem:[%s3458_s3 + $0x1c0] sm:$0xff] %v1670_v33  ;;  %vm1543_vm9 = vcmp.ge.f32.partialorder %v1479_v30, 0.0  ;;  %v1607_v45 = vmul.f32 0.2, %v1479_v30  ;;  %vm1544_vm10 = vcmp.ge.f32.partialorder %v1480_v31, 0.0  ;;  %v1484_v49 = vadd.f32 %v3003_v47, %v1398_v37 }
 0x1cd   : > { %v1608_v39 = vmul.f32 0.2, %v1480_v31  ;;  %vm1545_vm11 = vcmp.ge.f32.partialorder %v1481_v34, 0.0  ;;  %v1609_v40 = vmul.f32 0.2, %v1481_v34  ;;  %vm1546_vm12 = vcmp.ge.f32.partialorder %v1482_v35, 0.0 }
 0x1ce   : > { %v1610_v41 = vmul.f32 0.2, %v1482_v35  ;;  %v1671_v42 = vsel %vm1543_vm9, %v1479_v30, %v1607_v45  ;;  %v1485_v52 = vadd.f32 %v3005_v48, %v1399_v38  ;;  %vm1547_vm13 = vcmp.ge.f32.partialorder %v1483_v44, 0.0 }
 0x1cf   : > { %v1672_v43 = vsel %vm1544_vm10, %v1480_v31, %v1608_v39  ;;  %1735 = vst [vmem:[%s3458_s3 + $0x1c8] sm:$0xff] %v1671_v42  ;;  %v1673_v50 = vsel %vm1545_vm11, %v1481_v34, %v1609_v40  ;;  %v1611_v46 = vmul.f32 0.2, %v1483_v44  ;;  %vm1548_vm14 = vcmp.ge.f32.partialorder %v1484_v49, 0.0 }
 0x1d0   : > { %1736 = vst [vmem:[%s3458_s3 + $0x1d0] sm:$0xff] %v1672_v43  ;;  %v1674_v51 = vsel %vm1546_vm12, %v1482_v35, %v1610_v41  ;;  %1737 = vst [vmem:[%s3458_s3 + $0x1d8] sm:$0xff] %v1673_v50  ;;  %v1612_v47 = vmul.f32 0.2, %v1484_v49  ;;  %vm1549_vm15 = vcmp.ge.f32.partialorder %v1485_v52, 0.0 }
 0x1d1   : > { %1738 = vst [vmem:[%s3458_s3 + $0x1e0] sm:$0xff] %v1674_v51  ;;  %v1613_v53 = vmul.f32 0.2, %v1485_v52  ;;  %v1675_v54 = vsel %vm1547_vm13, %v1483_v44, %v1611_v46 }
 0x1d2   : > { %v1676_v55 = vsel %vm1548_vm14, %v1484_v49, %v1612_v47  ;;  %1739 = vst [vmem:[%s3458_s3 + $0x1e8] sm:$0xff] %v1675_v54 }
 0x1d3   : > { %1740 = vst [vmem:[%s3458_s3 + $0x1f0] sm:$0xff] %v1676_v55  ;;  %v1677_v48 = vsel %vm1549_vm15, %v1485_v52, %v1613_v53 }
 0x1d4   : > { %1741 = vst [vmem:[%s3458_s3 + $0x1f8] sm:$0xff] %v1677_v48 }
 0x1d5 PF: > { %s13_s16 = sadd.s32 1, %s2164_s16   ;;  %s3459_s12 = smov %s2152_s13 }
 0x1d6   : > { %p10_p12 = scmp.ge.s32.totalorder %s13_s16, 17   ;;  %s3460_s13 = smov %s2222_s20 }
 0x1d7   : > { %s3461_s14 = smov %s2160_s15  ;;  %s3462_s15 = smov %s3464_s17 }
 0x1d8   :  { %12 = sbr.rel (!%p10_p12) target bundleno = 3 (0x3), region = 119 }

// kernel: progressive_discriminator.10
= control target key start
LH: loop header
LB: loop body
LE: loop exit
PB: predicated region body
PF: predicated region fallthrough
CT: control target
= control target key end

     0   :  { %v608_v1 = vmov 0   ;;  %v418_v35 = vlaneseq  ;;  %s810_s1 = inlined_call_operand.vmem [shape: bf16[128,512], index: 1, kind: input, shape index: {}]   ;;  %s811_s0 = inlined_call_operand.vmem [shape: bf16[32,128], index: 0, kind: input, shape index: {}]   ;;  %s812_s2 = inlined_call_operand.vmem [shape: f32[1,512], index: 2, kind: input, shape index: {}]   ;;  %s813_s3 = inlined_call_operand.vmem [shape: f32[32,512], index: 3, kind: output, shape index: {}]  }
   0x1   :  { %v558_v0 = vld [vmem:[%s810_s1 + $0x4] ss:$16 sps:$4 sm:$0xff]   ;;  %291 = vmatprep.mubr.bf16.mxu0 %v608_v1  ;;  %344 = vmatprep.mubr.bf16.mxu1 %v608_v1  ;;  %v560_v2 = vld [vmem:[%s810_s1 + $0xc] ss:$16 sps:$4 sm:$0xff]   ;;  %v562_v3 = vld [vmem:[%s810_s1] ss:$16 sps:$4 sm:$0xff]  }
   0x2   :  { %259 = vmatprep.subr.bf16.mxu0 %v558_v0  ;;  %v563_v4 = vld [vmem:[%s810_s1 + $0x8] ss:$16 sps:$4 sm:$0xff]   ;;  %312 = vmatprep.subr.bf16.mxu1 %v560_v2  ;;  %v564_v5 = vld [vmem:[%s810_s1 + $0x24] ss:$16 sps:$4 sm:$0xff]   ;;  %v566_v6 = vld [vmem:[%s810_s1 + $0x2c] ss:$16 sps:$4 sm:$0xff]  }
   0x3   :  { %260 = vmatpush1.bf16.msra.mxu0 %v562_v3  ;;  %313 = vmatpush1.bf16.msra.mxu1 %v563_v4  ;;  %v568_v7 = vld [vmem:[%s810_s1 + $0x20] ss:$16 sps:$4 sm:$0xff]   ;;  %v569_v8 = vld [vmem:[%s810_s1 + $0x28] ss:$16 sps:$4 sm:$0xff]   ;;  %v570_v9 = vld [vmem:[%s810_s1 + $0x44] ss:$16 sps:$4 sm:$0xff]  }
   0x4   :  { %261 = vmatprep.subr.bf16.mxu0 %v564_v5  ;;  %314 = vmatprep.subr.bf16.mxu1 %v566_v6  ;;  %v572_v10 = vld [vmem:[%s810_s1 + $0x4c] ss:$16 sps:$4 sm:$0xff]   ;;  %v574_v11 = vld [vmem:[%s810_s1 + $0x40] ss:$16 sps:$4 sm:$0xff]   ;;  %v575_v12 = vld [vmem:[%s810_s1 + $0x48] ss:$16 sps:$4 sm:$0xff]  }
   0x5   :  { %v576_v13 = vld [vmem:[%s810_s1 + $0x64] ss:$16 sps:$4 sm:$0xff]   ;;  %v578_v14 = vld [vmem:[%s810_s1 + $0x6c] ss:$16 sps:$4 sm:$0xff]   ;;  %v580_v15 = vld [vmem:[%s810_s1 + $0x60] ss:$16 sps:$4 sm:$0xff]  }
   0x6   :  { %v581_v16 = vld [vmem:[%s810_s1 + $0x68] ss:$16 sps:$4 sm:$0xff]   ;;  %v582_v17 = vld [vmem:[%s810_s1 + $0x84] ss:$16 sps:$4 sm:$0xff]   ;;  %v584_v18 = vld [vmem:[%s810_s1 + $0x8c] ss:$16 sps:$4 sm:$0xff]  }
   0x7   :  { %262 = vmatpush1.bf16.msra.mxu0 %v568_v7  ;;  %315 = vmatpush1.bf16.msra.mxu1 %v569_v8  ;;  %v586_v19 = vld [vmem:[%s810_s1 + $0x80] ss:$16 sps:$4 sm:$0xff]   ;;  %v587_v20 = vld [vmem:[%s810_s1 + $0x88] ss:$16 sps:$4 sm:$0xff]   ;;  %v588_v21 = vld [vmem:[%s810_s1 + $0xa4] ss:$16 sps:$4 sm:$0xff]  }
   0x8   :  { %263 = vmatprep.subr.bf16.mxu0 %v570_v9  ;;  %316 = vmatprep.subr.bf16.mxu1 %v572_v10  ;;  %v590_v22 = vld [vmem:[%s810_s1 + $0xac] ss:$16 sps:$4 sm:$0xff]   ;;  %v592_v23 = vld [vmem:[%s810_s1 + $0xa0] ss:$16 sps:$4 sm:$0xff]   ;;  %v593_v24 = vld [vmem:[%s810_s1 + $0xa8] ss:$16 sps:$4 sm:$0xff]  }
   0x9   :  { %v594_v25 = vld [vmem:[%s810_s1 + $0xc4] ss:$16 sps:$4 sm:$0xff]   ;;  %v596_v26 = vld [vmem:[%s810_s1 + $0xcc] ss:$16 sps:$4 sm:$0xff]   ;;  %v598_v27 = vld [vmem:[%s810_s1 + $0xc0] ss:$16 sps:$4 sm:$0xff]  }
   0xa   :  { %v599_v28 = vld [vmem:[%s810_s1 + $0xc8] ss:$16 sps:$4 sm:$0xff]   ;;  %v600_v29 = vld [vmem:[%s810_s1 + $0xe4] ss:$16 sps:$4 sm:$0xff]   ;;  %v602_v30 = vld [vmem:[%s810_s1 + $0xec] ss:$16 sps:$4 sm:$0xff]  }
   0xb   :  { %264 = vmatpush1.bf16.msra.mxu0 %v574_v11  ;;  %317 = vmatpush1.bf16.msra.mxu1 %v575_v12  ;;  %v604_v31 = vld [vmem:[%s810_s1 + $0xe0] ss:$16 sps:$4 sm:$0xff]   ;;  %v605_v32 = vld [vmem:[%s810_s1 + $0xe8] ss:$16 sps:$4 sm:$0xff]   ;;  %v419_v36 = vshrl.u32 %v418_v35, 7 }
   0xc   :  { %265 = vmatprep.subr.bf16.mxu0 %v576_v13  ;;  %318 = vmatprep.subr.bf16.mxu1 %v578_v14  ;;  %v606_v33 = vld [vmem:[%s811_s0] sm:$0xff]   ;;  %v607_v34 = vld [vmem:[%s811_s0 + $0x8] sm:$0xff]  }
   0xd   :  { %v420_v37 = vsub.s32 0, %v419_v36  ;;  %v428_v38 = vsub.s32 2, %v419_v36  ;;  %v416_v39 = vld [vmem:[%s812_s2] sm:$0xf]  ;;  %v424_v40 = vsub.s32 1, %v419_v36  ;;  %v432_v41 = vsub.s32 3, %v419_v36 }
   0xf   :  { %266 = vmatpush1.bf16.msra.mxu0 %v580_v15  ;;  %319 = vmatpush1.bf16.msra.mxu1 %v581_v16  ;;  %v738_v42 = vrot.slane %v416_v39, %v420_v37  ;;  %v740_v43 = vrot.slane %v416_v39, %v428_v38  ;;  %v742_v46 = vrot.slane %v416_v39, %v424_v40 }
  0x10   :  { %267 = vmatprep.subr.bf16.mxu0 %v582_v17  ;;  %320 = vmatprep.subr.bf16.mxu1 %v584_v18  ;;  %v744_v47 = vrot.slane %v416_v39, %v432_v41 }
  0x13   :  { %268 = vmatpush1.bf16.msra.mxu0 %v586_v19  ;;  %321 = vmatpush1.bf16.msra.mxu1 %v587_v20 }
  0x14   :  { %269 = vmatprep.subr.bf16.mxu0 %v588_v21  ;;  %322 = vmatprep.subr.bf16.mxu1 %v590_v22 }
  0x17   :  { %270 = vmatpush1.bf16.msra.mxu0 %v592_v23  ;;  %323 = vmatpush1.bf16.msra.mxu1 %v593_v24 }
  0x18   :  { %271 = vmatprep.subr.bf16.mxu0 %v594_v25  ;;  %324 = vmatprep.subr.bf16.mxu1 %v596_v26 }
  0x1b   :  { %272 = vmatpush1.bf16.msra.mxu0 %v598_v27  ;;  %325 = vmatpush1.bf16.msra.mxu1 %v599_v28 }
  0x1c   :  { %273 = vmatprep.subr.bf16.mxu0 %v600_v29  ;;  %326 = vmatprep.subr.bf16.mxu1 %v602_v30 }
  0x1f   :  { %274 = vmatpush1.bf16.msra.mxu0 %v604_v31  ;;  %327 = vmatpush1.bf16.msra.mxu1 %v605_v32 }
  0x22   :  { %292 = vmatmul.mubr.bf16.vlgmr.msra.gmra.mrb[0].mxu0 %v606_v33  ;;  %345 = vmatmul.mubr.bf16.vlgmr.msra.gmra.mrb[0].mxu1 %v606_v33 }
  0x23   :  { %301 = vmatprep.mubr.bf16.mxu0 %v608_v1  ;;  %354 = vmatprep.mubr.bf16.mxu1 %v608_v1 }
  0x2a   :  { %302 = vmatmul.mubr.bf16.gmra.mrb[4].mxu0 %v607_v34  ;;  %355 = vmatmul.mubr.bf16.gmra.mrb[4].mxu1 %v607_v34 }
  0xf5   :  { %v293_v44 = vpop.f32.mrb[0].mxu0  ;;  %v346_v45 = vpop.f32.mrb[0].mxu1 }
  0xf6   :  { %v295_v48 = vpop.f32.mrb[1].mxu0  ;;  %v348_v49 = vpop.f32.mrb[1].mxu1  ;;  %v438_v52 = vadd.f32 %v738_v42, %v293_v44  ;;  %v440_v53 = vadd.f32 %v740_v43, %v346_v45 }
  0xf7   :  { %v297_v50 = vpop.f32.mrb[2].mxu0  ;;  %v350_v51 = vpop.f32.mrb[2].mxu1  ;;  %v439_v56 = vadd.f32 %v742_v46, %v295_v48  ;;  %v441_v57 = vadd.f32 %v744_v47, %v348_v49 }
  0xf8   :  { %v299_v54 = vpop.f32.mrb[3].mxu0  ;;  %v352_v55 = vpop.f32.mrb[3].mxu1  ;;  %vm454_vm0 = vcmp.ge.f32.partialorder %v438_v52, 0.0  ;;  %v470_v58 = vmul.f32 0.2, %v438_v52  ;;  %vm456_vm1 = vcmp.ge.f32.partialorder %v440_v53, 0.0  ;;  %v442_v0 = vadd.f32 %v738_v42, %v297_v50 }
  0xf9   :  { %v472_v59 = vmul.f32 0.2, %v440_v53  ;;  %vm455_vm2 = vcmp.ge.f32.partialorder %v439_v56, 0.0  ;;  %v471_v60 = vmul.f32 0.2, %v439_v56  ;;  %vm457_vm3 = vcmp.ge.f32.partialorder %v441_v57, 0.0 }
  0xfa   :  { %v473_v61 = vmul.f32 0.2, %v441_v57  ;;  %v486_v62 = vsel %vm454_vm0, %v438_v52, %v470_v58  ;;  %v444_v1 = vadd.f32 %v740_v43, %v350_v51  ;;  %v443_v4 = vadd.f32 %v742_v46, %v299_v54 }
  0xfb   :  { %v488_v63 = vsel %vm456_vm1, %v440_v53, %v472_v59  ;;  %502 = vst [vmem:[%s813_s3] sm:$0xff] %v486_v62  ;;  %v487_v2 = vsel %vm455_vm2, %v439_v56, %v471_v60  ;;  %v445_v5 = vadd.f32 %v744_v47, %v352_v55  ;;  %vm458_vm4 = vcmp.ge.f32.partialorder %v442_v0, 0.0 }
  0xfc   :  { %504 = vst [vmem:[%s813_s3 + $0x10] sm:$0xff] %v488_v63  ;;  %v489_v3 = vsel %vm457_vm3, %v441_v57, %v473_v61  ;;  %503 = vst [vmem:[%s813_s3 + $0x8] sm:$0xff] %v487_v2  ;;  %v474_v8 = vmul.f32 0.2, %v442_v0  ;;  %vm460_vm5 = vcmp.ge.f32.partialorder %v444_v1, 0.0  ;;  %vm459_vm6 = vcmp.ge.f32.partialorder %v443_v4, 0.0 }
  0xfd   :  { %v303_v6 = vpop.f32.mrb[4].mxu0  ;;  %v356_v7 = vpop.f32.mrb[4].mxu1  ;;  %505 = vst [vmem:[%s813_s3 + $0x18] sm:$0xff] %v489_v3  ;;  %v476_v9 = vmul.f32 0.2, %v444_v1  ;;  %vm461_vm7 = vcmp.ge.f32.partialorder %v445_v5, 0.0 }
  0xfe   :  { %v475_v10 = vmul.f32 0.2, %v443_v4  ;;  %v477_v11 = vmul.f32 0.2, %v445_v5  ;;  %v490_v12 = vsel %vm458_vm4, %v442_v0, %v474_v8  ;;  %v305_v14 = vpop.f32.mrb[5].mxu0  ;;  %v358_v15 = vpop.f32.mrb[5].mxu1  ;;  %v446_v20 = vadd.f32 %v738_v42, %v303_v6 }
  0xff   :  { %v492_v13 = vsel %vm460_vm5, %v444_v1, %v476_v9  ;;  %506 = vst [vmem:[%s813_s3 + $0x20] sm:$0xff] %v490_v12  ;;  %v307_v18 = vpop.f32.mrb[6].mxu0  ;;  %v360_v19 = vpop.f32.mrb[6].mxu1  ;;  %v448_v21 = vadd.f32 %v740_v43, %v356_v7  ;;  %v447_v24 = vadd.f32 %v742_v46, %v305_v14  ;;  %v449_v25 = vadd.f32 %v744_v47, %v358_v15 }
 0x100   :  { %508 = vst [vmem:[%s813_s3 + $0x30] sm:$0xff] %v492_v13  ;;  %v491_v16 = vsel %vm459_vm6, %v443_v4, %v475_v10  ;;  %v493_v17 = vsel %vm461_vm7, %v445_v5, %v477_v11  ;;  %v309_v22 = vpop.f32.mrb[7].mxu0  ;;  %v362_v23 = vpop.f32.mrb[7].mxu1  ;;  %vm462_vm8 = vcmp.ge.f32.partialorder %v446_v20, 0.0  ;;  %v478_v26 = vmul.f32 0.2, %v446_v20 }
 0x101   :  { %507 = vst [vmem:[%s813_s3 + $0x28] sm:$0xff] %v491_v16  ;;  %509 = vst [vmem:[%s813_s3 + $0x38] sm:$0xff] %v493_v17  ;;  %vm464_vm9 = vcmp.ge.f32.partialorder %v448_v21, 0.0  ;;  %v480_v27 = vmul.f32 0.2, %v448_v21  ;;  %vm463_vm10 = vcmp.ge.f32.partialorder %v447_v24, 0.0  ;;  %v450_v32 = vadd.f32 %v738_v42, %v307_v18 }
 0x102   :  { %v479_v28 = vmul.f32 0.2, %v447_v24  ;;  %vm465_vm11 = vcmp.ge.f32.partialorder %v449_v25, 0.0  ;;  %v481_v29 = vmul.f32 0.2, %v449_v25  ;;  %v494_v30 = vsel %vm462_vm8, %v446_v20, %v478_v26 }
 0x103   :  { %v496_v31 = vsel %vm464_vm9, %v448_v21, %v480_v27  ;;  %v452_v33 = vadd.f32 %v740_v43, %v360_v19  ;;  %510 = vst [vmem:[%s813_s3 + $0x40] sm:$0xff] %v494_v30  ;;  %v451_v36 = vadd.f32 %v742_v46, %v309_v22  ;;  %v453_v37 = vadd.f32 %v744_v47, %v362_v23 }
 0x104   :  { %512 = vst [vmem:[%s813_s3 + $0x50] sm:$0xff] %v496_v31  ;;  %v495_v34 = vsel %vm463_vm10, %v447_v24, %v479_v28  ;;  %v497_v35 = vsel %vm465_vm11, %v449_v25, %v481_v29  ;;  %vm466_vm12 = vcmp.ge.f32.partialorder %v450_v32, 0.0  ;;  %v482_v38 = vmul.f32 0.2, %v450_v32 }
 0x105   :  { %511 = vst [vmem:[%s813_s3 + $0x48] sm:$0xff] %v495_v34  ;;  %513 = vst [vmem:[%s813_s3 + $0x58] sm:$0xff] %v497_v35  ;;  %vm468_vm13 = vcmp.ge.f32.partialorder %v452_v33, 0.0  ;;  %v484_v39 = vmul.f32 0.2, %v452_v33  ;;  %vm467_vm14 = vcmp.ge.f32.partialorder %v451_v36, 0.0 }
 0x106   :  { %v483_v40 = vmul.f32 0.2, %v451_v36  ;;  %vm469_vm15 = vcmp.ge.f32.partialorder %v453_v37, 0.0  ;;  %v485_v41 = vmul.f32 0.2, %v453_v37  ;;  %v498_v42 = vsel %vm466_vm12, %v450_v32, %v482_v38 }
 0x107   :  { %v500_v43 = vsel %vm468_vm13, %v452_v33, %v484_v39  ;;  %514 = vst [vmem:[%s813_s3 + $0x60] sm:$0xff] %v498_v42 }
 0x108   :  { %516 = vst [vmem:[%s813_s3 + $0x70] sm:$0xff] %v500_v43  ;;  %v499_v44 = vsel %vm467_vm14, %v451_v36, %v483_v40  ;;  %v501_v45 = vsel %vm469_vm15, %v453_v37, %v485_v41 }
 0x109   :  { %515 = vst [vmem:[%s813_s3 + $0x68] sm:$0xff] %v499_v44  ;;  %517 = vst [vmem:[%s813_s3 + $0x78] sm:$0xff] %v501_v45 }

// kernel: progressive_discriminator.11
= control target key start
LH: loop header
LB: loop body
LE: loop exit
PB: predicated region body
PF: predicated region fallthrough
CT: control target
= control target key end

     0   :  { %s1437_s12 = smov 0   ;;  %s1439_s13 = smov 0   ;;  %s1837_s0 = inlined_call_operand.vmem [shape: bf16[32,3840], index: 0, kind: input, shape index: {}]   ;;  %s1838_s1 = inlined_call_operand.vmem [shape: bf16[3840,512], index: 1, kind: input, shape index: {}]   ;;  %s1839_s2 = inlined_call_operand.vmem [shape: f32[1,512], index: 2, kind: input, shape index: {}]   ;;  %s1840_s3 = inlined_call_operand.vmem [shape: f32[32,512], index: 3, kind: output, shape index: {}]  }
   0x1   :  { %s1441_s14 = smov 0   ;;  %s1443_s15 = smov 0  }
   0x2   :  { %s1445_s16 = smov 0  }
   0x3 LB: > { %s25_s17 = sadd.s32 1, %s1410_s15  ;;  %p48_p1 = scmp.ne.s32.totalorder %s1402_s13, %s1398_s12  ;;  %s1414_s16 = sphi %s1445_s16, %s13_s16   ;;  %s1410_s15 = sphi %s1443_s15, %s1844_s15   ;;  %s1406_s14 = sphi %s1441_s14, %s1843_s14   ;;  %s1402_s13 = sphi %s1439_s13, %s1842_s13   ;;  %s1398_s12 = sphi %s1437_s12, %s1841_s12  }
   0x4   : > { %p26_p0 = scmp.ge.s32.totalorder %s25_s17, 15  ;;  %p49_p2 = scmp.eq.s32.totalorder %s1414_s16, 0 }
   0x5   : > { %s41_s19 = sadd.s32 1, %s1402_s13  ;;  %p1148_p5 = scmp.ge.s32.totalorder %s1414_s16, 15 }
   0x6   : > { %s1846_s17 = smov (%p26_p0, %s25_s17), 0  ;;  %p50_p3 = por %p49_p2, %p48_p1 }
   0x7   : > { %s37_s18 = ssub.s32 %s1410_s15, %s1846_s17  ;;  %164 = sbr.rel (%p1148_p5) target bundleno = 21 (0x15), region = 20 }
   0x8   : > { %p39_p4 = scmp.eq.s32.totalorder %s37_s18, 0 }
   0xa   : > { %s1472_s20 = scalar_select %p39_p4, %s1402_s13, %s41_s19  }
   0xe   : > { %167 = sbr.rel (!%p50_p3) target bundleno = 21 (0x15), region = 24  ;;  %s169_s21 = sand.u32 (%p50_p3), 1, %s1402_s13  }
   0xf   : > { %s1231_s22 = sshll.u32 (%p50_p3), %s1410_s15, 3  ;;  %s1149_s23 = sshll.u32 (%p50_p3), %s169_s21, 5 }
  0x10   : > { %s177_s26 = scalar_lea.vmem (%p50_p3), %s1837_s0, %s1231_s22  ;;  %s171_s27 = scalar_lea.vmem (%p50_p3), [#allocation2], %s1149_s23 }
  0x11   : > { %v211_v0 = vld [vmem:[%s177_s26] sm:$0xff] (%p50_p3)  ;;  %v213_v1 = vld [vmem:[%s177_s26 + $0x78] sm:$0xff] (%p50_p3)  ;;  %v215_v2 = vld [vmem:[%s177_s26 + $0xf0] sm:$0xff] (%p50_p3) }
  0x12   : > { %212 = vst [vmem:[%s171_s27] sm:$0xff] (%p50_p3), %v211_v0  ;;  %214 = vst [vmem:[%s171_s27 + $0x8] sm:$0xff] (%p50_p3), %v213_v1  ;;  %v217_v3 = vld [vmem:[%s177_s26 + $0x168] sm:$0xff] (%p50_p3) }
  0x13   : > { %216 = vst [vmem:[%s171_s27 + $0x10] sm:$0xff] (%p50_p3), %v215_v2  ;;  %218 = vst [vmem:[%s171_s27 + $0x18] sm:$0xff] (%p50_p3), %v217_v3 }
  0x15 PF: > { %p1152_p6 = scmp.ge.s32.totalorder %s1414_s16, 1  ;;  %p238_p7 = scmp.lt.s32.totalorder %s1414_s16, 16 }
  0x17   : > { %p239_p8 = pnand %p1152_p6, %p238_p7 }
  0x18   : > { %s245_s28 = sand.u32 (!%p239_p8), 1, %s1398_s12   ;;  %s1154_s29 = sshll.u32 (!%p239_p8), %s1406_s14, 5 }
  0x19   : > { %242 = sbr.rel (%p239_p8) target bundleno = 350 (0x15e), region = 66  ;;  %s1153_s30 = sshll.u32 (!%p239_p8), %s245_s28, 5 }
  0x1a   : > { %p291_p9 = scmp.lt.s32.totalorder (!%p239_p8), %s1154_s29, 479  ;;  %s1489_s8 = scalar_lea.vmem (!%p239_p8), [#allocation2], %s1153_s30 }
  0x1b   : > { %p1157_p10 = scmp.ne.s32.totalorder (!%p239_p8), %s1406_s14, 0 }
  0x20   : > { %s1848_s29 = smov (!%p291_p9, %s1154_s29), 479  ;;  %321 = sbr.rel (%p1157_p10) target bundleno = 42 (0x2a), region = 74 }
  0x21   : > { %s1232_s4 = sshll.u32 %s1848_s29, 4  ;;  %v1416_v4 = vmov (!%p1157_p10), 0.0  }
  0x22   : > { %s1487_s7 = scalar_lea.vmem %s1838_s1, %s1232_s4  ;;  %322 = vst [vmem:[%s1840_s3] sm:$0xff] (!%p1157_p10), %v1416_v4  ;;  %323 = vst [vmem:[%s1840_s3 + $0x8] sm:$0xff] (!%p1157_p10), %v1416_v4 }
  0x23   : > { %324 = vst [vmem:[%s1840_s3 + $0x10] sm:$0xff] (!%p1157_p10), %v1416_v4  ;;  %325 = vst [vmem:[%s1840_s3 + $0x18] sm:$0xff] (!%p1157_p10), %v1416_v4 }
  0x24   : > { %326 = vst [vmem:[%s1840_s3 + $0x20] sm:$0xff] (!%p1157_p10), %v1416_v4  ;;  %327 = vst [vmem:[%s1840_s3 + $0x28] sm:$0xff] (!%p1157_p10), %v1416_v4 }
  0x25   : > { %328 = vst [vmem:[%s1840_s3 + $0x30] sm:$0xff] (!%p1157_p10), %v1416_v4  ;;  %329 = vst [vmem:[%s1840_s3 + $0x38] sm:$0xff] (!%p1157_p10), %v1416_v4 }
  0x26   : > { %330 = vst [vmem:[%s1840_s3 + $0x40] sm:$0xff] (!%p1157_p10), %v1416_v4  ;;  %331 = vst [vmem:[%s1840_s3 + $0x48] sm:$0xff] (!%p1157_p10), %v1416_v4 }
  0x27   : > { %332 = vst [vmem:[%s1840_s3 + $0x50] sm:$0xff] %v1416_v4  ;;  %333 = vst [vmem:[%s1840_s3 + $0x58] sm:$0xff] %v1416_v4 }
  0x28   : > { %334 = vst [vmem:[%s1840_s3 + $0x60] sm:$0xff] %v1416_v4  ;;  %335 = vst [vmem:[%s1840_s3 + $0x68] sm:$0xff] %v1416_v4 }
  0x29   : > { %336 = vst [vmem:[%s1840_s3 + $0x70] sm:$0xff] %v1416_v4  ;;  %337 = vst [vmem:[%s1840_s3 + $0x78] sm:$0xff] %v1416_v4 }
  0x2a PF: > { %v1274_v5 = vld [vmem:[%s1487_s7 + $0x4] ss:$16 sps:$4 sm:$0xff]   ;;  %v1276_v6 = vld [vmem:[%s1487_s7 + $0xc] ss:$16 sps:$4 sm:$0xff]   ;;  %v1278_v7 = vld [vmem:[%s1487_s7] ss:$16 sps:$4 sm:$0xff]  }
  0x2b   : > { %762 = vmatprep.subr.bf16.mxu0 %v1274_v5  ;;  %v1279_v8 = vld [vmem:[%s1487_s7 + $0x8] ss:$16 sps:$4 sm:$0xff]   ;;  %815 = vmatprep.subr.bf16.mxu1 %v1276_v6  ;;  %v1280_v9 = vld [vmem:[%s1487_s7 + $0x24] ss:$16 sps:$4 sm:$0xff]   ;;  %v1282_v10 = vld [vmem:[%s1487_s7 + $0x2c] ss:$16 sps:$4 sm:$0xff]  }
  0x2c   : > { %763 = vmatpush1.bf16.msra.mxu0 %v1278_v7  ;;  %816 = vmatpush1.bf16.msra.mxu1 %v1279_v8  ;;  %v1284_v11 = vld [vmem:[%s1487_s7 + $0x20] ss:$16 sps:$4 sm:$0xff]   ;;  %v1285_v12 = vld [vmem:[%s1487_s7 + $0x28] ss:$16 sps:$4 sm:$0xff]   ;;  %v1286_v13 = vld [vmem:[%s1487_s7 + $0x44] ss:$16 sps:$4 sm:$0xff]  }
  0x2d   : > { %764 = vmatprep.subr.bf16.mxu0 %v1280_v9  ;;  %817 = vmatprep.subr.bf16.mxu1 %v1282_v10  ;;  %v1288_v14 = vld [vmem:[%s1487_s7 + $0x4c] ss:$16 sps:$4 sm:$0xff]   ;;  %v1290_v15 = vld [vmem:[%s1487_s7 + $0x40] ss:$16 sps:$4 sm:$0xff]   ;;  %v1291_v16 = vld [vmem:[%s1487_s7 + $0x48] ss:$16 sps:$4 sm:$0xff]  }
  0x2e   : > { %v1292_v17 = vld [vmem:[%s1487_s7 + $0x64] ss:$16 sps:$4 sm:$0xff]   ;;  %v1294_v18 = vld [vmem:[%s1487_s7 + $0x6c] ss:$16 sps:$4 sm:$0xff]   ;;  %v1296_v19 = vld [vmem:[%s1487_s7 + $0x60] ss:$16 sps:$4 sm:$0xff]  }
  0x2f   : > { %v1297_v20 = vld [vmem:[%s1487_s7 + $0x68] ss:$16 sps:$4 sm:$0xff]   ;;  %v1298_v21 = vld [vmem:[%s1487_s7 + $0x84] ss:$16 sps:$4 sm:$0xff]   ;;  %v1300_v22 = vld [vmem:[%s1487_s7 + $0x8c] ss:$16 sps:$4 sm:$0xff]  }
  0x30   : > { %765 = vmatpush1.bf16.msra.mxu0 %v1284_v11  ;;  %818 = vmatpush1.bf16.msra.mxu1 %v1285_v12  ;;  %v1302_v23 = vld [vmem:[%s1487_s7 + $0x80] ss:$16 sps:$4 sm:$0xff]   ;;  %v1303_v24 = vld [vmem:[%s1487_s7 + $0x88] ss:$16 sps:$4 sm:$0xff]   ;;  %v1304_v25 = vld [vmem:[%s1487_s7 + $0xa4] ss:$16 sps:$4 sm:$0xff]  }
  0x31   : > { %766 = vmatprep.subr.bf16.mxu0 %v1286_v13  ;;  %819 = vmatprep.subr.bf16.mxu1 %v1288_v14  ;;  %v1306_v26 = vld [vmem:[%s1487_s7 + $0xac] ss:$16 sps:$4 sm:$0xff]   ;;  %v1308_v27 = vld [vmem:[%s1487_s7 + $0xa0] ss:$16 sps:$4 sm:$0xff]   ;;  %v1309_v28 = vld [vmem:[%s1487_s7 + $0xa8] ss:$16 sps:$4 sm:$0xff]  }
  0x32   : > { %v1310_v29 = vld [vmem:[%s1487_s7 + $0xc4] ss:$16 sps:$4 sm:$0xff]   ;;  %v1312_v30 = vld [vmem:[%s1487_s7 + $0xcc] ss:$16 sps:$4 sm:$0xff]   ;;  %v1314_v31 = vld [vmem:[%s1487_s7 + $0xc0] ss:$16 sps:$4 sm:$0xff]  }
  0x33   : > { %v1315_v32 = vld [vmem:[%s1487_s7 + $0xc8] ss:$16 sps:$4 sm:$0xff]   ;;  %v1316_v33 = vld [vmem:[%s1487_s7 + $0xe4] ss:$16 sps:$4 sm:$0xff]   ;;  %v1318_v34 = vld [vmem:[%s1487_s7 + $0xec] ss:$16 sps:$4 sm:$0xff]  }
  0x34   : > { %767 = vmatpush1.bf16.msra.mxu0 %v1290_v15  ;;  %820 = vmatpush1.bf16.msra.mxu1 %v1291_v16  ;;  %v1320_v35 = vld [vmem:[%s1487_s7 + $0xe0] ss:$16 sps:$4 sm:$0xff]   ;;  %v1321_v36 = vld [vmem:[%s1487_s7 + $0xe8] ss:$16 sps:$4 sm:$0xff]   ;;  %v1322_v37 = vld [vmem:[%s1487_s7 + $0x104] ss:$16 sps:$4 sm:$0xff]  }
  0x35   : > { %768 = vmatprep.subr.bf16.mxu0 %v1292_v17  ;;  %821 = vmatprep.subr.bf16.mxu1 %v1294_v18  ;;  %v1324_v38 = vld [vmem:[%s1487_s7 + $0x10c] ss:$16 sps:$4 sm:$0xff]   ;;  %v1326_v39 = vld [vmem:[%s1487_s7 + $0x100] ss:$16 sps:$4 sm:$0xff]   ;;  %v1327_v40 = vld [vmem:[%s1487_s7 + $0x108] ss:$16 sps:$4 sm:$0xff]  }
  0x36   : > { %v1328_v41 = vld [vmem:[%s1487_s7 + $0x124] ss:$16 sps:$4 sm:$0xff]   ;;  %v1330_v42 = vld [vmem:[%s1487_s7 + $0x12c] ss:$16 sps:$4 sm:$0xff]   ;;  %v1332_v43 = vld [vmem:[%s1487_s7 + $0x120] ss:$16 sps:$4 sm:$0xff]  }
  0x37   : > { %v1333_v44 = vld [vmem:[%s1487_s7 + $0x128] ss:$16 sps:$4 sm:$0xff]   ;;  %v1334_v45 = vld [vmem:[%s1487_s7 + $0x144] ss:$16 sps:$4 sm:$0xff]   ;;  %v1336_v46 = vld [vmem:[%s1487_s7 + $0x14c] ss:$16 sps:$4 sm:$0xff]  }
  0x38   : > { %769 = vmatpush1.bf16.msra.mxu0 %v1296_v19  ;;  %822 = vmatpush1.bf16.msra.mxu1 %v1297_v20  ;;  %v1338_v47 = vld [vmem:[%s1487_s7 + $0x140] ss:$16 sps:$4 sm:$0xff]   ;;  %v1339_v48 = vld [vmem:[%s1487_s7 + $0x148] ss:$16 sps:$4 sm:$0xff]   ;;  %v1340_v49 = vld [vmem:[%s1487_s7 + $0x164] ss:$16 sps:$4 sm:$0xff]  }
  0x39   : > { %770 = vmatprep.subr.bf16.mxu0 %v1298_v21  ;;  %823 = vmatprep.subr.bf16.mxu1 %v1300_v22  ;;  %v1342_v50 = vld [vmem:[%s1487_s7 + $0x16c] ss:$16 sps:$4 sm:$0xff]   ;;  %v1344_v51 = vld [vmem:[%s1487_s7 + $0x160] ss:$16 sps:$4 sm:$0xff]   ;;  %v1345_v53 = vld [vmem:[%s1487_s7 + $0x168] ss:$16 sps:$4 sm:$0xff]  }
  0x3a   : > { %v1372_v52 = vld [vmem:[%s1489_s8 + $0x4] ss:$8 sps:$4 sm:$0xff]   ;;  %v1350_v56 = vld [vmem:[%s1487_s7 + $0x180] ss:$16 sps:$4 sm:$0xff]   ;;  %v1351_v57 = vld [vmem:[%s1487_s7 + $0x188] ss:$16 sps:$4 sm:$0xff]  }
  0x3b   : > { %v1346_v54 = vld [vmem:[%s1487_s7 + $0x184] ss:$16 sps:$4 sm:$0xff]   ;;  %v1348_v55 = vld [vmem:[%s1487_s7 + $0x18c] ss:$16 sps:$4 sm:$0xff]   ;;  %794 = vmatprep.mubr.bf16.mxu0 %v1372_v52  ;;  %847 = vmatprep.mubr.bf16.mxu1 %v1372_v52  ;;  %v1356_v60 = vld [vmem:[%s1487_s7 + $0x1a0] ss:$16 sps:$4 sm:$0xff]  }
  0x3c   : > { %771 = vmatpush1.bf16.msra.mxu0 %v1302_v23  ;;  %824 = vmatpush1.bf16.msra.mxu1 %v1303_v24  ;;  %v1352_v58 = vld [vmem:[%s1487_s7 + $0x1a4] ss:$16 sps:$4 sm:$0xff]   ;;  %v1354_v59 = vld [vmem:[%s1487_s7 + $0x1ac] ss:$16 sps:$4 sm:$0xff]   ;;  %v1357_v61 = vld [vmem:[%s1487_s7 + $0x1a8] ss:$16 sps:$4 sm:$0xff]  }
  0x3d   : > { %772 = vmatprep.subr.bf16.mxu0 %v1304_v25  ;;  %825 = vmatprep.subr.bf16.mxu1 %v1306_v26  ;;  %v1358_v62 = vld [vmem:[%s1487_s7 + $0x1c4] ss:$16 sps:$4 sm:$0xff]   ;;  %v1360_v63 = vld [vmem:[%s1487_s7 + $0x1cc] ss:$16 sps:$4 sm:$0xff]   ;;  %v1362_v0 = vld [vmem:[%s1487_s7 + $0x1c0] ss:$16 sps:$4 sm:$0xff]  }
  0x3e   : > { %v1363_v1 = vld [vmem:[%s1487_s7 + $0x1c8] ss:$16 sps:$4 sm:$0xff]   ;;  %v1364_v2 = vld [vmem:[%s1487_s7 + $0x1e4] ss:$16 sps:$4 sm:$0xff]   ;;  %v1366_v3 = vld [vmem:[%s1487_s7 + $0x1ec] ss:$16 sps:$4 sm:$0xff]  }
  0x3f   : > { %v1368_v4 = vld [vmem:[%s1487_s7 + $0x1e0] ss:$16 sps:$4 sm:$0xff]   ;;  %v1369_v5 = vld [vmem:[%s1487_s7 + $0x1e8] ss:$16 sps:$4 sm:$0xff]   ;;  %v1373_v7 = vld [vmem:[%s1489_s8 + $0x14] ss:$8 sps:$4 sm:$0xff]  }
  0x40   : > { %773 = vmatpush1.bf16.msra.mxu0 %v1308_v27  ;;  %826 = vmatpush1.bf16.msra.mxu1 %v1309_v28  ;;  %v1370_v6 = vld [vmem:[%s1489_s8] ss:$8 sps:$4 sm:$0xff]   ;;  %v1375_v8 = vld [vmem:[%s1489_s8 + $0x10] ss:$8 sps:$4 sm:$0xff]   ;;  %p1226_p11 = scmp.ne.s32.totalorder %s1406_s14, 14 }
  0x41   : > { %774 = vmatprep.subr.bf16.mxu0 %v1310_v29  ;;  %827 = vmatprep.subr.bf16.mxu1 %v1312_v30  ;;  %v338_v9 = vld [vmem:[%s1840_s3] sm:$0xff]  ;;  %v340_v10 = vld [vmem:[%s1840_s3 + $0x10] sm:$0xff]  ;;  %v339_v11 = vld [vmem:[%s1840_s3 + $0x8] sm:$0xff] }
  0x42   : > { %v341_v12 = vld [vmem:[%s1840_s3 + $0x18] sm:$0xff]  ;;  %v342_v15 = vld [vmem:[%s1840_s3 + $0x20] sm:$0xff]  ;;  %v344_v16 = vld [vmem:[%s1840_s3 + $0x30] sm:$0xff] }
  0x43   : > { %v343_v21 = vld [vmem:[%s1840_s3 + $0x28] sm:$0xff]  ;;  %v345_v22 = vld [vmem:[%s1840_s3 + $0x38] sm:$0xff] }
  0x44   : > { %775 = vmatpush1.bf16.msra.mxu0 %v1314_v31  ;;  %828 = vmatpush1.bf16.msra.mxu1 %v1315_v32 }
  0x45   : > { %776 = vmatprep.subr.bf16.mxu0 %v1316_v33  ;;  %829 = vmatprep.subr.bf16.mxu1 %v1318_v34  ;;  %v346_v33 = vld [vmem:[%s1840_s3 + $0x40] sm:$0xff]  ;;  %v348_v34 = vld [vmem:[%s1840_s3 + $0x50] sm:$0xff] }
  0x48   : > { %777 = vmatpush1.bf16.msra.mxu0 %v1320_v35  ;;  %830 = vmatpush1.bf16.msra.mxu1 %v1321_v36  ;;  %v347_v35 = vld [vmem:[%s1840_s3 + $0x48] sm:$0xff]  ;;  %v349_v36 = vld [vmem:[%s1840_s3 + $0x58] sm:$0xff] }
  0x49   : > { %778 = vmatprep.subr.bf16.mxu0 %v1322_v37  ;;  %831 = vmatprep.subr.bf16.mxu1 %v1324_v38 }
  0x4c   : > { %779 = vmatpush1.bf16.msra.mxu0 %v1326_v39  ;;  %832 = vmatpush1.bf16.msra.mxu1 %v1327_v40  ;;  %v350_v39 = vld [vmem:[%s1840_s3 + $0x60] sm:$0xff]  ;;  %v352_v40 = vld [vmem:[%s1840_s3 + $0x70] sm:$0xff] }
  0x4d   : > { %780 = vmatprep.subr.bf16.mxu0 %v1328_v41  ;;  %833 = vmatprep.subr.bf16.mxu1 %v1330_v42 }
  0x50   : > { %781 = vmatpush1.bf16.msra.mxu0 %v1332_v43  ;;  %834 = vmatpush1.bf16.msra.mxu1 %v1333_v44 }
  0x51   : > { %782 = vmatprep.subr.bf16.mxu0 %v1334_v45  ;;  %835 = vmatprep.subr.bf16.mxu1 %v1336_v46  ;;  %v351_v45 = vld [vmem:[%s1840_s3 + $0x68] sm:$0xff]  ;;  %v353_v46 = vld [vmem:[%s1840_s3 + $0x78] sm:$0xff] }
  0x54   : > { %783 = vmatpush1.bf16.msra.mxu0 %v1338_v47  ;;  %836 = vmatpush1.bf16.msra.mxu1 %v1339_v48 }
  0x55   : > { %784 = vmatprep.subr.bf16.mxu0 %v1340_v49  ;;  %837 = vmatprep.subr.bf16.mxu1 %v1342_v50 }
  0x58   : > { %785 = vmatpush1.bf16.msra.mxu0 %v1344_v51  ;;  %838 = vmatpush1.bf16.msra.mxu1 %v1345_v53 }
  0x59   : > { %786 = vmatprep.subr.bf16.mxu0 %v1346_v54  ;;  %839 = vmatprep.subr.bf16.mxu1 %v1348_v55 }
  0x5c   : > { %787 = vmatpush1.bf16.msra.mxu0 %v1350_v56  ;;  %840 = vmatpush1.bf16.msra.mxu1 %v1351_v57  ;;  %v922_v57 = vlaneseq (!%p1226_p11) }
  0x5d   : > { %788 = vmatprep.subr.bf16.mxu0 %v1352_v58  ;;  %841 = vmatprep.subr.bf16.mxu1 %v1354_v59  ;;  %v920_v59 = vld [vmem:[%s1839_s2] sm:$0xf] (!%p1226_p11) }
  0x5e   : > { %v923_v58 = vshrl.u32 (!%p1226_p11), %v922_v57, 7 }
  0x60   : > { %789 = vmatpush1.bf16.msra.mxu0 %v1356_v60  ;;  %842 = vmatpush1.bf16.msra.mxu1 %v1357_v61  ;;  %v924_v61 = vsub.s32 (!%p1226_p11), 0, %v923_v58 }
  0x61   : > { %790 = vmatprep.subr.bf16.mxu0 %v1358_v62  ;;  %843 = vmatprep.subr.bf16.mxu1 %v1360_v63  ;;  %v928_v63 = vsub.s32 (!%p1226_p11), 1, %v923_v58 }
  0x64   : > { %791 = vmatpush1.bf16.msra.mxu0 %v1362_v0  ;;  %844 = vmatpush1.bf16.msra.mxu1 %v1363_v1  ;;  %v932_v0 = vsub.s32 (!%p1226_p11), 2, %v923_v58  ;;  %v936_v1 = vsub.s32 (!%p1226_p11), 3, %v923_v58 }
  0x65   : > { %792 = vmatprep.subr.bf16.mxu0 %v1364_v2  ;;  %845 = vmatprep.subr.bf16.mxu1 %v1366_v3 }
  0x68   : > { %793 = vmatpush1.bf16.msra.mxu0 %v1368_v4  ;;  %846 = vmatpush1.bf16.msra.mxu1 %v1369_v5  ;;  %v925_v5 = vrot.slane (!%p1226_p11), %v920_v59, %v924_v61 }
  0x6b   : > { %795 = vmatmul.mubr.bf16.vlgmr.msra.gmra.mrb[0].mxu0 %v1370_v6  ;;  %848 = vmatmul.mubr.bf16.vlgmr.msra.gmra.mrb[0].mxu1 %v1370_v6  ;;  %v1723_v6 = vrot.slane (!%p1226_p11), %v920_v59, %v928_v63 }
  0x6c   : > { %804 = vmatprep.mubr.bf16.mxu0 %v1373_v7  ;;  %857 = vmatprep.mubr.bf16.mxu1 %v1373_v7  ;;  %v1725_v7 = vrot.slane (!%p1226_p11), %v920_v59, %v932_v0 }
  0x73   : > { %805 = vmatmul.mubr.bf16.gmra.mrb[4].mxu0 %v1375_v8  ;;  %858 = vmatmul.mubr.bf16.gmra.mrb[4].mxu1 %v1375_v8  ;;  %v1727_v8 = vrot.slane (!%p1226_p11), %v920_v59, %v936_v1 }
 0x13e   : > { %v796_v13 = vpop.f32.mrb[0].mxu0  ;;  %v849_v14 = vpop.f32.mrb[0].mxu1 }
 0x13f   : > { %v868_v17 = vadd.f32 %v796_v13, %v338_v9  ;;  %v870_v18 = vadd.f32 %v849_v14, %v340_v10  ;;  %v798_v19 = vpop.f32.mrb[1].mxu0  ;;  %v851_v20 = vpop.f32.mrb[1].mxu1 }
 0x140   : > { %v869_v23 = vadd.f32 %v798_v19, %v339_v11  ;;  %v871_v24 = vadd.f32 %v851_v20, %v341_v12  ;;  %v800_v25 = vpop.f32.mrb[2].mxu0  ;;  %v853_v26 = vpop.f32.mrb[2].mxu1 }
 0x141   : > { %884 = vst [vmem:[%s1840_s3] sm:$0xff] %v868_v17  ;;  %886 = vst [vmem:[%s1840_s3 + $0x10] sm:$0xff] %v870_v18  ;;  %v872_v27 = vadd.f32 %v800_v25, %v342_v15  ;;  %v874_v28 = vadd.f32 %v853_v26, %v344_v16  ;;  %v802_v29 = vpop.f32.mrb[3].mxu0  ;;  %v855_v30 = vpop.f32.mrb[3].mxu1 }
 0x142   : > { %885 = vst [vmem:[%s1840_s3 + $0x8] sm:$0xff] %v869_v23  ;;  %887 = vst [vmem:[%s1840_s3 + $0x18] sm:$0xff] %v871_v24  ;;  %v873_v31 = vadd.f32 %v802_v29, %v343_v21  ;;  %v875_v32 = vadd.f32 %v855_v30, %v345_v22 }
 0x143   : > { %888 = vst [vmem:[%s1840_s3 + $0x20] sm:$0xff] %v872_v27  ;;  %890 = vst [vmem:[%s1840_s3 + $0x30] sm:$0xff] %v874_v28 }
 0x144   : > { %889 = vst [vmem:[%s1840_s3 + $0x28] sm:$0xff] %v873_v31  ;;  %891 = vst [vmem:[%s1840_s3 + $0x38] sm:$0xff] %v875_v32 }
 0x146   : > { %v806_v37 = vpop.f32.mrb[4].mxu0  ;;  %v859_v38 = vpop.f32.mrb[4].mxu1  ;;  %903 = sbr.rel (%p1226_p11) target bundleno = 350 (0x15e), region = 78 }
 0x147   : > { %v876_v41 = vadd.f32 %v806_v37, %v346_v33  ;;  %v878_v42 = vadd.f32 %v859_v38, %v348_v34  ;;  %v808_v43 = vpop.f32.mrb[5].mxu0  ;;  %v861_v44 = vpop.f32.mrb[5].mxu1 }
 0x148   : > { %v877_v47 = vadd.f32 %v808_v43, %v347_v35  ;;  %v879_v48 = vadd.f32 %v861_v44, %v349_v36  ;;  %v810_v49 = vpop.f32.mrb[6].mxu0  ;;  %v863_v50 = vpop.f32.mrb[6].mxu1  ;;  %v904_v60 = vld [vmem:[%s1840_s3] sm:$0xff] (!%p1226_p11)  ;;  %v906_v2 = vld [vmem:[%s1840_s3 + $0x10] sm:$0xff] (!%p1226_p11) }
 0x149   : > { %892 = vst [vmem:[%s1840_s3 + $0x40] sm:$0xff] %v876_v41  ;;  %894 = vst [vmem:[%s1840_s3 + $0x50] sm:$0xff] %v878_v42  ;;  %v880_v51 = vadd.f32 %v810_v49, %v350_v39  ;;  %v882_v52 = vadd.f32 %v863_v50, %v352_v40  ;;  %v812_v53 = vpop.f32.mrb[7].mxu0  ;;  %v865_v54 = vpop.f32.mrb[7].mxu1  ;;  %v905_v62 = vld [vmem:[%s1840_s3 + $0x8] sm:$0xff] (!%p1226_p11)  ;;  %v907_v3 = vld [vmem:[%s1840_s3 + $0x18] sm:$0xff] (!%p1226_p11)  ;;  %v942_v12 = vadd.f32 (!%p1226_p11), %v925_v5, %v904_v60 }
 0x14a   : > { %893 = vst [vmem:[%s1840_s3 + $0x48] sm:$0xff] %v877_v47  ;;  %895 = vst [vmem:[%s1840_s3 + $0x58] sm:$0xff] %v879_v48  ;;  %v881_v55 = vadd.f32 %v812_v53, %v351_v45  ;;  %v883_v56 = vadd.f32 %v865_v54, %v353_v46  ;;  %v908_v4 = vld [vmem:[%s1840_s3 + $0x20] sm:$0xff] (!%p1226_p11)  ;;  %v910_v10 = vld [vmem:[%s1840_s3 + $0x30] sm:$0xff] (!%p1226_p11)  ;;  %v943_v13 = vadd.f32 (!%p1226_p11), %v1723_v6, %v905_v62 }
 0x14b   : > { %896 = vst [vmem:[%s1840_s3 + $0x60] sm:$0xff] %v880_v51  ;;  %898 = vst [vmem:[%s1840_s3 + $0x70] sm:$0xff] %v882_v52  ;;  %v909_v9 = vld [vmem:[%s1840_s3 + $0x28] sm:$0xff] (!%p1226_p11)  ;;  %v911_v11 = vld [vmem:[%s1840_s3 + $0x38] sm:$0xff] (!%p1226_p11)  ;;  %v944_v14 = vadd.f32 (!%p1226_p11), %v1725_v7, %v906_v2  ;;  %v945_v15 = vadd.f32 (!%p1226_p11), %v1727_v8, %v907_v3  ;;  %v946_v16 = vadd.f32 (!%p1226_p11), %v925_v5, %v908_v4  ;;  %vm958_vm0 = vcmp.ge.f32.partialorder (!%p1226_p11), %v942_v12, 0.0 }
 0x14c   : > { %897 = vst [vmem:[%s1840_s3 + $0x68] sm:$0xff] %v881_v55  ;;  %899 = vst [vmem:[%s1840_s3 + $0x78] sm:$0xff] %v883_v56  ;;  %v947_v17 = vadd.f32 (!%p1226_p11), %v1723_v6, %v909_v9  ;;  %v948_v18 = vadd.f32 (!%p1226_p11), %v1725_v7, %v910_v10  ;;  %v949_v19 = vadd.f32 (!%p1226_p11), %v1727_v8, %v911_v11  ;;  %v974_v20 = vmul.f32 (!%p1226_p11), 0.2, %v942_v12 }
 0x14d   : > { %vm959_vm1 = vcmp.ge.f32.partialorder %v943_v13, 0.0  ;;  %v975_v21 = vmul.f32 0.2, %v943_v13  ;;  %vm960_vm2 = vcmp.ge.f32.partialorder %v944_v14, 0.0  ;;  %v976_v22 = vmul.f32 0.2, %v944_v14 }
 0x14e   : > { %vm961_vm3 = vcmp.ge.f32.partialorder %v945_v15, 0.0  ;;  %v977_v23 = vmul.f32 0.2, %v945_v15  ;;  %v990_v24 = vsel %vm958_vm0, %v942_v12, %v974_v20  ;;  %vm962_vm4 = vcmp.ge.f32.partialorder %v946_v16, 0.0 }
 0x14f   : > { %v991_v25 = vsel %vm959_vm1, %v943_v13, %v975_v21  ;;  %v978_v26 = vmul.f32 0.2, %v946_v16  ;;  %1006 = vst [vmem:[%s1840_s3] sm:$0xff] %v990_v24  ;;  %v992_v29 = vsel %vm960_vm2, %v944_v14, %v976_v22  ;;  %vm963_vm5 = vcmp.ge.f32.partialorder %v947_v17, 0.0 }
 0x150   : > { %v912_v27 = vld [vmem:[%s1840_s3 + $0x40] sm:$0xff]  ;;  %1007 = vst [vmem:[%s1840_s3 + $0x8] sm:$0xff] %v991_v25  ;;  %v993_v30 = vsel %vm961_vm3, %v945_v15, %v977_v23  ;;  %v979_v31 = vmul.f32 0.2, %v947_v17  ;;  %v914_v32 = vld [vmem:[%s1840_s3 + $0x50] sm:$0xff]  ;;  %1008 = vst [vmem:[%s1840_s3 + $0x10] sm:$0xff] %v992_v29 }
 0x151   : > { %v913_v28 = vld [vmem:[%s1840_s3 + $0x48] sm:$0xff]  ;;  %v915_v33 = vld [vmem:[%s1840_s3 + $0x58] sm:$0xff]  ;;  %1009 = vst [vmem:[%s1840_s3 + $0x18] sm:$0xff] %v993_v30  ;;  %v994_v35 = vsel %vm962_vm4, %v946_v16, %v978_v26  ;;  %vm964_vm6 = vcmp.ge.f32.partialorder %v948_v18, 0.0  ;;  %v980_v36 = vmul.f32 0.2, %v948_v18  ;;  %v950_v39 = vadd.f32 %v925_v5, %v912_v27 }
 0x152   : > { %v916_v34 = vld [vmem:[%s1840_s3 + $0x60] sm:$0xff]  ;;  %vm965_vm7 = vcmp.ge.f32.partialorder %v949_v19, 0.0  ;;  %1010 = vst [vmem:[%s1840_s3 + $0x20] sm:$0xff] %v994_v35  ;;  %v995_v37 = vsel %vm963_vm5, %v947_v17, %v979_v31  ;;  %v981_v38 = vmul.f32 0.2, %v949_v19  ;;  %v951_v40 = vadd.f32 %v1723_v6, %v913_v28  ;;  %v918_v48 = vld [vmem:[%s1840_s3 + $0x70] sm:$0xff] }
 0x153   : > { %1011 = vst [vmem:[%s1840_s3 + $0x28] sm:$0xff] %v995_v37  ;;  %v996_v41 = vsel %vm964_vm6, %v948_v18, %v980_v36  ;;  %v952_v42 = vadd.f32 %v1725_v7, %v914_v32  ;;  %v953_v43 = vadd.f32 %v1727_v8, %v915_v33  ;;  %v954_v44 = vadd.f32 %v925_v5, %v916_v34  ;;  %v917_v45 = vld [vmem:[%s1840_s3 + $0x68] sm:$0xff]  ;;  %v919_v49 = vld [vmem:[%s1840_s3 + $0x78] sm:$0xff] }
 0x154   : > { %1012 = vst [vmem:[%s1840_s3 + $0x30] sm:$0xff] %v996_v41  ;;  %v997_v46 = vsel %vm965_vm7, %v949_v19, %v981_v38  ;;  %vm966_vm8 = vcmp.ge.f32.partialorder %v950_v39, 0.0  ;;  %v982_v47 = vmul.f32 0.2, %v950_v39  ;;  %vm967_vm9 = vcmp.ge.f32.partialorder %v951_v40, 0.0 }
 0x155   : > { %1013 = vst [vmem:[%s1840_s3 + $0x38] sm:$0xff] %v997_v46  ;;  %v983_v50 = vmul.f32 0.2, %v951_v40  ;;  %vm968_vm10 = vcmp.ge.f32.partialorder %v952_v42, 0.0  ;;  %v984_v51 = vmul.f32 0.2, %v952_v42  ;;  %v955_v57 = vadd.f32 %v1723_v6, %v917_v45 }
 0x156   : > { %vm969_vm11 = vcmp.ge.f32.partialorder %v953_v43, 0.0  ;;  %v998_v52 = vsel %vm966_vm8, %v950_v39, %v982_v47  ;;  %v985_v53 = vmul.f32 0.2, %v953_v43  ;;  %vm970_vm12 = vcmp.ge.f32.partialorder %v954_v44, 0.0 }
 0x157   : > { %v986_v54 = vmul.f32 0.2, %v954_v44  ;;  %1014 = vst [vmem:[%s1840_s3 + $0x40] sm:$0xff] %v998_v52  ;;  %v999_v55 = vsel %vm967_vm9, %v951_v40, %v983_v50  ;;  %v1000_v56 = vsel %vm968_vm10, %v952_v42, %v984_v51  ;;  %v956_v58 = vadd.f32 %v1725_v7, %v918_v48 }
 0x158   : > { %1015 = vst [vmem:[%s1840_s3 + $0x48] sm:$0xff] %v999_v55  ;;  %1016 = vst [vmem:[%s1840_s3 + $0x50] sm:$0xff] %v1000_v56  ;;  %v1001_v59 = vsel %vm969_vm11, %v953_v43, %v985_v53  ;;  %v957_v61 = vadd.f32 %v1727_v8, %v919_v49  ;;  %vm971_vm13 = vcmp.ge.f32.partialorder %v955_v57, 0.0  ;;  %v987_v62 = vmul.f32 0.2, %v955_v57 }
 0x159   : > { %v1002_v60 = vsel %vm970_vm12, %v954_v44, %v986_v54  ;;  %1017 = vst [vmem:[%s1840_s3 + $0x58] sm:$0xff] %v1001_v59  ;;  %vm972_vm14 = vcmp.ge.f32.partialorder %v956_v58, 0.0  ;;  %v988_v63 = vmul.f32 0.2, %v956_v58 }
 0x15a   : > { %1018 = vst [vmem:[%s1840_s3 + $0x60] sm:$0xff] %v1002_v60  ;;  %vm973_vm15 = vcmp.ge.f32.partialorder %v957_v61, 0.0  ;;  %v989_v0 = vmul.f32 0.2, %v957_v61  ;;  %v1003_v1 = vsel %vm971_vm13, %v955_v57, %v987_v62 }
 0x15b   : > { %v1004_v2 = vsel %vm972_vm14, %v956_v58, %v988_v63  ;;  %1019 = vst [vmem:[%s1840_s3 + $0x68] sm:$0xff] %v1003_v1 }
 0x15c   : > { %1020 = vst [vmem:[%s1840_s3 + $0x70] sm:$0xff] %v1004_v2  ;;  %v1005_v3 = vsel %vm973_vm15, %v957_v61, %v989_v0 }
 0x15d   : > { %1021 = vst [vmem:[%s1840_s3 + $0x78] sm:$0xff] %v1005_v3 }
 0x15e PF: > { %s13_s16 = sadd.s32 1, %s1414_s16   ;;  %s1841_s12 = smov %s1402_s13 }
 0x15f   : > { %p10_p12 = scmp.ge.s32.totalorder %s13_s16, 17   ;;  %s1842_s13 = smov %s1472_s20 }
 0x160   : > { %s1843_s14 = smov %s1410_s15  ;;  %s1844_s15 = smov %s1846_s17 }
 0x161   :  { %12 = sbr.rel (!%p10_p12) target bundleno = 3 (0x3), region = 119 }

// kernel: progressive_discriminator.13
= control target key start
LH: loop header
LB: loop body
LE: loop exit
PB: predicated region body
PF: predicated region fallthrough
CT: control target
= control target key end

     0   :  { %s706_s12 = smov 0   ;;  %s708_s13 = smov 0   ;;  %s781_s0 = inlined_call_operand.vmem [shape: bf16[8,1792], index: 0, kind: input, shape index: {}]   ;;  %s782_s1 = inlined_call_operand.vmem [shape: bf16[1792,128], index: 1, kind: input, shape index: {}]   ;;  %s783_s2 = inlined_call_operand.vmem [shape: f32[1,128], index: 2, kind: input, shape index: {}]   ;;  %s784_s3 = inlined_call_operand.vmem [shape: f32[8,128], index: 3, kind: output, shape index: {}]  }
   0x1   :  { %s710_s14 = smov 0  }
   0x2 LB: > { %s25_s15 = sadd.s32 1, %s679_s13  ;;  %p567_p0 = scmp.ge.s32.totalorder %s683_s14, 1  ;;  %s683_s14 = sphi %s710_s14, %s13_s14   ;;  %s679_s13 = sphi %s708_s13, %s786_s13   ;;  %s675_s12 = sphi %s706_s12, %s785_s12  }
   0x3   : > { %p26_p1 = scmp.ge.s32.totalorder %s25_s15, 7  ;;  %p189_p2 = scmp.lt.s32.totalorder %s683_s14, 8 }
   0x5   : > { %s788_s15 = smov (%p26_p1, %s25_s15), 0  ;;  %p190_p3 = pnand %p567_p0, %p189_p2 }
   0x6   : > { %s568_s16 = sshll.u32 (!%p190_p3), %s675_s12, 1  ;;  %s570_s17 = sshll.u32 (!%p190_p3), %s675_s12, 5 }
   0x7   : > { %193 = sbr.rel (%p190_p3) target bundleno = 285 (0x11d), region = 32  ;;  %p233_p4 = scmp.lt.s32.totalorder (!%p190_p3), %s568_s16, 13 }
   0x8   : > { %p241_p5 = scmp.lt.s32.totalorder (!%p190_p3), %s570_s17, 223  ;;  %p572_p6 = scmp.ne.s32.totalorder (!%p190_p3), %s675_s12, 0 }
   0xe   : > { %s790_s16 = smov (!%p233_p4, %s568_s16), 13  ;;  %s792_s17 = smov (!%p241_p5, %s570_s17), 223 }
   0xf   : > { %s569_s18 = sshll.u32 %s790_s16, 2  ;;  %s571_s22 = sshll.u32 %s792_s17, 2  ;;  %v685_v0 = vmov (!%p572_p6), 0.0  }
  0x10   : > { %s238_s21 = scalar_lea.vmem %s781_s0, %s569_s18  ;;  %s734_s25 = scalar_lea.vmem %s782_s1, %s571_s22  ;;  %264 = vst [vmem:[%s784_s3] sm:$0xff] (!%p572_p6), %v685_v0 }
  0x11   : > { %263 = sbr.rel (%p572_p6) target bundleno = 24 (0x18), region = 36 }
  0x18 PF: > { %v643_v1 = vld [vmem:[%s734_s25 + $0x40] sm:$0xff]   ;;  %v645_v3 = vld [vmem:[%s734_s25 + $0x48] sm:$0xff]   ;;  %v647_v5 = vld [vmem:[%s734_s25 + $0x50] sm:$0xff]   ;;  %p591_p7 = scmp.ne.s32.totalorder %s675_s12, 6 }
  0x19   : > { %v644_v2 = vld [vmem:[%s734_s25] sm:$0xff]   ;;  %596 = vmatprep.subr.bf16.mxu0 %v643_v1  ;;  %v646_v4 = vld [vmem:[%s734_s25 + $0x8] sm:$0xff]   ;;  %v648_v6 = vld [vmem:[%s734_s25 + $0x10] sm:$0xff]  }
  0x1a   : > { %597 = vmatpush3.bf16.msra.mxu0 %v644_v2  ;;  %v649_v7 = vld [vmem:[%s734_s25 + $0x58] sm:$0xff]   ;;  %v651_v9 = vld [vmem:[%s734_s25 + $0x60] sm:$0xff]   ;;  %v653_v11 = vld [vmem:[%s734_s25 + $0x68] sm:$0xff]  }
  0x1b   : > { %598 = vmatprep.subr.bf16.mxu0 %v645_v3  ;;  %v650_v8 = vld [vmem:[%s734_s25 + $0x18] sm:$0xff]   ;;  %v652_v10 = vld [vmem:[%s734_s25 + $0x20] sm:$0xff]   ;;  %v654_v14 = vld [vmem:[%s734_s25 + $0x28] sm:$0xff]  }
  0x1c   : > { %v266_v12 = vld [vmem:[%s238_s21] sm:$0xff]  ;;  %v655_v15 = vld [vmem:[%s734_s25 + $0x70] sm:$0xff]   ;;  %v657_v17 = vld [vmem:[%s734_s25 + $0x78] sm:$0xff]  }
  0x1d   : > { %v574_v13 = vcombine.high %v266_v12, %v266_v12  ;;  %v656_v16 = vld [vmem:[%s734_s25 + $0x30] sm:$0xff]   ;;  %v658_v18 = vld [vmem:[%s734_s25 + $0x38] sm:$0xff]   ;;  %v573_v19 = vcombine.low %v266_v12, %v266_v12  ;;  %v265_v21 = vld [vmem:[%s784_s3] sm:$0xff] }
  0x1e   : > { %599 = vmatpush3.bf16.msra.mxu0 %v646_v4  ;;  %v592_v28 = vld [vmem:[%s783_s2] ss:$0 sm:$0xff] (!%p591_p7) }
  0x1f   : > { %600 = vmatprep.subr.bf16.mxu0 %v647_v5  ;;  %434 = vmatprep.mubr.bf16.mxu0 %v574_v13 }
  0x22   : > { %601 = vmatpush3.bf16.msra.mxu0 %v648_v6 }
  0x23   : > { %602 = vmatprep.subr.bf16.mxu0 %v649_v7 }
  0x26   : > { %603 = vmatpush3.bf16.msra.mxu0 %v650_v8 }
  0x27   : > { %604 = vmatprep.subr.bf16.mxu0 %v651_v9 }
  0x2a   : > { %605 = vmatpush3.bf16.msra.mxu0 %v652_v10 }
  0x2b   : > { %606 = vmatprep.subr.bf16.mxu0 %v653_v11 }
  0x2e   : > { %607 = vmatpush3.bf16.msra.mxu0 %v654_v14 }
  0x2f   : > { %608 = vmatprep.subr.bf16.mxu0 %v655_v15 }
  0x32   : > { %609 = vmatpush3.bf16.msra.mxu0 %v656_v16 }
  0x33   : > { %610 = vmatprep.subr.bf16.mxu0 %v657_v17 }
  0x36   : > { %611 = vmatpush3.bf16.msra.mxu0 %v658_v18 }
  0x39   : > { %435 = vmatmul.mubr.bf16.vlgmr.msra.gmra.mrb[0].mxu0 %v573_v19 }
 0x10c   : > { %v612_v20 = vpop.f32.mrb[0].mxu0  ;;  %447 = sbr.rel (%p591_p7) target bundleno = 285 (0x11d), region = 40 }
 0x10d   : > { %v613_v22 = vpop.f32.mrb[1].mxu0 }
 0x10e   : > { %v614_v23 = vadd.f32 %v613_v22, %v612_v20  ;;  %v615_v24 = vpop.f32.mrb[2].mxu0 }
 0x10f   : > { %v616_v25 = vpop.f32.mrb[3].mxu0 }
 0x110   : > { %v442_v26 = vadd.f32 %v614_v23, %v265_v21 }
 0x112   : > { %443 = vst [vmem:[%s784_s3] sm:$0xff] %v442_v26 }
 0x119   : > { %v448_v27 = vld [vmem:[%s784_s3] sm:$0xff] }
 0x11a   : > { %v456_v29 = vadd.f32 %v592_v28, %v448_v27 }
 0x11c   : > { %457 = vst [vmem:[%s784_s3] sm:$0xff] %v456_v29 }
 0x11d PF: > { %s13_s14 = sadd.s32 1, %s683_s14   ;;  %s785_s12 = smov %s679_s13 }
 0x11e   : > { %p10_p8 = scmp.ge.s32.totalorder %s13_s14, 9   ;;  %s786_s13 = smov %s788_s15 }
 0x120   :  { %12 = sbr.rel (!%p10_p8) target bundleno = 2 (0x2), region = 76 }

</bundles_post_ra>
